<compile_context>
chip_gen: v7x
topology: tpu7x:2x2x1
jax: 0.10.0
libtpu: 0.0.40
codegen_flags: <defaults>
</compile_context>

<pallas_src>
import functools

import jax
import jax.numpy as jnp
from jax.experimental import pallas as pl
from jax.experimental.pallas import tpu as pltpu


def _round_up(x, m):
    return ((x + m - 1) // m) * m


# ----------------------------------------------------------------------------
# Kernel 1: one-time codebook preparation.
#   codebook = embedding @ W_proj^T   (nn.Linear(e_dim, e_dim, bias=False))
#   e_sq     = sum(codebook**2, axis=1)  as a (1, K) row
# ----------------------------------------------------------------------------
def _proj_kernel(emb_ref, w_ref, cb_ref, esq_ref):
    # Contract on the last dim of both operands -> embedding @ W^T, no explicit
    # transpose of the weight.
    cb = jax.lax.dot_general(
        emb_ref[...], w_ref[...],
        dimension_numbers=(((1,), (1,)), ((), ())),
        preferred_element_type=jnp.float32,
    )
    cb_ref[...] = cb
    esq_ref[...] = jnp.sum(cb * cb, axis=1)[None, :]


def project_codebook(embedding, w_proj):
    K, D = embedding.shape
    return pl.pallas_call(
        _proj_kernel,
        out_shape=(
            jax.ShapeDtypeStruct((K, D), jnp.float32),
            jax.ShapeDtypeStruct((1, K), jnp.float32),
        ),
        in_specs=[
            pl.BlockSpec((K, D), lambda: (0, 0)),
            pl.BlockSpec((D, D), lambda: (0, 0)),
        ],
        out_specs=(
            pl.BlockSpec((K, D), lambda: (0, 0)),
            pl.BlockSpec((1, K), lambda: (0, 0)),
        ),
    )(embedding, w_proj)


# ----------------------------------------------------------------------------
# Kernel 2: vector-quantization hot path.  For each tile of TM tokens:
#   d    = ||e||^2 - 2 z @ e^T      (||z||^2 dropped: constant over codebook)
#   idx  = first argmin_k d         (torch.argmin tie-break)
#   zq   = one_hot(idx) @ codebook  (MXU gather)
#   err  = sum((zq - z)^2)          (per-tile partial, padded rows masked)
# ----------------------------------------------------------------------------
def _vq_kernel(z_ref, cb_ref, esq_ref, idx_ref, zq_ref, err_ref, *, n_valid):
    z = z_ref[...]                                   # (TM, D) f32
    cb = cb_ref[...]                                 # (K,  D) f32
    K = cb.shape[0]
    tm = z.shape[0]

    # cross = z @ cb^T via dot_general (no per-step transpose of the codebook)
    cross = jax.lax.dot_general(
        z, cb, dimension_numbers=(((1,), (1,)), ((), ())),
        preferred_element_type=jnp.float32,
    )                                                # (TM, K)
    # TODO(synk): optional bf16 cast of the cross matmul (v6e/v7x MXU) skipped
    # to keep argmin bit-faithful to the f32 reference.
    d = esq_ref[...] - 2.0 * cross                   # (TM, K), (1,K) broadcast

    # first-minimum argmin along the codebook axis (matches torch.argmin)
    min_d = jnp.min(d, axis=1, keepdims=True)        # (TM, 1)
    iota = jax.lax.broadcasted_iota(jnp.int32, d.shape, 1)
    idx = jnp.min(jnp.where(d == min_d, iota, K), axis=1)        # (TM,)
    idx_ref[...] = idx[None, :].astype(jnp.int32)    # lane-dense (1, TM) store

    # gather codebook rows via one-hot matmul (MXU)
    one_hot = (iota == idx[:, None]).astype(jnp.float32)         # (TM, K)
    zq = jnp.dot(one_hot, cb, preferred_element_type=jnp.float32)
    zq_ref[...] = zq

    diff = zq - z
    if n_valid is not None:                          # mask padded tail tokens
        rows = pl.program_id(0) * tm + jax.lax.broadcasted_iota(
            jnp.int32, (tm, 1), 0)
        diff = jnp.where(rows < n_valid, diff, 0.0)
    err_ref[...] = jnp.sum(diff * diff).reshape(1, 1, 1)


def vq_forward_flat(z_flat, codebook, e_sq, *, tm=None):
    """z_flat: (N, D) f32; codebook: (K, D) f32; e_sq: (1, K) f32."""
    N, D = z_flat.shape
    K, _ = codebook.shape

    if tm is None:
        # 512-token tiles (sweet spot per review); smaller inputs use one tile
        # rounded up to a multiple of 128 for lane-dense index stores.
        tm = 512 if N >= 512 else _round_up(N, 128)
    n_pad = _round_up(N, tm)
    if n_pad != N:
        z_flat = jnp.pad(z_flat, ((0, n_pad - N), (0, 0)))
    num_tiles = n_pad // tm
    n_valid = None if n_pad == N else N              # static mask switch

    kernel = functools.partial(_vq_kernel, n_valid=n_valid)

    idx_row, zq_pad, err_parts = pl.pallas_call(
        kernel,
        out_shape=(
            jax.ShapeDtypeStruct((1, n_pad), jnp.int32),       # lane-dense idx
            jax.ShapeDtypeStruct((n_pad, D), jnp.float32),
            jax.ShapeDtypeStruct((num_tiles, 1, 1), jnp.float32),  # partials
        ),
        grid_spec=pltpu.PrefetchScalarGridSpec(
            num_scalar_prefetch=0,
            grid=(num_tiles,),
            in_specs=[
                pl.BlockSpec((tm, D), lambda i: (i, 0)),
                pl.BlockSpec((K, D), lambda i: (0, 0)),   # constant block
                pl.BlockSpec((1, K), lambda i: (0, 0)),   # constant block
            ],
            out_specs=(
                pl.BlockSpec((1, tm), lambda i: (0, i)),
                pl.BlockSpec((tm, D), lambda i: (i, 0)),
                pl.BlockSpec((1, 1, 1), lambda i: (i, 0, 0)),
            ),
        ),
        compiler_params=pltpu.CompilerParams(
            dimension_semantics=("parallel",),        # megacore-friendly
            vmem_limit_bytes=48 * 1024 * 1024,
        ),
    )(z_flat, codebook, e_sq)

    idx = idx_row[0, :N]
    zq = zq_pad[:N]
    return idx, zq, err_parts


# ----------------------------------------------------------------------------
# Module-level wrapper (parameter setup + layout glue in plain JAX)
# ----------------------------------------------------------------------------
class VectorQuantizerPallas:
    def __init__(self, codebook_size=1024, token_size=256,
                 commitment_cost=0.25, use_l2_norm=False, seed=0):
        assert not use_l2_norm, "use_l2_norm path not enabled"
        # TODO(synk): l2-normalized path (F.normalize) not implemented; default
        # use_l2_norm=False matches the module's default configuration.
        self.n_e = codebook_size
        self.e_dim = token_size
        self.commitment_cost = commitment_cost
        key = jax.random.PRNGKey(seed)
        # nn.Embedding weight ~ U(-1/codebook_size, 1/codebook_size)
        self.embedding = jax.random.uniform(
            key, (codebook_size, token_size), jnp.float32,
            minval=-1.0 / codebook_size, maxval=1.0 / codebook_size)
        # nn.Linear(e_dim, e_dim, bias=False) with identity init
        self.w_proj = jnp.eye(token_size, dtype=jnp.float32)

    @functools.partial(jax.jit, static_argnums=0)
    def __call__(self, x):
        # x: NCHW float
        x = x.astype(jnp.float32)
        B, C, H, W = x.shape
        assert C == self.e_dim
        z = jnp.transpose(x, (0, 2, 3, 1))            # b h w c
        z_flat = z.reshape(-1, C)                     # (B*H*W, C)
        N = z_flat.shape[0]

        codebook, e_sq = project_codebook(self.embedding, self.w_proj)
        idx, zq_flat, err_parts = vq_forward_flat(z_flat, codebook, e_sq)

        sq_err = jnp.sum(err_parts)                   # reduce per-tile partials
        mse = sq_err / jnp.float32(N * C)
        commitment_loss = self.commitment_cost * mse
        codebook_loss = mse
        loss = commitment_loss + codebook_loss

        # straight-through: forward value of z + (zq - z).detach() is zq
        zq = zq_flat.reshape(B, H, W, C)
        zq_nchw = jnp.transpose(zq, (0, 3, 1, 2))     # back to b c h w
        result = dict(
            quantizer_loss=loss,
            commitment_loss=commitment_loss,
            codebook_loss=codebook_loss,
            min_encoding_indices=idx.reshape(B, H, W),
        )
        return zq_nchw, result


# ----------------------------------------------------------------------------
# Pure-JAX reference (for correctness check) — follows the PyTorch math exactly
# ----------------------------------------------------------------------------
def reference_forward(x, embedding, w_proj, commitment_cost):
    x = x.astype(jnp.float32)
    B, C, H, W = x.shape
    z = jnp.transpose(x, (0, 2, 3, 1))
    zf = z.reshape(-1, C)
    hi = jax.lax.Precision.HIGHEST
    cb = jnp.dot(embedding, w_proj.T, precision=hi)
    d = (jnp.sum(zf ** 2, 1, keepdims=True) + jnp.sum(cb ** 2, 1)[None, :]
         - 2.0 * jnp.dot(zf, cb.T, precision=hi))
    idx = jnp.argmin(d, axis=1)
    zq = cb[idx]
    mse = jnp.mean((zq - zf) ** 2)
    loss = commitment_cost * mse + mse
    zq_nchw = jnp.transpose(zq.reshape(B, H, W, C), (0, 3, 1, 2))
    return zq_nchw, idx.reshape(B, H, W), loss, d, cb


if __name__ == "__main__":
    codebook_size = 256
    token_size = 128
    B, H, W = 2, 8, 8

    vq = VectorQuantizerPallas(codebook_size=codebook_size,
                               token_size=token_size,
                               commitment_cost=0.25)

    key = jax.random.PRNGKey(0)
    x = jax.random.normal(key, (B, token_size, H, W), jnp.float32)

    zq, res = vq(x)
    jax.block_until_ready(zq)
    jax.block_until_ready(res["quantizer_loss"])

    zq_ref, idx_ref, loss_ref, d_ref, cb_ref = reference_forward(
        x, vq.embedding, vq.w_proj, 0.25)

    idx_k = res["min_encoding_indices"].reshape(-1)
    idx_r = idx_ref.reshape(-1)

    # indices must match, or be a genuine numerical near-tie in the reference
    # distance matrix (tie-breaks can differ under reordered f32 arithmetic).
    d_at_k = jnp.take_along_axis(d_ref, idx_k[:, None].astype(jnp.int32), 1)[:, 0]
    d_at_r = jnp.take_along_axis(d_ref, idx_r[:, None].astype(jnp.int32), 1)[:, 0]
    ok_idx = (idx_k == idx_r) | (jnp.abs(d_at_k - d_at_r) <= 1e-3)
    assert bool(jnp.all(ok_idx)), "index mismatch beyond tie tolerance"

    # quantized values must be the (projected) codebook rows at the kernel's
    # own indices (checks projection + one-hot gather exactly).
    zq_flat_k = jnp.transpose(zq, (0, 2, 3, 1)).reshape(-1, token_size)
    assert jnp.allclose(zq_flat_k, cb_ref[idx_k], atol=1e-5), "z_quantized mismatch"

    # loss (robust to near-tie flips and accumulation-order differences)
    assert jnp.allclose(res["quantizer_loss"], loss_ref,
                        rtol=1e-4, atol=1e-6), "loss mismatch"

    print("KERNEL_OK")
</pallas_src>

<mosaic_0001>
module attributes {stable_mosaic.version = 11 : i64} {
  func.func @_proj_kernel(%arg0: memref<256x128xf32, #tpu.memory_space<vmem>>, %arg1: memref<128x128xf32, #tpu.memory_space<vmem>>, %arg2: memref<256x128xf32, #tpu.memory_space<vmem>>, %arg3: memref<1x256xf32, #tpu.memory_space<vmem>>) attributes {dimension_semantics = [], scalar_prefetch = 0 : i64, scratch_operands = 0 : i64, tpu.core_type = #tpu.core_type<tc>} {
    %c0 = arith.constant 0 : index
    %c0_0 = arith.constant 0 : index
    %0 = vector.load %arg0[%c0, %c0_0] : memref<256x128xf32, #tpu.memory_space<vmem>>, vector<256x128xf32>
    %c0_1 = arith.constant 0 : index
    %c0_2 = arith.constant 0 : index
    %1 = vector.load %arg1[%c0_1, %c0_2] : memref<128x128xf32, #tpu.memory_space<vmem>>, vector<128x128xf32>
    %cst = arith.constant dense<0.000000e+00> : vector<256x128xf32>
    %2 = tpu.matmul %0, %1, %cst {dimension_numbers = #tpu.dot_dimension_numbers<[1], [1], [0], [0], [0, 0, 1, 0], [], []>} : vector<256x128xf32>, vector<128x128xf32>, vector<256x128xf32> -> vector<256x128xf32>
    %c0_3 = arith.constant 0 : index
    %c0_4 = arith.constant 0 : index
    %3 = vector.load %arg2[%c0_3, %c0_4] : memref<256x128xf32, #tpu.memory_space<vmem>>, vector<256x128xf32>
    tpu.vector_store %arg2[%c0_3, %c0_4], %2 {strides = array<i32>} : memref<256x128xf32, #tpu.memory_space<vmem>>, vector<256x128xf32>,
    %4 = arith.mulf %2, %2 : vector<256x128xf32>
    %cst_5 = arith.constant dense<0.000000e+00> : vector<256xf32>
    %5 = vector.multi_reduction <add>, %4, %cst_5 [1] : vector<256x128xf32> to vector<256xf32>
    %6 = vector.shape_cast %5 : vector<256xf32> to vector<1x256xf32>
    %c0_6 = arith.constant 0 : index
    %c0_7 = arith.constant 0 : index
    %7 = vector.load %arg3[%c0_6, %c0_7] : memref<1x256xf32, #tpu.memory_space<vmem>>, vector<1x256xf32>
    tpu.vector_store %arg3[%c0_6, %c0_7], %6 {strides = array<i32>} : memref<1x256xf32, #tpu.memory_space<vmem>>, vector<1x256xf32>,
    return
  }
}

module attributes {stable_mosaic.version = 11 : i64} {
  func.func @_vq_kernel(%arg0: i32, %arg1: memref<128x128xf32, #tpu.memory_space<vmem>>, %arg2: memref<256x128xf32, #tpu.memory_space<vmem>>, %arg3: memref<1x256xf32, #tpu.memory_space<vmem>>, %arg4: memref<1x128xi32, #tpu.memory_space<vmem>>, %arg5: memref<128x128xf32, #tpu.memory_space<vmem>>, %arg6: memref<1x1x1xf32, #tpu.memory_space<vmem>>) attributes {dimension_semantics = [#tpu.dimension_semantics<parallel>], iteration_bounds = array<i64: 1>, scalar_prefetch = 0 : i64, scratch_operands = 0 : i64, tpu.core_type = #tpu.core_type<tc>, window_params = [{transform_indices = @transform_0, window_bounds = array<i64: 128, 128>}, {pipeline_mode = #tpu.pipeline_mode<synchronous>, transform_indices = @transform_1, window_bounds = array<i64: 256, 128>}, {pipeline_mode = #tpu.pipeline_mode<synchronous>, transform_indices = @transform_2, window_bounds = array<i64: 1, 256>}, {transform_indices = @transform_3, window_bounds = array<i64: 1, 128>}, {transform_indices = @transform_4, window_bounds = array<i64: 128, 128>}, {transform_indices = @transform_5, window_bounds = array<i64: 1, 1, 1>}]} {
    %c0 = arith.constant 0 : index
    %c0_0 = arith.constant 0 : index
    %0 = vector.load %arg1[%c0, %c0_0] : memref<128x128xf32, #tpu.memory_space<vmem>>, vector<128x128xf32>
    %c0_1 = arith.constant 0 : index
    %c0_2 = arith.constant 0 : index
    %1 = vector.load %arg2[%c0_1, %c0_2] : memref<256x128xf32, #tpu.memory_space<vmem>>, vector<256x128xf32>
    %cst = arith.constant dense<0.000000e+00> : vector<128x256xf32>
    %2 = tpu.matmul %0, %1, %cst {dimension_numbers = #tpu.dot_dimension_numbers<[1], [1], [0], [0], [0, 0, 1, 0], [], []>} : vector<128x128xf32>, vector<256x128xf32>, vector<128x256xf32> -> vector<128x256xf32>
    %c0_3 = arith.constant 0 : index
    %c0_4 = arith.constant 0 : index
    %3 = vector.load %arg3[%c0_3, %c0_4] : memref<1x256xf32, #tpu.memory_space<vmem>>, vector<1x256xf32>
    %cst_5 = arith.constant 2.000000e+00 : f32
    %4 = vector.broadcast %cst_5 : f32 to vector<128x256xf32>
    %5 = arith.mulf %4, %2 : vector<128x256xf32>
    %6 = vector.broadcast %3 : vector<1x256xf32> to vector<128x256xf32>
    %7 = arith.subf %6, %5 : vector<128x256xf32>
    %cst_6 = arith.constant dense<0x7F800000> : vector<128xf32>
    %8 = vector.multi_reduction <minimumf>, %7, %cst_6 [1] : vector<128x256xf32> to vector<128xf32>
    %9 = vector.shape_cast %8 : vector<128xf32> to vector<128x1xf32>
    %10 = tpu.iota {dimensions = array<i32: 1>} : vector<128x256xi32>
    %11 = vector.broadcast %9 : vector<128x1xf32> to vector<128x256xf32>
    %12 = arith.cmpf oeq, %7, %11 : vector<128x256xf32>
    %c256_i32 = arith.constant 256 : i32
    %13 = vector.broadcast %c256_i32 : i32 to vector<128x256xi32>
    %14 = arith.select %12, %10, %13 : vector<128x256xi1>, vector<128x256xi32>
    %cst_7 = arith.constant dense<2147483647> : vector<128xi32>
    %15 = vector.multi_reduction <minsi>, %14, %cst_7 [1] : vector<128x256xi32> to vector<128xi32>
    %16 = vector.shape_cast %15 : vector<128xi32> to vector<1x128xi32>
    %c0_8 = arith.constant 0 : index
    %c0_9 = arith.constant 0 : index
    %17 = vector.load %arg4[%c0_8, %c0_9] : memref<1x128xi32, #tpu.memory_space<vmem>>, vector<1x128xi32>
    tpu.vector_store %arg4[%c0_8, %c0_9], %16 {strides = array<i32>} : memref<1x128xi32, #tpu.memory_space<vmem>>, vector<1x128xi32>,
    %18 = vector.shape_cast %15 : vector<128xi32> to vector<128x1xi32>
    %19 = vector.broadcast %18 : vector<128x1xi32> to vector<128x256xi32>
    %20 = arith.cmpi eq, %10, %19 : vector<128x256xi32>
    %21 = arith.extui %20 : vector<128x256xi1> to vector<128x256xi32>
    %22 = arith.sitofp %21 : vector<128x256xi32> to vector<128x256xf32>
    %cst_10 = arith.constant dense<0.000000e+00> : vector<128x128xf32>
    %23 = tpu.matmul %22, %1, %cst_10 {dimension_numbers = #tpu.dot_dimension_numbers<[1], [0], [0], [1], [0, 0, 1, 1], [], []>} : vector<128x256xf32>, vector<256x128xf32>, vector<128x128xf32> -> vector<128x128xf32>
    %c0_11 = arith.constant 0 : index
    %c0_12 = arith.constant 0 : index
    %24 = vector.load %arg5[%c0_11, %c0_12] : memref<128x128xf32, #tpu.memory_space<vmem>>, vector<128x128xf32>
    tpu.vector_store %arg5[%c0_11, %c0_12], %23 {strides = array<i32>} : memref<128x128xf32, #tpu.memory_space<vmem>>, vector<128x128xf32>,
    %25 = arith.subf %23, %0 : vector<128x128xf32>
    %26 = arith.mulf %25, %25 : vector<128x128xf32>
    %27 = vector.shape_cast %26 : vector<128x128xf32> to vector<1x128x128xf32>
    %cst_13 = arith.constant dense<0.000000e+00> : vector<1xf32>
    %28 = vector.multi_reduction <add>, %27, %cst_13 [1, 2] : vector<1x128x128xf32> to vector<1xf32>
    %29 = vector.shape_cast %28 : vector<1xf32> to vector<1x1x1xf32>
    %30 = vector.extract %29[0, 0, 0] : f32 from vector<1x1x1xf32>
    %31 = vector.broadcast %30 : f32 to vector<1x1x1xf32>
    %c0_14 = arith.constant 0 : index
    %c0_15 = arith.constant 0 : index
    %c0_16 = arith.constant 0 : index
    %32 = vector.load %arg6[%c0_14, %c0_15, %c0_16] : memref<1x1x1xf32, #tpu.memory_space<vmem>>, vector<1x1x1xf32>
    tpu.vector_store %arg6[%c0_14, %c0_15, %c0_16], %31 {strides = array<i32>} : memref<1x1x1xf32, #tpu.memory_space<vmem>>, vector<1x1x1xf32>,
    return
  }
  func.func @transform_0(%arg0: i32) -> (i32, i32) {
    %c0_i32 = arith.constant 0 : i32
    %c0_i32_0 = arith.constant 0 : i32
    return %arg0, %c0_i32 : i32, i32
  }
  func.func @transform_1(%arg0: i32) -> (i32, i32) {
    %c0_i32 = arith.constant 0 : i32
    %c0_i32_0 = arith.constant 0 : i32
    %c0_i32_1 = arith.constant 0 : i32
    return %c0_i32, %c0_i32_0 : i32, i32
  }
  func.func @transform_2(%arg0: i32) -> (i32, i32) {
    %c0_i32 = arith.constant 0 : i32
    %c0_i32_0 = arith.constant 0 : i32
    %c0_i32_1 = arith.constant 0 : i32
    return %c0_i32, %c0_i32_0 : i32, i32
  }
  func.func @transform_3(%arg0: i32) -> (i32, i32) {
    %c0_i32 = arith.constant 0 : i32
    %c0_i32_0 = arith.constant 0 : i32
    return %c0_i32, %arg0 : i32, i32
  }
  func.func @transform_4(%arg0: i32) -> (i32, i32) {
    %c0_i32 = arith.constant 0 : i32
    %c0_i32_0 = arith.constant 0 : i32
    return %arg0, %c0_i32 : i32, i32
  }
  func.func @transform_5(%arg0: i32) -> (i32, i32, i32) {
    %c0_i32 = arith.constant 0 : i32
    %c0_i32_0 = arith.constant 0 : i32
    %c0_i32_1 = arith.constant 0 : i32
    return %arg0, %c0_i32, %c0_i32_0 : i32, i32, i32
  }
}

</mosaic_0001>

<bundles_post_ra>
// kernel: squeeze.1
= control target key start
LH: loop header
LB: loop body
LE: loop exit
PB: predicated region body
PF: predicated region fallthrough
CT: control target
= control target key end

     0   :  { %s207_s0 = inlined_call_operand.vmem [shape: s32[128], index: 0, kind: input, shape index: {}]   ;;  %s208_s1 = inlined_call_operand.hbm [shape: s32[2,8,8], index: 1, kind: output, shape index: {}]  }
   0x1   :  { %v5_v0 = vld [vmem:[%s207_s0] sm:$0x1] }
   0x2   :  { %6 = vst [vmem:[#allocation2] sm:$0x1] %v5_v0 }
   0x3   :  { %2 = vsyncpa [#allocation1], 0  ;;  %s150_s0 = smov 120   ;;  %s151_s8 = smov 104   ;;  %vm8_vm0 = vcmask 64512  }
   0x4   :  { %s152_s9 = smov 112   ;;  %s153_s10 = smov 96  }
   0x5   :  { %s154_s11 = smov 88   ;;  %s155_s12 = smov 80  }
   0x6   :  { %s156_s13 = smov 72   ;;  %s157_s14 = smov 64  }
   0x7   :  { %s158_s15 = smov 56   ;;  %s159_s16 = smov 48  }
   0x8   :  { %s160_s17 = smov 40   ;;  %s161_s18 = smov 32  }
   0x9   :  { %v10_v1 = vld [vmem:[#allocation2] sm:$0x1]   ;;  %s162_s19 = smov 24   ;;  %s163_s20 = smov 16  }
   0xa   :  { %v22_v2 = vld [vmem:[#allocation2] sm:$0x1]   ;;  %11 = vrot.lane.b32.xlu0 %v10_v1, %s150_s0  ;;  %s164_s21 = smov 8   ;;  %s165_s22 = smov [#allocation0]  }
   0xb   :  { %23 = vrot.lane.b32.xlu1 %v22_v2, %s151_s8  ;;  %v16_v3 = vld [vmem:[#allocation2] sm:$0x1]   ;;  %s104_s23 = sshll.u32 %s165_s22, 4  ;;  %s105_s23 = int_to_ptr.vmem [resolvable:$true] %s104_s23 }
   0xc   :  { %v28_v4 = vld [vmem:[#allocation2] sm:$0x1]   ;;  %s126_s24 = scalar_lea.vmem %s105_s23, 256  ;;  %p131_p1 = scmp.lt.s32.totalorder %s105_s23, %s105_s23 }
   0xd   :  { %v34_v5 = vld [vmem:[#allocation2] sm:$0x1]   ;;  %p127_p0 = scmp.ne.s32.totalorder %s105_s23, %s126_s24  ;;  %p132_p2 = scmp.lt.s32.totalorder %s126_s24, %s126_s24 }
   0xe   :  { %17 = vrot.lane.b32.xlu0 %v16_v3, %s152_s9  ;;  %v40_v6 = vld [vmem:[#allocation2] sm:$0x1]  }
   0xf   :  { %29 = vrot.lane.b32.xlu1 %v28_v4, %s153_s10  ;;  %v46_v7 = vld [vmem:[#allocation2] sm:$0x1]   ;;  %p133_p3 = por %p132_p2, %p131_p1 }
  0x10   :  { %v52_v8 = vld [vmem:[#allocation2] sm:$0x1]  }
  0x11   :  { %v58_v9 = vld [vmem:[#allocation2] sm:$0x1]   ;;  %p134_p4 = pnand %p133_p3, %p127_p0 }
  0x12   :  { %35 = vrot.lane.b32.xlu0 %v34_v5, %s154_s11  ;;  %v64_v10 = vld [vmem:[#allocation2] sm:$0x1]  }
  0x13   :  { %41 = vrot.lane.b32.xlu1 %v40_v6, %s155_s12  ;;  %v7_v11 = vld [vmem:[#allocation2] sm:$0x1]  }
  0x14   :  { %9 = vst.msk [vmem:[#allocation0] sm:$0x1] %vm8_vm0, %v7_v11   ;;  %v70_v12 = vld [vmem:[#allocation2] sm:$0x1]  }
  0x15   :  { %v76_v13 = vld [vmem:[#allocation2] sm:$0x1]  }
  0x16   :  { %47 = vrot.lane.b32.xlu0 %v46_v7, %s156_s13  ;;  %v82_v14 = vld [vmem:[#allocation2] sm:$0x1]  }
  0x17   :  { %53 = vrot.lane.b32.xlu1 %v52_v8, %s157_s14  ;;  %v88_v15 = vld [vmem:[#allocation2] sm:$0x1]  }
  0x18   :  { %v94_v16 = vld [vmem:[#allocation2] sm:$0x1]  }
  0x1a   :  { %59 = vrot.lane.b32.xlu0 %v58_v9, %s158_s15 }
  0x1b   :  { %65 = vrot.lane.b32.xlu1 %v64_v10, %s159_s16 }
  0x1e   :  { %71 = vrot.lane.b32.xlu0 %v70_v12, %s160_s17 }
  0x1f   :  { %77 = vrot.lane.b32.xlu1 %v76_v13, %s161_s18 }
  0x22   :  { %83 = vrot.lane.b32.xlu0 %v82_v14, %s162_s19 }
  0x23   :  { %89 = vrot.lane.b32.xlu1 %v88_v15, %s163_s20 }
  0x26   :  { %95 = vrot.lane.b32.xlu0 %v94_v16, %s164_s21 }
  0x7c   :  { %v12_v17 = vpop.permute.xlu0 %11  }
  0x7d   :  { %v24_v18 = vpop.permute.xlu1 %23   ;;  %15 = vst.msk [vmem:[#allocation0 + $0x1] sm:$0x1] %vm8_vm0, %v12_v17  }
  0x7e   :  { %27 = vst.msk [vmem:[#allocation0 + $0x3] sm:$0x1] %vm8_vm0, %v24_v18  }
  0x80   :  { %v18_v19 = vpop.permute.xlu0 %17  }
  0x81   :  { %v30_v20 = vpop.permute.xlu1 %29   ;;  %21 = vst.msk [vmem:[#allocation0 + $0x2] sm:$0x1] %vm8_vm0, %v18_v19  }
  0x82   :  { %33 = vst.msk [vmem:[#allocation0 + $0x4] sm:$0x1] %vm8_vm0, %v30_v20  }
  0x84   :  { %v36_v21 = vpop.permute.xlu0 %35  }
  0x85   :  { %v42_v22 = vpop.permute.xlu1 %41   ;;  %39 = vst.msk [vmem:[#allocation0 + $0x5] sm:$0x1] %vm8_vm0, %v36_v21  }
  0x86   :  { %45 = vst.msk [vmem:[#allocation0 + $0x6] sm:$0x1] %vm8_vm0, %v42_v22  }
  0x88   :  { %v48_v23 = vpop.permute.xlu0 %47  }
  0x89   :  { %v54_v24 = vpop.permute.xlu1 %53   ;;  %51 = vst.msk [vmem:[#allocation0 + $0x7] sm:$0x1] %vm8_vm0, %v48_v23  }
  0x8a   :  { %57 = vst.msk [vmem:[#allocation0 + $0x8] sm:$0x1] %vm8_vm0, %v54_v24  }
  0x8c   :  { %v60_v25 = vpop.permute.xlu0 %59  }
  0x8d   :  { %v66_v26 = vpop.permute.xlu1 %65   ;;  %63 = vst.msk [vmem:[#allocation0 + $0x9] sm:$0x1] %vm8_vm0, %v60_v25  }
  0x8e   :  { %69 = vst.msk [vmem:[#allocation0 + $0xa] sm:$0x1] %vm8_vm0, %v66_v26  }
  0x90   :  { %v72_v27 = vpop.permute.xlu0 %71  }
  0x91   :  { %v78_v28 = vpop.permute.xlu1 %77   ;;  %75 = vst.msk [vmem:[#allocation0 + $0xb] sm:$0x1] %vm8_vm0, %v72_v27  }
  0x92   :  { %81 = vst.msk [vmem:[#allocation0 + $0xc] sm:$0x1] %vm8_vm0, %v78_v28  }
  0x94   :  { %v84_v29 = vpop.permute.xlu0 %83  }
  0x95   :  { %v90_v30 = vpop.permute.xlu1 %89   ;;  %87 = vst.msk [vmem:[#allocation0 + $0xd] sm:$0x1] %vm8_vm0, %v84_v29  }
  0x96   :  { %93 = vst.msk [vmem:[#allocation0 + $0xe] sm:$0x1] %vm8_vm0, %v90_v30  }
  0x98   :  { %v96_v31 = vpop.permute.xlu0 %95  }
  0x99   :  { %99 = vst.msk [vmem:[#allocation0 + $0xf] sm:$0x1] %vm8_vm0, %v96_v31  }
  0x9a   :  { %137 = shalt.err (!%p134_p4)
}
  0x9b   :  { %s138_s27 = scalar_lea.hbm %s208_s1, 256 }
  0x9c   :  { %p139_p5 = scmp.ne.s32.totalorder %s208_s1, %s138_s27  ;;  %p142_p6 = scmp.lt.u32.totalorder %s138_s27, %s208_s1 }
  0x9e   :  { %p144_p7 = pnand %p142_p6, %p139_p5 }
  0xa0   :  { %147 = shalt.err (!%p144_p7)
}
  0xa1   :  { %107 = dma.vmem_to_hbm [thread:$0]  %s105_s23, 256, %s208_s1, [#allocation1]  }
  0xa2   :  { %148 = dma.done.wait [#allocation1], 256  }
  0xa3   :  { %149 = vsyncadd [#allocation1], 4294967040 }
  0xa4   :  { %109 = vsyncpa [#allocation1], 1 }

// kernel: a_call__.3
= control target key start
LH: loop header
LB: loop body
LE: loop exit
PB: predicated region body
PF: predicated region fallthrough
CT: control target
= control target key end

     0   :  { %11 = vsyncpa [#allocation3], 0  ;;  %s2230_s0 = inlined_call_operand.vmem [shape: f32[128,128], index: 0, kind: input, shape index: {}]   ;;  %s2231_s1 = inlined_call_operand.vmem [shape: f32[256,128], index: 1, kind: input, shape index: {}]   ;;  %s2232_s2 = inlined_call_operand.vmem [shape: f32[1,256], index: 2, kind: input, shape index: {}]   ;;  %s2233_s3 = inlined_call_operand.vmem [shape: s32[1,128], index: 3, kind: output, shape index: {0}]   ;;  %s2234_s4 = inlined_call_operand.hbm [shape: f32[128,128], index: 4, kind: output, shape index: {1}]   ;;  %s2235_s5 = inlined_call_operand.hbm [shape: f32[1,1,1], index: 5, kind: output, shape index: {2}]  }
   0x1   :  { %v51_v0 = vld [vmem:[%s2231_s1 + $0x80] sm:$0xff]  ;;  %v52_v1 = vld [vmem:[%s2231_s1 + $0x88] sm:$0xff]  ;;  %v53_v5 = vld [vmem:[%s2231_s1 + $0x90] sm:$0xff] }
   0x2   :  { %v35_v2 = vld [vmem:[%s2231_s1] sm:$0xff]  ;;  %v1343_v3 = vpack.c.bf16 %v52_v1, %v51_v0  ;;  %v36_v4 = vld [vmem:[%s2231_s1 + $0x8] sm:$0xff]  ;;  %v54_v6 = vld [vmem:[%s2231_s1 + $0x98] sm:$0xff] }
   0x3   :  { %v1345_v7 = vpack.c.bf16 %v36_v4, %v35_v2  ;;  %v1347_v8 = vpack.c.bf16 %v54_v6, %v53_v5  ;;  %v37_v9 = vld [vmem:[%s2231_s1 + $0x10] sm:$0xff]  ;;  %v38_v10 = vld [vmem:[%s2231_s1 + $0x18] sm:$0xff]  ;;  %v55_v11 = vld [vmem:[%s2231_s1 + $0xa0] sm:$0xff] }
   0x4   :  { %1344 = vmatprep.subr.bf16.mxu0 %v1343_v3  ;;  %1376 = vmatprep.subr.bf16.mxu1 %v1343_v3  ;;  %v56_v12 = vld [vmem:[%s2231_s1 + $0xa8] sm:$0xff]  ;;  %v1349_v13 = vpack.c.bf16 %v38_v10, %v37_v9  ;;  %v39_v15 = vld [vmem:[%s2231_s1 + $0x20] sm:$0xff]  ;;  %v57_v17 = vld [vmem:[%s2231_s1 + $0xb0] sm:$0xff] }
   0x5   :  { %1346 = vmatpush3.bf16.xpose.msra.mxu0 %v1345_v7  ;;  %1378 = vmatpush3.bf16.msra.mxu1 %v1345_v7  ;;  %v1351_v14 = vpack.c.bf16 %v56_v12, %v55_v11  ;;  %v40_v16 = vld [vmem:[%s2231_s1 + $0x28] sm:$0xff]  ;;  %v58_v18 = vld [vmem:[%s2231_s1 + $0xb8] sm:$0xff]  ;;  %v19_v20 = vld [vmem:[%s2230_s0] sm:$0xff] }
   0x6   :  { %1348 = vmatprep.subr.bf16.mxu0 %v1347_v8  ;;  %1380 = vmatprep.subr.bf16.mxu1 %v1347_v8  ;;  %v1353_v19 = vpack.c.bf16 %v40_v16, %v39_v15  ;;  %v1355_v21 = vpack.c.bf16 %v58_v18, %v57_v17  ;;  %v41_v22 = vld [vmem:[%s2231_s1 + $0x30] sm:$0xff]  ;;  %v42_v23 = vld [vmem:[%s2231_s1 + $0x38] sm:$0xff]  ;;  %v59_v24 = vld [vmem:[%s2231_s1 + $0xc0] sm:$0xff] }
   0x7   :  { %1231 = vmatprep.mubr.f32.mxu0 %v19_v20  ;;  %v60_v25 = vld [vmem:[%s2231_s1 + $0xc8] sm:$0xff]  ;;  %v1357_v26 = vpack.c.bf16 %v42_v23, %v41_v22  ;;  %v43_v28 = vld [vmem:[%s2231_s1 + $0x40] sm:$0xff]  ;;  %v61_v30 = vld [vmem:[%s2231_s1 + $0xd0] sm:$0xff] }
   0x8   :  { %v1359_v27 = vpack.c.bf16 %v60_v25, %v59_v24  ;;  %v44_v29 = vld [vmem:[%s2231_s1 + $0x48] sm:$0xff]  ;;  %v62_v31 = vld [vmem:[%s2231_s1 + $0xd8] sm:$0xff] }
   0x9   :  { %1382 = vmatpush3.bf16.msra.mxu1 %v1349_v13 }
   0xa   :  { %1384 = vmatprep.subr.bf16.mxu1 %v1351_v14 }
   0xd   :  { %1350 = vmatpush3.bf16.xpose.msra.mxu0 %v1349_v13  ;;  %1386 = vmatpush3.bf16.msra.mxu1 %v1353_v19 }
   0xe   :  { %1352 = vmatprep.subr.bf16.mxu0 %v1351_v14  ;;  %1388 = vmatprep.subr.bf16.mxu1 %v1355_v21 }
  0x11   :  { %1390 = vmatpush3.bf16.msra.mxu1 %v1357_v26 }
  0x12   :  { %12 = vsyncpa [#allocation5], 0  ;;  %1392 = vmatprep.subr.bf16.mxu1 %v1359_v27  ;;  %v1361_v32 = vpack.c.bf16 %v44_v29, %v43_v28  ;;  %v1363_v33 = vpack.c.bf16 %v62_v31, %v61_v30  ;;  %v45_v34 = vld [vmem:[%s2231_s1 + $0x50] sm:$0xff]  ;;  %v46_v35 = vld [vmem:[%s2231_s1 + $0x58] sm:$0xff]  ;;  %v262_v0 = vlaneseq }
  0x13   :  { %v63_v36 = vld [vmem:[%s2231_s1 + $0xe0] sm:$0xff]  ;;  %v64_v37 = vld [vmem:[%s2231_s1 + $0xe8] sm:$0xff]  ;;  %v1365_v38 = vpack.c.bf16 %v46_v35, %v45_v34  ;;  %v65_v42 = vld [vmem:[%s2231_s1 + $0xf0] sm:$0xff] }
  0x14   :  { %v1367_v39 = vpack.c.bf16 %v64_v37, %v63_v36  ;;  %v47_v40 = vld [vmem:[%s2231_s1 + $0x60] sm:$0xff]  ;;  %v48_v41 = vld [vmem:[%s2231_s1 + $0x68] sm:$0xff]  ;;  %v66_v43 = vld [vmem:[%s2231_s1 + $0xf8] sm:$0xff]  ;;  %v1658_v1 = vshrl.u32 %v262_v0, 7 }
  0x15   :  { %1354 = vmatpush3.bf16.xpose.msra.mxu0 %v1353_v19  ;;  %1394 = vmatpush3.bf16.msra.mxu1 %v1361_v32  ;;  %v1369_v44 = vpack.c.bf16 %v48_v41, %v47_v40  ;;  %v1371_v45 = vpack.c.bf16 %v66_v43, %v65_v42  ;;  %v49_v46 = vld [vmem:[%s2231_s1 + $0x70] sm:$0xff]  ;;  %v50_v47 = vld [vmem:[%s2231_s1 + $0x78] sm:$0xff]  ;;  %v20_v49 = vld [vmem:[%s2230_s0 + $0x8] sm:$0xff] }
  0x16   :  { %1356 = vmatprep.subr.bf16.mxu0 %v1355_v21  ;;  %1396 = vmatprep.subr.bf16.mxu1 %v1363_v33  ;;  %v1373_v48 = vpack.c.bf16 %v50_v47, %v49_v46  ;;  %v21_v50 = vld [vmem:[%s2230_s0 + $0x10] sm:$0xff]  ;;  %v22_v51 = vld [vmem:[%s2230_s0 + $0x18] sm:$0xff]  ;;  %v23_v52 = vld [vmem:[%s2230_s0 + $0x20] sm:$0xff]  ;;  %v264_v2 = vsub.s32 0, %v1658_v1  ;;  %v268_v4 = vsub.s32 1, %v1658_v1 }
  0x17   :  { %v24_v53 = vld [vmem:[%s2230_s0 + $0x28] sm:$0xff]  ;;  %v25_v54 = vld [vmem:[%s2230_s0 + $0x30] sm:$0xff]  ;;  %v26_v55 = vld [vmem:[%s2230_s0 + $0x38] sm:$0xff] }
  0x18   :  { %v27_v56 = vld [vmem:[%s2230_s0 + $0x40] sm:$0xff]  ;;  %v28_v57 = vld [vmem:[%s2230_s0 + $0x48] sm:$0xff]  ;;  %v29_v58 = vld [vmem:[%s2230_s0 + $0x50] sm:$0xff] }
  0x19   :  { %1398 = vmatpush3.bf16.msra.mxu1 %v1365_v38  ;;  %v30_v59 = vld [vmem:[%s2230_s0 + $0x58] sm:$0xff]  ;;  %v31_v60 = vld [vmem:[%s2230_s0 + $0x60] sm:$0xff]  ;;  %v32_v61 = vld [vmem:[%s2230_s0 + $0x68] sm:$0xff] }
  0x1a   :  { %1400 = vmatprep.subr.bf16.mxu1 %v1367_v39  ;;  %v33_v62 = vld [vmem:[%s2230_s0 + $0x70] sm:$0xff]  ;;  %v34_v63 = vld [vmem:[%s2230_s0 + $0x78] sm:$0xff]  ;;  %v228_v3 = vld [vmem:[%s2232_s2] sm:$0x3] }
  0x1b   :  { %v1665_v5 = vrot.slane %v228_v3, %v264_v2  ;;  %v1667_v7 = vrot.slane %v228_v3, %v268_v4 }
  0x1d   :  { %1358 = vmatpush3.bf16.xpose.msra.mxu0 %v1357_v26  ;;  %1402 = vmatpush3.bf16.msra.mxu1 %v1369_v44 }
  0x1e   :  { %1360 = vmatprep.subr.bf16.mxu0 %v1359_v27  ;;  %1404 = vmatprep.subr.bf16.mxu1 %v1371_v45 }
  0x21   :  { %1406 = vmatpush3.bf16.msra.mxu1 %v1373_v48 }
  0x25   :  { %1362 = vmatpush3.bf16.xpose.msra.mxu0 %v1361_v32 }
  0x26   :  { %1364 = vmatprep.subr.bf16.mxu0 %v1363_v33 }
  0x2d   :  { %1366 = vmatpush3.bf16.xpose.msra.mxu0 %v1365_v38 }
  0x2e   :  { %1368 = vmatprep.subr.bf16.mxu0 %v1367_v39 }
  0x35   :  { %1370 = vmatpush3.bf16.xpose.msra.mxu0 %v1369_v44 }
  0x36   :  { %1372 = vmatprep.subr.bf16.mxu0 %v1371_v45 }
  0x3d   :  { %1374 = vmatpush3.bf16.xpose.msra.mxu0 %v1373_v48 }
  0x44   :  { %1232 = vmatmul.mubr.f32.vlgmr.msra.gmra.mrb[0].mxu0 %v19_v20 }
  0x45   :  { %1233 = vmatprep.mubr.f32.mxu0 %v20_v49 }
  0x48   :  { %1234 = vmatmul.mubr.f32.gmra.mrb[2].mxu0 %v20_v49 }
  0x49   :  { %1235 = vmatprep.mubr.f32.mxu0 %v21_v50 }
  0x4c   :  { %1236 = vmatmul.mubr.f32.gmra.mrb[4].mxu0 %v21_v50 }
  0x4d   :  { %1237 = vmatprep.mubr.f32.mxu0 %v22_v51 }
  0x50   :  { %1238 = vmatmul.mubr.f32.gmra.mrb[6].mxu0 %v22_v51 }
  0x51   :  { %1239 = vmatprep.mubr.f32.mxu0 %v23_v52 }
  0x54   :  { %1240 = vmatmul.mubr.f32.gmra.mrb[8].mxu0 %v23_v52 }
  0x55   :  { %1241 = vmatprep.mubr.f32.mxu0 %v24_v53 }
  0x58   :  { %1242 = vmatmul.mubr.f32.gmra.mrb[10].mxu0 %v24_v53 }
  0x59   :  { %1243 = vmatprep.mubr.f32.mxu0 %v25_v54 }
  0x5c   :  { %1244 = vmatmul.mubr.f32.gmra.mrb[12].mxu0 %v25_v54 }
  0x5d   :  { %1245 = vmatprep.mubr.f32.mxu0 %v26_v55 }
  0x60   :  { %1246 = vmatmul.mubr.f32.gmra.mrb[14].mxu0 %v26_v55 }
  0x61   :  { %1247 = vmatprep.mubr.f32.mxu0 %v27_v56 }
  0x64   :  { %1248 = vmatmul.mubr.f32.gmra.mrb[16].mxu0 %v27_v56 }
  0x65   :  { %1249 = vmatprep.mubr.f32.mxu0 %v28_v57 }
  0x68   :  { %1250 = vmatmul.mubr.f32.gmra.mrb[18].mxu0 %v28_v57 }
  0x69   :  { %1251 = vmatprep.mubr.f32.mxu0 %v29_v58 }
  0x6c   :  { %1252 = vmatmul.mubr.f32.gmra.mrb[20].mxu0 %v29_v58 }
  0x6d   :  { %1253 = vmatprep.mubr.f32.mxu0 %v30_v59 }
  0x70   :  { %1254 = vmatmul.mubr.f32.gmra.mrb[22].mxu0 %v30_v59 }
  0x71   :  { %1255 = vmatprep.mubr.f32.mxu0 %v31_v60 }
  0x74   :  { %1256 = vmatmul.mubr.f32.gmra.mrb[24].mxu0 %v31_v60 }
  0x75   :  { %1257 = vmatprep.mubr.f32.mxu0 %v32_v61 }
  0x78   :  { %1258 = vmatmul.mubr.f32.gmra.mrb[26].mxu0 %v32_v61 }
  0x79   :  { %1259 = vmatprep.mubr.f32.mxu0 %v33_v62 }
  0x7c   :  { %1260 = vmatmul.mubr.f32.gmra.mrb[28].mxu0 %v33_v62 }
  0x7d   :  { %1261 = vmatprep.mubr.f32.mxu0 %v34_v63 }
  0x80   :  { %1262 = vmatmul.mubr.f32.gmra.mrb[30].mxu0 %v34_v63 }
 0x117   :  { %v133_v6 = vpop.f32.mrb[0].mxu0 }
 0x118   :  { %v229_v8 = vmul.f32 2.0, %v133_v6  ;;  %v135_v9 = vpop.f32.mrb[1].mxu0 }
 0x119   :  { %v230_v10 = vmul.f32 2.0, %v135_v9 }
 0x11a   :  { %v1670_v11 = vsub.f32 %v1665_v5, %v229_v8 }
 0x11b   :  { %v139_v12 = vpop.f32.mrb[2].mxu0  ;;  %v1673_v13 = vsub.f32 %v1667_v7, %v230_v10 }
 0x11c   :  { %v231_v14 = vmul.f32 2.0, %v139_v12  ;;  %v141_v15 = vpop.f32.mrb[3].mxu0 }
 0x11d   :  { %v232_v16 = vmul.f32 2.0, %v141_v15  ;;  %v304_v17 = vmin.f32 %v1670_v11, %v1673_v13 }
 0x11e   :  { %v1678_v18 = vsub.f32 %v1665_v5, %v231_v14 }
 0x11f   :  { %v1681_v19 = vsub.f32 %v1667_v7, %v232_v16  ;;  %305 = vmin.xlane.f32.xlu0 %v304_v17  ;;  %v145_v20 = vpop.f32.mrb[4].mxu0 }
 0x120   :  { %v233_v21 = vmul.f32 2.0, %v145_v20  ;;  %v147_v22 = vpop.f32.mrb[5].mxu0 }
 0x121   :  { %v234_v23 = vmul.f32 2.0, %v147_v22  ;;  %v307_v24 = vmin.f32 %v1678_v18, %v1681_v19 }
 0x122   :  { %v1686_v25 = vsub.f32 %v1665_v5, %v233_v21 }
 0x123   :  { %308 = vmin.xlane.f32.xlu0 %v307_v24  ;;  %v151_v26 = vpop.f32.mrb[6].mxu0  ;;  %v1689_v27 = vsub.f32 %v1667_v7, %v234_v23 }
 0x124   :  { %v235_v28 = vmul.f32 2.0, %v151_v26  ;;  %v153_v29 = vpop.f32.mrb[7].mxu0 }
 0x125   :  { %v236_v30 = vmul.f32 2.0, %v153_v29  ;;  %v310_v31 = vmin.f32 %v1686_v25, %v1689_v27 }
 0x126   :  { %v1694_v32 = vsub.f32 %v1665_v5, %v235_v28 }
 0x127   :  { %v1697_v33 = vsub.f32 %v1667_v7, %v236_v30  ;;  %311 = vmin.xlane.f32.xlu1 %v310_v31  ;;  %v157_v34 = vpop.f32.mrb[8].mxu0 }
 0x128   :  { %v237_v35 = vmul.f32 2.0, %v157_v34  ;;  %v159_v36 = vpop.f32.mrb[9].mxu0 }
 0x129   :  { %v238_v37 = vmul.f32 2.0, %v159_v36  ;;  %v313_v38 = vmin.f32 %v1694_v32, %v1697_v33 }
 0x12a   :  { %v1702_v39 = vsub.f32 %v1665_v5, %v237_v35 }
 0x12b   :  { %v1705_v40 = vsub.f32 %v1667_v7, %v238_v37  ;;  %314 = vmin.xlane.f32.xlu1 %v313_v38  ;;  %v163_v41 = vpop.f32.mrb[10].mxu0 }
 0x12c   :  { %v239_v42 = vmul.f32 2.0, %v163_v41  ;;  %v165_v43 = vpop.f32.mrb[11].mxu0 }
 0x12d   :  { %v240_v44 = vmul.f32 2.0, %v165_v43  ;;  %v316_v45 = vmin.f32 %v1702_v39, %v1705_v40 }
 0x12e   :  { %v1710_v46 = vsub.f32 %v1665_v5, %v239_v42 }
 0x12f   :  { %v1713_v47 = vsub.f32 %v1667_v7, %v240_v44  ;;  %317 = vmin.xlane.f32.xlu0 %v316_v45  ;;  %v169_v48 = vpop.f32.mrb[12].mxu0 }
 0x130   :  { %v241_v49 = vmul.f32 2.0, %v169_v48  ;;  %v171_v50 = vpop.f32.mrb[13].mxu0 }
 0x131   :  { %v242_v51 = vmul.f32 2.0, %v171_v50  ;;  %v319_v52 = vmin.f32 %v1710_v46, %v1713_v47 }
 0x132   :  { %v1718_v53 = vsub.f32 %v1665_v5, %v241_v49 }
 0x133   :  { %v1721_v54 = vsub.f32 %v1667_v7, %v242_v51  ;;  %320 = vmin.xlane.f32.xlu1 %v319_v52  ;;  %v175_v55 = vpop.f32.mrb[14].mxu0 }
 0x134   :  { %v243_v56 = vmul.f32 2.0, %v175_v55  ;;  %v177_v57 = vpop.f32.mrb[15].mxu0 }
 0x135   :  { %v244_v58 = vmul.f32 2.0, %v177_v57  ;;  %v322_v59 = vmin.f32 %v1718_v53, %v1721_v54 }
 0x136   :  { %v1726_v60 = vsub.f32 %v1665_v5, %v243_v56 }
 0x137   :  { %v1729_v61 = vsub.f32 %v1667_v7, %v244_v58  ;;  %323 = vmin.xlane.f32.xlu0 %v322_v59  ;;  %v181_v62 = vpop.f32.mrb[16].mxu0 }
 0x138   :  { %v245_v63 = vmul.f32 2.0, %v181_v62  ;;  %v183_v2 = vpop.f32.mrb[17].mxu0 }
 0x139   :  { %v246_v3 = vmul.f32 2.0, %v183_v2  ;;  %v325_v4 = vmin.f32 %v1726_v60, %v1729_v61 }
 0x13a   :  { %v1734_v6 = vsub.f32 %v1665_v5, %v245_v63 }
 0x13b   :  { %v1737_v8 = vsub.f32 %v1667_v7, %v246_v3  ;;  %326 = vmin.xlane.f32.xlu1 %v325_v4  ;;  %v187_v9 = vpop.f32.mrb[18].mxu0 }
 0x13c   :  { %v247_v10 = vmul.f32 2.0, %v187_v9  ;;  %v189_v12 = vpop.f32.mrb[19].mxu0 }
 0x13d   :  { %v248_v14 = vmul.f32 2.0, %v189_v12  ;;  %v328_v15 = vmin.f32 %v1734_v6, %v1737_v8 }
 0x13e   :  { %v1742_v16 = vsub.f32 %v1665_v5, %v247_v10 }
 0x13f   :  { %v1745_v17 = vsub.f32 %v1667_v7, %v248_v14  ;;  %329 = vmin.xlane.f32.xlu0 %v328_v15  ;;  %v193_v20 = vpop.f32.mrb[20].mxu0 }
 0x140   :  { %v249_v21 = vmul.f32 2.0, %v193_v20  ;;  %v195_v22 = vpop.f32.mrb[21].mxu0 }
 0x141   :  { %v250_v23 = vmul.f32 2.0, %v195_v22  ;;  %v331_v24 = vmin.f32 %v1742_v16, %v1745_v17 }
 0x142   :  { %v1750_v26 = vsub.f32 %v1665_v5, %v249_v21 }
 0x143   :  { %v1753_v28 = vsub.f32 %v1667_v7, %v250_v23  ;;  %332 = vmin.xlane.f32.xlu1 %v331_v24  ;;  %v199_v29 = vpop.f32.mrb[22].mxu0  ;;  %v1798_v23 = vand.u32 127, %v262_v0 }
 0x144   :  { %v251_v30 = vmul.f32 2.0, %v199_v29  ;;  %v201_v31 = vpop.f32.mrb[23].mxu0 }
 0x145   :  { %v252_v34 = vmul.f32 2.0, %v201_v31  ;;  %v334_v35 = vmin.f32 %v1750_v26, %v1753_v28  ;;  %v1801_v24 = vadd.s32 128, %v1798_v23 }
 0x146   :  { %v1758_v36 = vsub.f32 %v1665_v5, %v251_v30 }
 0x147   :  { %v1761_v37 = vsub.f32 %v1667_v7, %v252_v34  ;;  %335 = vmin.xlane.f32.xlu0 %v334_v35  ;;  %v205_v38 = vpop.f32.mrb[24].mxu0 }
 0x148   :  { %v253_v41 = vmul.f32 2.0, %v205_v38  ;;  %v207_v42 = vpop.f32.mrb[25].mxu0 }
 0x149   :  { %v254_v43 = vmul.f32 2.0, %v207_v42  ;;  %v337_v44 = vmin.f32 %v1758_v36, %v1761_v37 }
 0x14a   :  { %v1766_v45 = vsub.f32 %v1665_v5, %v253_v41 }
 0x14b   :  { %v1769_v48 = vsub.f32 %v1667_v7, %v254_v43  ;;  %338 = vmin.xlane.f32.xlu1 %v337_v44  ;;  %v211_v49 = vpop.f32.mrb[26].mxu0 }
 0x14c   :  { %v255_v50 = vmul.f32 2.0, %v211_v49  ;;  %v213_v51 = vpop.f32.mrb[27].mxu0 }
 0x14d   :  { %v256_v52 = vmul.f32 2.0, %v213_v51  ;;  %v340_v55 = vmin.f32 %v1766_v45, %v1769_v48 }
 0x14e   :  { %v1774_v56 = vsub.f32 %v1665_v5, %v255_v50 }
 0x14f   :  { %v1777_v57 = vsub.f32 %v1667_v7, %v256_v52  ;;  %341 = vmin.xlane.f32.xlu0 %v340_v55  ;;  %v217_v58 = vpop.f32.mrb[28].mxu0 }
 0x150   :  { %v257_v59 = vmul.f32 2.0, %v217_v58  ;;  %v219_v62 = vpop.f32.mrb[29].mxu0 }
 0x151   :  { %v258_v63 = vmul.f32 2.0, %v219_v62  ;;  %v343_v2 = vmin.f32 %v1774_v56, %v1777_v57 }
 0x152   :  { %v1782_v3 = vsub.f32 %v1665_v5, %v257_v59 }
 0x153   :  { %v1785_v4 = vsub.f32 %v1667_v7, %v258_v63  ;;  %344 = vmin.xlane.f32.xlu1 %v343_v2  ;;  %v223_v9 = vpop.f32.mrb[30].mxu0 }
 0x154   :  { %v259_v10 = vmul.f32 2.0, %v223_v9  ;;  %v225_v12 = vpop.f32.mrb[31].mxu0 }
 0x155   :  { %v260_v14 = vmul.f32 2.0, %v225_v12  ;;  %v346_v15 = vmin.f32 %v1782_v3, %v1785_v4 }
 0x156   :  { %v1790_v20 = vsub.f32 %v1665_v5, %v259_v10 }
 0x157   :  { %v1793_v21 = vsub.f32 %v1667_v7, %v260_v14  ;;  %347 = vmin.xlane.f32.xlu0 %v346_v15 }
 0x159   :  { %v349_v22 = vmin.f32 %v1790_v20, %v1793_v21 }
 0x15b   :  { %350 = vmin.xlane.f32.xlu1 %v349_v22 }
 0x1ac   :  { %v306_v29 = vpop.xlane.xlu0 %305 }
 0x1ad   :  { %vm355_vm0 = vcmp.eq.f32.partialorder %v1670_v11, %v306_v29  ;;  %vm356_vm1 = vcmp.eq.f32.partialorder %v1673_v13, %v306_v29 }
 0x1ae   :  { %v387_v5 = vsel %vm355_vm0, %v1798_v23, 256  ;;  %v388_v7 = vsel %vm356_vm1, %v1801_v24, 256 }
 0x1af   :  { %vm419_vm2 = vcmp.lt.s32.totalorder %v387_v5, %v388_v7 }
 0x1b0   :  { %v309_v30 = vpop.xlane.xlu0 %308  ;;  %v1807_v31 = vsel %vm419_vm2, %v387_v5, %v388_v7 }
 0x1b1   :  { %vm357_vm3 = vcmp.eq.f32.partialorder %v1678_v18, %v309_v30  ;;  %vm358_vm4 = vcmp.eq.f32.partialorder %v1681_v19, %v309_v30  ;;  %v422_v0 = vshra.s32 %v1807_v31, 16 }
 0x1b2   :  { %v389_v34 = vsel %vm357_vm3, %v1798_v23, 256  ;;  %v390_v11 = vsel %vm358_vm4, %v1801_v24, 256 }
 0x1b3   :  { %vm435_vm5 = vcmp.lt.s32.totalorder %v389_v34, %v390_v11  ;;  %v1814_v13 = vcvt.s32.f32 %v422_v0 }
 0x1b4   :  { %v312_v35 = vpop.xlane.xlu1 %311  ;;  %v1816_v38 = vsel %vm435_vm5, %v389_v34, %v390_v11 }
 0x1b5   :  { %vm359_vm6 = vcmp.eq.f32.partialorder %v1686_v25, %v312_v35  ;;  %vm360_vm7 = vcmp.eq.f32.partialorder %v1689_v27, %v312_v35  ;;  %425 = vmin.xlane.f32.xlu0 %v1814_v13  ;;  %v438_v18 = vshra.s32 %v1816_v38, 16 }
 0x1b6   :  { %v391_v19 = vsel %vm359_vm6, %v1798_v23, 256  ;;  %v392_v41 = vsel %vm360_vm7, %v1801_v24, 256 }
 0x1b7   :  { %vm451_vm8 = vcmp.lt.s32.totalorder %v391_v19, %v392_v41  ;;  %v1824_v42 = vcvt.s32.f32 %v438_v18 }
 0x1b8   :  { %v315_v43 = vpop.xlane.xlu1 %314  ;;  %v1826_v44 = vsel %vm451_vm8, %v391_v19, %v392_v41 }
 0x1b9   :  { %vm361_vm9 = vcmp.eq.f32.partialorder %v1694_v32, %v315_v43  ;;  %vm362_vm10 = vcmp.eq.f32.partialorder %v1697_v33, %v315_v43  ;;  %441 = vmin.xlane.f32.xlu1 %v1824_v42  ;;  %v454_v25 = vshra.s32 %v1826_v44, 16 }
 0x1ba   :  { %v393_v27 = vsel %vm361_vm9, %v1798_v23, 256  ;;  %v394_v49 = vsel %vm362_vm10, %v1801_v24, 256 }
 0x1bb   :  { %vm467_vm11 = vcmp.lt.s32.totalorder %v393_v27, %v394_v49  ;;  %v1834_v50 = vcvt.s32.f32 %v454_v25 }
 0x1bc   :  { %v318_v51 = vpop.xlane.xlu0 %317  ;;  %v1836_v52 = vsel %vm467_vm11, %v393_v27, %v394_v49 }
 0x1bd   :  { %vm363_vm12 = vcmp.eq.f32.partialorder %v1702_v39, %v318_v51  ;;  %vm364_vm13 = vcmp.eq.f32.partialorder %v1705_v40, %v318_v51  ;;  %457 = vmin.xlane.f32.xlu0 %v1834_v50  ;;  %v470_v32 = vshra.s32 %v1836_v52, 16 }
 0x1be   :  { %v395_v33 = vsel %vm363_vm12, %v1798_v23, 256  ;;  %v396_v55 = vsel %vm364_vm13, %v1801_v24, 256 }
 0x1bf   :  { %vm483_vm14 = vcmp.lt.s32.totalorder %v395_v33, %v396_v55  ;;  %v1844_v58 = vcvt.s32.f32 %v470_v32 }
 0x1c0   :  { %v321_v59 = vpop.xlane.xlu1 %320  ;;  %v1846_v62 = vsel %vm483_vm14, %v395_v33, %v396_v55 }
 0x1c1   :  { %vm365_vm15 = vcmp.eq.f32.partialorder %v1710_v46, %v321_v59  ;;  %vm366_vm0 = vcmp.eq.f32.partialorder %v1713_v47, %v321_v59  ;;  %473 = vmin.xlane.f32.xlu1 %v1844_v58  ;;  %v486_v39 = vshra.s32 %v1846_v62, 16 }
 0x1c2   :  { %v397_v40 = vsel %vm365_vm15, %v1798_v23, 256  ;;  %v398_v63 = vsel %vm366_vm0, %v1801_v24, 256 }
 0x1c3   :  { %vm499_vm1 = vcmp.lt.s32.totalorder %v397_v40, %v398_v63  ;;  %v1854_v2 = vcvt.s32.f32 %v486_v39 }
 0x1c4   :  { %v324_v9 = vpop.xlane.xlu0 %323  ;;  %v1856_v10 = vsel %vm499_vm1, %v397_v40, %v398_v63 }
 0x1c5   :  { %vm367_vm2 = vcmp.eq.f32.partialorder %v1718_v53, %v324_v9  ;;  %vm368_vm3 = vcmp.eq.f32.partialorder %v1721_v54, %v324_v9  ;;  %489 = vmin.xlane.f32.xlu0 %v1854_v2  ;;  %v502_v46 = vshra.s32 %v1856_v10, 16 }
 0x1c6   :  { %v399_v47 = vsel %vm367_vm2, %v1798_v23, 256  ;;  %v400_v12 = vsel %vm368_vm3, %v1801_v24, 256 }
 0x1c7   :  { %vm515_vm4 = vcmp.lt.s32.totalorder %v399_v47, %v400_v12  ;;  %v1864_v14 = vcvt.s32.f32 %v502_v46 }
 0x1c8   :  { %v327_v15 = vpop.xlane.xlu1 %326  ;;  %v1866_v22 = vsel %vm515_vm4, %v399_v47, %v400_v12 }
 0x1c9   :  { %vm369_vm5 = vcmp.eq.f32.partialorder %v1726_v60, %v327_v15  ;;  %vm370_vm6 = vcmp.eq.f32.partialorder %v1729_v61, %v327_v15  ;;  %505 = vmin.xlane.f32.xlu1 %v1864_v14  ;;  %v518_v53 = vshra.s32 %v1866_v22, 16 }
 0x1ca   :  { %v401_v54 = vsel %vm369_vm5, %v1798_v23, 256  ;;  %v402_v29 = vsel %vm370_vm6, %v1801_v24, 256 }
 0x1cb   :  { %vm531_vm7 = vcmp.lt.s32.totalorder %v401_v54, %v402_v29  ;;  %v1874_v5 = vcvt.s32.f32 %v518_v53 }
 0x1cc   :  { %v330_v7 = vpop.xlane.xlu0 %329  ;;  %v1876_v30 = vsel %vm531_vm7, %v401_v54, %v402_v29 }
 0x1cd   :  { %vm371_vm8 = vcmp.eq.f32.partialorder %v1734_v6, %v330_v7  ;;  %vm372_vm9 = vcmp.eq.f32.partialorder %v1737_v8, %v330_v7  ;;  %521 = vmin.xlane.f32.xlu0 %v1874_v5  ;;  %v534_v60 = vshra.s32 %v1876_v30, 16 }
 0x1ce   :  { %v403_v61 = vsel %vm371_vm8, %v1798_v23, 256  ;;  %v404_v0 = vsel %vm372_vm9, %v1801_v24, 256 }
 0x1cf   :  { %vm547_vm10 = vcmp.lt.s32.totalorder %v403_v61, %v404_v0  ;;  %v1884_v34 = vcvt.s32.f32 %v534_v60 }
 0x1d0   :  { %v333_v11 = vpop.xlane.xlu1 %332  ;;  %v1886_v35 = vsel %vm547_vm10, %v403_v61, %v404_v0 }
 0x1d1   :  { %vm373_vm11 = vcmp.eq.f32.partialorder %v1742_v16, %v333_v11  ;;  %vm374_vm12 = vcmp.eq.f32.partialorder %v1745_v17, %v333_v11  ;;  %537 = vmin.xlane.f32.xlu1 %v1884_v34  ;;  %v550_v6 = vshra.s32 %v1886_v35, 16 }
 0x1d2   :  { %v405_v8 = vsel %vm373_vm11, %v1798_v23, 256  ;;  %v406_v18 = vsel %vm374_vm12, %v1801_v24, 256 }
 0x1d3   :  { %vm563_vm13 = vcmp.lt.s32.totalorder %v405_v8, %v406_v18  ;;  %v1894_v19 = vcvt.s32.f32 %v550_v6 }
 0x1d4   :  { %v336_v41 = vpop.xlane.xlu0 %335  ;;  %v1896_v43 = vsel %vm563_vm13, %v405_v8, %v406_v18  ;;  %v437_v18 = vand.u32 65535, %v1816_v38  ;;  %v469_v38 = vand.u32 65535, %v1836_v52  ;;  %v501_v52 = vand.u32 65535, %v1856_v10 }
 0x1d5   :  { %vm375_vm14 = vcmp.eq.f32.partialorder %v1750_v26, %v336_v41  ;;  %vm376_vm15 = vcmp.eq.f32.partialorder %v1753_v28, %v336_v41  ;;  %553 = vmin.xlane.f32.xlu0 %v1894_v19  ;;  %v566_v16 = vshra.s32 %v1896_v43, 16  ;;  %v533_v10 = vand.u32 65535, %v1876_v30 }
 0x1d6   :  { %v407_v17 = vsel %vm375_vm14, %v1798_v23, 256  ;;  %v408_v25 = vsel %vm376_vm15, %v1801_v24, 256  ;;  %v565_v30 = vand.u32 65535, %v1896_v43 }
 0x1d7   :  { %vm579_vm0 = vcmp.lt.s32.totalorder %v407_v17, %v408_v25  ;;  %v1904_v27 = vcvt.s32.f32 %v566_v16 }
 0x1d8   :  { %v339_v49 = vpop.xlane.xlu1 %338  ;;  %v1906_v51 = vsel %vm579_vm0, %v407_v17, %v408_v25  ;;  %v439_v17 = vcvt.s32.f32 %v437_v18  ;;  %v453_v25 = vand.u32 65535, %v1826_v44  ;;  %v485_v44 = vand.u32 65535, %v1846_v62 }
 0x1d9   :  { %vm377_vm1 = vcmp.eq.f32.partialorder %v1758_v36, %v339_v49  ;;  %vm378_vm2 = vcmp.eq.f32.partialorder %v1761_v37, %v339_v49  ;;  %569 = vmin.xlane.f32.xlu1 %v1904_v27  ;;  %v582_v26 = vshra.s32 %v1906_v51, 16  ;;  %v517_v62 = vand.u32 65535, %v1866_v22 }
 0x1da   :  { %v409_v28 = vsel %vm377_vm1, %v1798_v23, 256  ;;  %v410_v32 = vsel %vm378_vm2, %v1801_v24, 256  ;;  %v549_v22 = vand.u32 65535, %v1886_v35  ;;  %v581_v35 = vand.u32 65535, %v1906_v51 }
 0x1db   :  { %vm595_vm3 = vcmp.lt.s32.totalorder %v409_v28, %v410_v32  ;;  %v1914_v33 = vcvt.s32.f32 %v582_v26  ;;  %v455_v26 = vcvt.s32.f32 %v453_v25 }
 0x1dc   :  { %v342_v55 = vpop.xlane.xlu0 %341  ;;  %v1916_v59 = vsel %vm595_vm3, %v409_v28, %v410_v32  ;;  %v471_v32 = vcvt.s32.f32 %v469_v38 }
 0x1dd   :  { %vm379_vm4 = vcmp.eq.f32.partialorder %v1766_v45, %v342_v55  ;;  %vm380_vm5 = vcmp.eq.f32.partialorder %v1769_v48, %v342_v55  ;;  %585 = vmin.xlane.f32.xlu0 %v1914_v33  ;;  %v598_v36 = vshra.s32 %v1916_v59, 16  ;;  %v597_v43 = vand.u32 65535, %v1916_v59 }
 0x1de   :  { %v411_v37 = vsel %vm379_vm4, %v1798_v23, 256  ;;  %v412_v39 = vsel %vm380_vm5, %v1801_v24, 256 }
 0x1df   :  { %vm611_vm6 = vcmp.lt.s32.totalorder %v411_v37, %v412_v39  ;;  %v1924_v40 = vcvt.s32.f32 %v598_v36  ;;  %v487_v36 = vcvt.s32.f32 %v485_v44 }
 0x1e0   :  { %v345_v63 = vpop.xlane.xlu1 %344  ;;  %v1926_v9 = vsel %vm611_vm6, %v411_v37, %v412_v39  ;;  %v503_v39 = vcvt.s32.f32 %v501_v52 }
 0x1e1   :  { %vm381_vm7 = vcmp.eq.f32.partialorder %v1774_v56, %v345_v63  ;;  %vm382_vm8 = vcmp.eq.f32.partialorder %v1777_v57, %v345_v63  ;;  %601 = vmin.xlane.f32.xlu1 %v1924_v40  ;;  %v614_v45 = vshra.s32 %v1926_v9, 16  ;;  %v613_v51 = vand.u32 65535, %v1926_v9 }
 0x1e2   :  { %v413_v48 = vsel %vm381_vm7, %v1798_v23, 256  ;;  %v414_v46 = vsel %vm382_vm8, %v1801_v24, 256 }
 0x1e3   :  { %vm627_vm9 = vcmp.lt.s32.totalorder %v413_v48, %v414_v46  ;;  %v1934_v47 = vcvt.s32.f32 %v614_v45  ;;  %v519_v45 = vcvt.s32.f32 %v517_v62 }
 0x1e4   :  { %v348_v12 = vpop.xlane.xlu0 %347  ;;  %v1936_v15 = vsel %vm627_vm9, %v413_v48, %v414_v46  ;;  %v535_v46 = vcvt.s32.f32 %v533_v10 }
 0x1e5   :  { %vm383_vm10 = vcmp.eq.f32.partialorder %v1782_v3, %v348_v12  ;;  %vm384_vm11 = vcmp.eq.f32.partialorder %v1785_v4, %v348_v12  ;;  %617 = vmin.xlane.f32.xlu0 %v1934_v47  ;;  %v630_v56 = vshra.s32 %v1936_v15, 16  ;;  %v629_v59 = vand.u32 65535, %v1936_v15 }
 0x1e6   :  { %v415_v57 = vsel %vm383_vm10, %v1798_v23, 256  ;;  %v416_v53 = vsel %vm384_vm11, %v1801_v24, 256 }
 0x1e7   :  { %vm643_vm12 = vcmp.lt.s32.totalorder %v415_v57, %v416_v53  ;;  %v1944_v54 = vcvt.s32.f32 %v630_v56  ;;  %v551_v56 = vcvt.s32.f32 %v549_v22  ;;  %v631_v18 = vcvt.s32.f32 %v629_v59 }
 0x1e8   :  { %v351_v29 = vpop.xlane.xlu1 %350  ;;  %v1946_v7 = vsel %vm643_vm12, %v415_v57, %v416_v53  ;;  %v567_v53 = vcvt.s32.f32 %v565_v30 }
 0x1e9   :  { %vm385_vm13 = vcmp.eq.f32.partialorder %v1790_v20, %v351_v29  ;;  %vm386_vm14 = vcmp.eq.f32.partialorder %v1793_v21, %v351_v29  ;;  %633 = vmin.xlane.f32.xlu1 %v1944_v54  ;;  %v646_v3 = vshra.s32 %v1946_v7, 16  ;;  %v421_v21 = vand.u32 65535, %v1807_v31 }
 0x1ea   :  { %v417_v4 = vsel %vm385_vm13, %v1798_v23, 256  ;;  %v418_v60 = vsel %vm386_vm14, %v1801_v24, 256  ;;  %v645_v9 = vand.u32 65535, %v1946_v7 }
 0x1eb   :  { %vm659_vm15 = vcmp.lt.s32.totalorder %v417_v4, %v418_v60  ;;  %v1954_v61 = vcvt.s32.f32 %v646_v3  ;;  %v423_v8 = vcvt.s32.f32 %v421_v21  ;;  %v583_v3 = vcvt.s32.f32 %v581_v35 }
 0x1ec   :  { %v1956_v0 = vsel %vm659_vm15, %v417_v4, %v418_v60  ;;  %v599_v60 = vcvt.s32.f32 %v597_v43  ;;  %v615_v21 = vcvt.s32.f32 %v613_v51  ;;  %v700_v35 = vadd.s32 4294967264, %v1798_v23 }
 0x1ed   :  { %649 = vmin.xlane.f32.xlu0 %v1954_v61  ;;  %v662_v11 = vshra.s32 %v1956_v0, 16  ;;  %v661_v15 = vand.u32 65535, %v1956_v0 }
 0x1ee   :  { %v703_v51 = vsub.s32 %v700_v35, %v1658_v1  ;;  %v742_v35 = vadd.s32 4294967216, %v1798_v23 }
 0x1ef   :  { %v1960_v20 = vcvt.s32.f32 %v662_v11 }
 0x1f1   :  { %665 = vmin.xlane.f32.xlu1 %v1960_v20 }
 0x242   :  { %v1964_v6 = vpop.xlane.xlu0 %425 }
 0x243   :  { %vm427_vm0 = vcmp.eq.f32.partialorder %v1814_v13, %v1964_v6 }
 0x244   :  { %v428_v41 = vsel %vm427_vm0, %v423_v8, inf }
 0x245   :  { %429 = vmin.xlane.f32.xlu0 %v428_v41 }
 0x246   :  { %v1969_v16 = vpop.xlane.xlu1 %441 }
 0x247   :  { %vm443_vm1 = vcmp.eq.f32.partialorder %v1824_v42, %v1969_v16 }
 0x248   :  { %v444_v49 = vsel %vm443_vm1, %v439_v17, inf  ;;  %v647_v17 = vcvt.s32.f32 %v645_v9 }
 0x249   :  { %445 = vmin.xlane.f32.xlu1 %v444_v49  ;;  %v663_v49 = vcvt.s32.f32 %v661_v15 }
 0x24a   :  { %v1974_v31 = vpop.xlane.xlu0 %457 }
 0x24b   :  { %vm459_vm2 = vcmp.eq.f32.partialorder %v1834_v50, %v1974_v31 }
 0x24c   :  { %v460_v13 = vsel %vm459_vm2, %v455_v26, inf  ;;  %v448_v26 = vcvt.f32.s32 %v1969_v16  ;;  %v1478_v16 = vmov 1.0   ;;  %vm684_vm2 = vcmask 130112  }
 0x24d   :  { %461 = vmin.xlane.f32.xlu0 %v460_v13 }
 0x24e   :  { %v1979_v28 = vpop.xlane.xlu1 %473 }
 0x24f   :  { %vm475_vm3 = vcmp.eq.f32.partialorder %v1844_v58, %v1979_v28 }
 0x250   :  { %v476_v42 = vsel %vm475_vm3, %v471_v32, inf  ;;  %v679_v32 = vadd.s32 4294967288, %v1798_v23 }
 0x251   :  { %477 = vmin.xlane.f32.xlu1 %v476_v42  ;;  %v449_v42 = vshll.u32 %v448_v26, 16 }
 0x252   :  { %v1984_v55 = vpop.xlane.xlu0 %489 }
 0x253   :  { %vm491_vm4 = vcmp.eq.f32.partialorder %v1854_v2, %v1984_v55 }
 0x254   :  { %v492_v50 = vsel %vm491_vm4, %v487_v36, inf  ;;  %v677_v36 = vsub.s32 %v1798_v23, %v1658_v1 }
 0x255   :  { %493 = vmin.xlane.f32.xlu0 %v492_v50  ;;  %v682_v50 = vsub.s32 %v679_v32, %v1658_v1  ;;  %v721_v32 = vadd.s32 4294967240, %v1798_v23 }
 0x256   :  { %v1989_v37 = vpop.xlane.xlu1 %505 }
 0x257   :  { %vm507_vm5 = vcmp.eq.f32.partialorder %v1864_v14, %v1989_v37 }
 0x258   :  { %v508_v58 = vsel %vm507_vm5, %v503_v39, inf  ;;  %vm691_vm5 = vcmask 195712  }
 0x259   :  { %509 = vmin.xlane.f32.xlu1 %v508_v58 }
 0x25a   :  { %v1994_v63 = vpop.xlane.xlu0 %521 }
 0x25b   :  { %vm523_vm6 = vcmp.eq.f32.partialorder %v1874_v5, %v1994_v63 }
 0x25c   :  { %v524_v2 = vsel %vm523_vm6, %v519_v45, inf }
 0x25d   :  { %525 = vmin.xlane.f32.xlu0 %v524_v2  ;;  %v693_v2 = vadd.s32 4294967272, %v1798_v23 }
 0x25e   :  { %v1999_v48 = vpop.xlane.xlu1 %537 }
 0x25f   :  { %vm539_vm7 = vcmp.eq.f32.partialorder %v1884_v34, %v1999_v48 }
 0x260   :  { %v540_v14 = vsel %vm539_vm7, %v535_v46, inf }
 0x261   :  { %541 = vmin.xlane.f32.xlu1 %v540_v14 }
 0x262   :  { %v2004_v12 = vpop.xlane.xlu0 %553 }
 0x263   :  { %vm555_vm8 = vcmp.eq.f32.partialorder %v1894_v19, %v2004_v12 }
 0x264   :  { %v556_v5 = vsel %vm555_vm8, %v551_v56, inf  ;;  %vm698_vm8 = vcmask 261312  }
 0x265   :  { %557 = vmin.xlane.f32.xlu0 %v556_v5  ;;  %v696_v5 = vsub.s32 %v693_v2, %v1658_v1 }
 0x266   :  { %v2009_v57 = vpop.xlane.xlu1 %569 }
 0x267   :  { %vm571_vm9 = vcmp.eq.f32.partialorder %v1904_v27, %v2009_v57 }
 0x268   :  { %v572_v34 = vsel %vm571_vm9, %v567_v53, inf }
 0x269   :  { %573 = vmin.xlane.f32.xlu1 %v572_v34 }
 0x26a   :  { %v2014_v29 = vpop.xlane.xlu0 %585 }
 0x26b   :  { %vm587_vm10 = vcmp.eq.f32.partialorder %v1914_v33, %v2014_v29 }
 0x26c   :  { %v588_v19 = vsel %vm587_vm10, %v583_v3, inf }
 0x26d   :  { %589 = vmin.xlane.f32.xlu0 %v588_v19 }
 0x26e   :  { %v2019_v4 = vpop.xlane.xlu1 %601 }
 0x26f   :  { %vm603_vm11 = vcmp.eq.f32.partialorder %v1924_v40, %v2019_v4 }
 0x270   :  { %v604_v27 = vsel %vm603_vm11, %v599_v60, inf  ;;  %v512_v60 = vcvt.f32.s32 %v1989_v37  ;;  %vm705_vm11 = vcmask 326912  }
 0x271   :  { %605 = vmin.xlane.f32.xlu1 %v604_v27 }
 0x272   :  { %v2024_v11 = vpop.xlane.xlu0 %617  ;;  %v513_v37 = vshll.u32 %v512_v60, 16  ;;  %v745_v60 = vsub.s32 %v742_v35, %v1658_v1 }
 0x273   :  { %vm619_vm12 = vcmp.eq.f32.partialorder %v1934_v47, %v2024_v11 }
 0x274   :  { %v620_v33 = vsel %vm619_vm12, %v615_v21, inf  ;;  %v707_v21 = vadd.s32 4294967256, %v1798_v23 }
 0x275   :  { %621 = vmin.xlane.f32.xlu0 %v620_v33 }
 0x276   :  { %v2029_v8 = vpop.xlane.xlu1 %633 }
 0x277   :  { %vm635_vm13 = vcmp.eq.f32.partialorder %v1944_v54, %v2029_v8  ;;  %v432_v54 = vcvt.f32.s32 %v1964_v6 }
 0x278   :  { %v636_v40 = vsel %vm635_vm13, %v631_v18, inf  ;;  %v528_v18 = vcvt.f32.s32 %v1994_v63 }
 0x279   :  { %637 = vmin.xlane.f32.xlu1 %v636_v40  ;;  %v433_v13 = vshll.u32 %v432_v54, 16 }
 0x27a   :  { %v2034_v41 = vpop.xlane.xlu0 %649  ;;  %v529_v63 = vshll.u32 %v528_v18, 16 }
 0x27b   :  { %vm651_vm14 = vcmp.eq.f32.partialorder %v1954_v61, %v2034_v41  ;;  %v464_v61 = vcvt.f32.s32 %v1974_v31  ;;  %v480_v31 = vcvt.f32.s32 %v1979_v28  ;;  %v496_v28 = vcvt.f32.s32 %v1984_v55 }
 0x27c   :  { %v652_v47 = vsel %vm651_vm14, %v647_v17, inf  ;;  %v710_v17 = vsub.s32 %v707_v21, %v1658_v1  ;;  %vm712_vm14 = vcmask 392512  }
 0x27d   :  { %653 = vmin.xlane.f32.xlu0 %v652_v47  ;;  %v465_v39 = vshll.u32 %v464_v61, 16  ;;  %v481_v30 = vshll.u32 %v480_v31, 16  ;;  %v497_v55 = vshll.u32 %v496_v28, 16  ;;  %v714_v47 = vadd.s32 4294967248, %v1798_v23 }
 0x27e   :  { %v2039_v25 = vpop.xlane.xlu1 %665 }
 0x27f   :  { %vm667_vm15 = vcmp.eq.f32.partialorder %v1960_v20, %v2039_v25  ;;  %v686_v20 = vadd.s32 4294967280, %v1798_v23 }
 0x280   :  { %v668_v7 = vsel %vm667_vm15, %v663_v49, inf }
 0x281   :  { %669 = vmin.xlane.f32.xlu1 %v668_v7  ;;  %v689_v45 = vsub.s32 %v686_v20, %v1658_v1  ;;  %v724_v20 = vsub.s32 %v721_v32, %v1658_v1 }
 0x2d2   :  { %v430_v38 = vpop.xlane.xlu0 %429 }
 0x2d3   :  { %v431_v0 = vcvt.f32.s32 %v430_v38  ;;  %v544_v38 = vcvt.f32.s32 %v1999_v48 }
 0x2d5   :  { %v434_v44 = vadd.s32 %v433_v13, %v431_v0  ;;  %v717_v13 = vsub.s32 %v714_v47, %v1658_v1  ;;  %v545_v48 = vshll.u32 %v544_v38, 16  ;;  %v763_v38 = vadd.s32 4294967192, %v1798_v23 }
 0x2d6   :  { %v446_v52 = vpop.xlane.xlu1 %445 }
 0x2d7   :  { %v447_v6 = vcvt.f32.s32 %v446_v52  ;;  %vm786_vm0 = vcmp.eq.s32.totalorder %v1801_v24, %v434_v44  ;;  %vm785_vm1 = vcmp.eq.s32.totalorder %v1798_v23, %v434_v44  ;;  %v678_v58 = vrot.slane %v434_v44, %v677_v36 }
 0x2d8   :  { %1167 = vmatprep.mubr.msk.f32.mxu1 %vm786_vm0, %v1478_v16 }
 0x2d9   :  { %v450_v62 = vadd.s32 %v449_v42, %v447_v6  ;;  %1168 = vmatmul.mubr.msk.f32.vlgmr.msra.gmra.mrb[0].mxu1 %vm785_vm1, %v1478_v16  ;;  %v560_v42 = vcvt.f32.s32 %v2004_v12  ;;  %vm719_vm1 = vcmask 458112   ;;  %v728_v6 = vadd.s32 4294967232, %v1798_v23 }
 0x2da   :  { %v462_v10 = vpop.xlane.xlu0 %461 }
 0x2db   :  { %v683_v46 = vrot.slane %v450_v62, %v682_v50  ;;  %v463_v22 = vcvt.f32.s32 %v462_v10  ;;  %vm788_vm3 = vcmp.eq.s32.totalorder %v1801_v24, %v450_v62  ;;  %vm787_vm4 = vcmp.eq.s32.totalorder %v1798_v23, %v450_v62 }
 0x2dc   :  { %1169 = vmatprep.mubr.msk.f32.mxu1 %vm788_vm3, %v1478_v16  ;;  %v561_v12 = vshll.u32 %v560_v42, 16  ;;  %v731_v10 = vsub.s32 %v728_v6, %v1658_v1  ;;  %v766_v42 = vsub.s32 %v763_v38, %v1658_v1 }
 0x2dd   :  { %v685_v14 = vsel %vm684_vm2, %v683_v46, %v678_v58  ;;  %v466_v56 = vadd.s32 %v465_v39, %v463_v22  ;;  %1170 = vmatmul.mubr.msk.f32.gmra.mrb[2].mxu1 %vm787_vm4, %v1478_v16  ;;  %vm726_vm4 = vcmask 523712   ;;  %v735_v46 = vadd.s32 4294967224, %v1798_v23 }
 0x2de   :  { %v478_v53 = vpop.xlane.xlu1 %477 }
 0x2df   :  { %v690_v34 = vrot.slane %v466_v56, %v689_v45  ;;  %v479_v3 = vcvt.f32.s32 %v478_v53  ;;  %vm790_vm6 = vcmp.eq.s32.totalorder %v1801_v24, %v466_v56  ;;  %vm789_vm7 = vcmp.eq.s32.totalorder %v1798_v23, %v466_v56 }
 0x2e0   :  { %1171 = vmatprep.mubr.msk.f32.mxu1 %vm790_vm6, %v1478_v16  ;;  %v576_v45 = vcvt.f32.s32 %v2009_v57 }
 0x2e1   :  { %v692_v43 = vsel %vm691_vm5, %v690_v34, %v685_v14  ;;  %v482_v19 = vadd.s32 %v481_v30, %v479_v3  ;;  %1172 = vmatmul.mubr.msk.f32.gmra.mrb[4].mxu1 %vm789_vm7, %v1478_v16  ;;  %v592_v14 = vcvt.f32.s32 %v2014_v29  ;;  %vm733_vm7 = vcmask 589312  }
 0x2e2   :  { %v494_v27 = vpop.xlane.xlu0 %493  ;;  %v577_v57 = vshll.u32 %v576_v45, 16 }
 0x2e3   :  { %v697_v59 = vrot.slane %v482_v19, %v696_v5  ;;  %v495_v33 = vcvt.f32.s32 %v494_v27  ;;  %vm792_vm9 = vcmp.eq.s32.totalorder %v1801_v24, %v482_v19  ;;  %vm791_vm10 = vcmp.eq.s32.totalorder %v1798_v23, %v482_v19 }
 0x2e4   :  { %1173 = vmatprep.mubr.msk.f32.mxu1 %vm792_vm9, %v1478_v16  ;;  %v738_v5 = vsub.s32 %v735_v46, %v1658_v1  ;;  %v593_v29 = vshll.u32 %v592_v14, 16  ;;  %v608_v19 = vcvt.f32.s32 %v2019_v4  ;;  %v749_v27 = vadd.s32 4294967208, %v1798_v23 }
 0x2e5   :  { %v699_v9 = vsel %vm698_vm8, %v697_v59, %v692_v43  ;;  %v498_v40 = vadd.s32 %v497_v55, %v495_v33  ;;  %1174 = vmatmul.mubr.msk.f32.gmra.mrb[6].mxu1 %vm791_vm10, %v1478_v16  ;;  %vm740_vm10 = vcmask 654912   ;;  %v624_v33 = vcvt.f32.s32 %v2024_v11 }
 0x2e6   :  { %v510_v15 = vpop.xlane.xlu1 %509  ;;  %v609_v4 = vshll.u32 %v608_v19, 16 }
 0x2e7   :  { %v704_v49 = vrot.slane %v498_v40, %v703_v51  ;;  %v511_v7 = vcvt.f32.s32 %v510_v15  ;;  %vm794_vm12 = vcmp.eq.s32.totalorder %v1801_v24, %v498_v40  ;;  %vm793_vm13 = vcmp.eq.s32.totalorder %v1798_v23, %v498_v40 }
 0x2e8   :  { %1175 = vmatprep.mubr.msk.f32.mxu1 %vm794_vm12, %v1478_v16  ;;  %v752_v40 = vsub.s32 %v749_v27, %v1658_v1  ;;  %v625_v11 = vshll.u32 %v624_v33, 16 }
 0x2e9   :  { %v706_v54 = vsel %vm705_vm11, %v704_v49, %v699_v9  ;;  %v514_v26 = vadd.s32 %v513_v37, %v511_v7  ;;  %1176 = vmatmul.mubr.msk.f32.gmra.mrb[8].mxu1 %vm793_vm13, %v1478_v16  ;;  %vm747_vm13 = vcmask 720512  }
 0x2ea   :  { %v526_v0 = vpop.xlane.xlu0 %525 }
 0x2eb   :  { %v711_v61 = vrot.slane %v514_v26, %v710_v17  ;;  %v527_v44 = vcvt.f32.s32 %v526_v0  ;;  %vm796_vm15 = vcmp.eq.s32.totalorder %v1801_v24, %v514_v26  ;;  %vm795_vm0 = vcmp.eq.s32.totalorder %v1798_v23, %v514_v26 }
 0x2ec   :  { %1177 = vmatprep.mubr.msk.f32.mxu1 %vm796_vm15, %v1478_v16  ;;  %v756_v17 = vadd.s32 4294967200, %v1798_v23 }
 0x2ed   :  { %v713_v36 = vsel %vm712_vm14, %v711_v61, %v706_v54  ;;  %v530_v52 = vadd.s32 %v529_v63, %v527_v44  ;;  %1178 = vmatmul.mubr.msk.f32.gmra.mrb[10].mxu1 %vm795_vm0, %v1478_v16  ;;  %v640_v63 = vcvt.f32.s32 %v2029_v8  ;;  %vm754_vm0 = vcmask 786112  }
 0x2ee   :  { %v542_v50 = vpop.xlane.xlu1 %541  ;;  %v759_v54 = vsub.s32 %v756_v17, %v1658_v1  ;;  %v656_v8 = vcvt.f32.s32 %v2034_v41  ;;  %v672_v41 = vcvt.f32.s32 %v2039_v25  ;;  %v1417_v17 = vld [vmem:[%s2230_s0 + $0x18] sm:$0xff] }
 0x2ef   :  { %v718_v39 = vrot.slane %v530_v52, %v717_v13  ;;  %v543_v31 = vcvt.f32.s32 %v542_v50  ;;  %vm798_vm2 = vcmp.eq.s32.totalorder %v1801_v24, %v530_v52  ;;  %vm797_vm3 = vcmp.eq.s32.totalorder %v1798_v23, %v530_v52 }
 0x2f0   :  { %1179 = vmatprep.mubr.msk.f32.mxu1 %vm798_vm2, %v1478_v16  ;;  %v641_v44 = vshll.u32 %v640_v63, 16  ;;  %v673_v46 = vshll.u32 %v672_v41, 16 }
 0x2f1   :  { %v720_v62 = vsel %vm719_vm1, %v718_v39, %v713_v36  ;;  %v546_v58 = vadd.s32 %v545_v48, %v543_v31  ;;  %1180 = vmatmul.mubr.msk.f32.gmra.mrb[12].mxu1 %vm797_vm3, %v1478_v16  ;;  %vm761_vm3 = vcmask 851712   ;;  %v657_v39 = vshll.u32 %v656_v8, 16 }
 0x2f2   :  { %v558_v2 = vpop.xlane.xlu0 %557 }
 0x2f3   :  { %v725_v22 = vrot.slane %v546_v58, %v724_v20  ;;  %v559_v28 = vcvt.f32.s32 %v558_v2  ;;  %vm800_vm5 = vcmp.eq.s32.totalorder %v1801_v24, %v546_v58  ;;  %vm799_vm6 = vcmp.eq.s32.totalorder %v1798_v23, %v546_v58 }
 0x2f4   :  { %1181 = vmatprep.mubr.msk.f32.mxu1 %vm800_vm5, %v1478_v16  ;;  %v770_v20 = vadd.s32 4294967184, %v1798_v23 }
 0x2f5   :  { %v727_v56 = vsel %vm726_vm4, %v725_v22, %v720_v62  ;;  %v562_v30 = vadd.s32 %v561_v12, %v559_v28  ;;  %1182 = vmatmul.mubr.msk.f32.gmra.mrb[14].mxu1 %vm799_vm6, %v1478_v16  ;;  %vm768_vm6 = vcmask 917312   ;;  %v777_v12 = vadd.s32 4294967176, %v1798_v23 }
 0x2f6   :  { %v574_v53 = vpop.xlane.xlu1 %573  ;;  %v773_v45 = vsub.s32 %v770_v20, %v1658_v1 }
 0x2f7   :  { %v732_v34 = vrot.slane %v562_v30, %v731_v10  ;;  %v575_v3 = vcvt.f32.s32 %v574_v53  ;;  %vm802_vm8 = vcmp.eq.s32.totalorder %v1801_v24, %v562_v30  ;;  %vm801_vm9 = vcmp.eq.s32.totalorder %v1798_v23, %v562_v30 }
 0x2f8   :  { %1183 = vmatprep.mubr.msk.f32.mxu1 %vm802_vm8, %v1478_v16  ;;  %v780_v22 = vsub.s32 %v777_v12, %v1658_v1 }
 0x2f9   :  { %v734_v55 = vsel %vm733_vm7, %v732_v34, %v727_v56  ;;  %v578_v43 = vadd.s32 %v577_v57, %v575_v3  ;;  %1184 = vmatmul.mubr.msk.f32.gmra.mrb[16].mxu1 %vm801_vm9, %v1478_v16 }
 0x2fa   :  { %v590_v51 = vpop.xlane.xlu0 %589 }
 0x2fb   :  { %v739_v21 = vrot.slane %v578_v43, %v738_v5  ;;  %v591_v59 = vcvt.f32.s32 %v590_v51  ;;  %vm804_vm11 = vcmp.eq.s32.totalorder %v1801_v24, %v578_v43  ;;  %vm803_vm12 = vcmp.eq.s32.totalorder %v1798_v23, %v578_v43 }
 0x2fc   :  { %1185 = vmatprep.mubr.msk.f32.mxu1 %vm804_vm11, %v1478_v16  ;;  %vm775_vm11 = vcmask 982912  }
 0x2fd   :  { %v741_v18 = vsel %vm740_vm10, %v739_v21, %v734_v55  ;;  %v594_v9 = vadd.s32 %v593_v29, %v591_v59  ;;  %1186 = vmatmul.mubr.msk.f32.gmra.mrb[18].mxu1 %vm803_vm12, %v1478_v16  ;;  %vm782_vm12 = vcmask 1048512   ;;  %v1416_v59 = vld [vmem:[%s2230_s0 + $0x10] sm:$0xff] }
 0x2fe   :  { %v606_v37 = vpop.xlane.xlu1 %605 }
 0x2ff   :  { %v746_v15 = vrot.slane %v594_v9, %v745_v60  ;;  %v607_v47 = vcvt.f32.s32 %v606_v37  ;;  %vm806_vm14 = vcmp.eq.s32.totalorder %v1801_v24, %v594_v9  ;;  %vm805_vm15 = vcmp.eq.s32.totalorder %v1798_v23, %v594_v9 }
 0x300   :  { %1187 = vmatprep.mubr.msk.f32.mxu1 %vm806_vm14, %v1478_v16 }
 0x301   :  { %v748_v49 = vsel %vm747_vm13, %v746_v15, %v741_v18  ;;  %v610_v7 = vadd.s32 %v609_v4, %v607_v47  ;;  %1188 = vmatmul.mubr.msk.f32.gmra.mrb[20].mxu1 %vm805_vm15, %v1478_v16 }
 0x302   :  { %v622_v26 = vpop.xlane.xlu0 %621 }
 0x303   :  { %v753_v13 = vrot.slane %v610_v7, %v752_v40  ;;  %v623_v0 = vcvt.f32.s32 %v622_v26  ;;  %vm808_vm1 = vcmp.eq.s32.totalorder %v1801_v24, %v610_v7  ;;  %vm807_vm2 = vcmp.eq.s32.totalorder %v1798_v23, %v610_v7 }
 0x304   :  { %1189 = vmatprep.mubr.msk.f32.mxu1 %vm808_vm1, %v1478_v16 }
 0x305   :  { %v755_v32 = vsel %vm754_vm0, %v753_v13, %v748_v49  ;;  %v626_v61 = vadd.s32 %v625_v11, %v623_v0  ;;  %1190 = vmatmul.mubr.msk.f32.gmra.mrb[22].mxu1 %vm807_vm2, %v1478_v16 }
 0x306   :  { %v638_v36 = vpop.xlane.xlu1 %637 }
 0x307   :  { %v760_v52 = vrot.slane %v626_v61, %v759_v54  ;;  %v639_v48 = vcvt.f32.s32 %v638_v36  ;;  %vm810_vm4 = vcmp.eq.s32.totalorder %v1801_v24, %v626_v61  ;;  %vm809_vm5 = vcmp.eq.s32.totalorder %v1798_v23, %v626_v61  ;;  %v1418_v54 = vld [vmem:[%s2230_s0 + $0x20] sm:$0xff] }
 0x308   :  { %1191 = vmatprep.mubr.msk.f32.mxu1 %vm810_vm4, %v1478_v16 }
 0x309   :  { %v762_v50 = vsel %vm761_vm3, %v760_v52, %v755_v32  ;;  %v642_v6 = vadd.s32 %v641_v44, %v639_v48  ;;  %1192 = vmatmul.mubr.msk.f32.gmra.mrb[24].mxu1 %vm809_vm5, %v1478_v16  ;;  %v1419_v44 = vld [vmem:[%s2230_s0 + $0x28] sm:$0xff] }
 0x30a   :  { %v654_v31 = vpop.xlane.xlu0 %653 }
 0x30b   :  { %v767_v62 = vrot.slane %v642_v6, %v766_v42  ;;  %v655_v58 = vcvt.f32.s32 %v654_v31  ;;  %vm812_vm7 = vcmp.eq.s32.totalorder %v1801_v24, %v642_v6  ;;  %vm811_vm8 = vcmp.eq.s32.totalorder %v1798_v23, %v642_v6 }
 0x30c   :  { %1193 = vmatprep.mubr.msk.f32.mxu1 %vm812_vm7, %v1478_v16 }
 0x30d   :  { %v769_v10 = vsel %vm768_vm6, %v767_v62, %v762_v50  ;;  %v658_v2 = vadd.s32 %v657_v39, %v655_v58  ;;  %1194 = vmatmul.mubr.msk.f32.gmra.mrb[26].mxu1 %vm811_vm8, %v1478_v16  ;;  %v1420_v50 = vld [vmem:[%s2230_s0 + $0x30] sm:$0xff]  ;;  %v1421_v58 = vld [vmem:[%s2230_s0 + $0x38] sm:$0xff] }
 0x30e   :  { %v670_v25 = vpop.xlane.xlu1 %669 }
 0x30f   :  { %v671_v28 = vcvt.f32.s32 %v670_v25  ;;  %vm814_vm9 = vcmp.eq.s32.totalorder %v1801_v24, %v658_v2  ;;  %vm813_vm10 = vcmp.eq.s32.totalorder %v1798_v23, %v658_v2  ;;  %v774_v14 = vrot.slane %v658_v2, %v773_v45 }
 0x310   :  { %1195 = vmatprep.mubr.msk.f32.mxu1 %vm814_vm9, %v1478_v16 }
 0x311   :  { %v674_v56 = vadd.s32 %v673_v46, %v671_v28  ;;  %1196 = vmatmul.mubr.msk.f32.gmra.mrb[28].mxu1 %vm813_vm10, %v1478_v16  ;;  %v776_v57 = vsel %vm775_vm11, %v774_v14, %v769_v10  ;;  %v1422_v28 = vld [vmem:[%s2230_s0 + $0x40] sm:$0xff] }
 0x313   :  { %v781_v30 = vrot.slane %v674_v56, %v780_v22  ;;  %vm816_vm13 = vcmp.eq.s32.totalorder %v1801_v24, %v674_v56  ;;  %vm815_vm14 = vcmp.eq.s32.totalorder %v1798_v23, %v674_v56  ;;  %v1414_v23 = vld [vmem:[%s2230_s0] sm:$0xff] }
 0x314   :  { %1197 = vmatprep.mubr.msk.f32.mxu1 %vm816_vm13, %v1478_v16 }
 0x315   :  { %v783_v1 = vsel %vm782_vm12, %v781_v30, %v776_v57  ;;  %1198 = vmatmul.mubr.msk.f32.gmra.mrb[30].mxu1 %vm815_vm14, %v1478_v16  ;;  %v1415_v16 = vld [vmem:[%s2230_s0 + $0x8] sm:$0xff] }
 0x316   :  { %784 = vst [vmem:[%s2233_s3] sm:$0x1] %v783_v1  ;;  %s1479_s3 = smov [#allocation2]  }
 0x317   :  { %s1108_s19 = sshll.u32 %s1479_s3, 4  ;;  %s1109_s19 = int_to_ptr.vmem [resolvable:$true] %s1108_s19 }
 0x318   :  { %s1430_s20 = scalar_lea.vmem %s1109_s19, 2048  ;;  %p1435_p1 = scmp.lt.s32.totalorder %s1109_s19, %s1109_s19 }
 0x319   :  { %p1431_p0 = scmp.ne.s32.totalorder %s1109_s19, %s1430_s20  ;;  %p1436_p2 = scmp.lt.s32.totalorder %s1430_s20, %s1430_s20 }
 0x31b   :  { %p1437_p3 = por %p1436_p2, %p1435_p1 }
 0x31d   :  { %p1438_p4 = pnand %p1437_p3, %p1431_p0 }
 0x3ac   :  { %v1295_v5 = vpop.f32.mrb[0].mxu1 }
 0x3ad   :  { %v1296_v53 = vpop.f32.mrb[1].mxu1 }
 0x3ae   :  { %v1297_v35 = vadd.f32 %v1296_v53, %v1295_v5  ;;  %v1423_v53 = vld [vmem:[%s2230_s0 + $0x48] sm:$0xff] }
 0x3b0   :  { %1026 = vst [vmem:[#allocation2] sm:$0xff] %v1297_v35  ;;  %v1298_v34 = vpop.f32.mrb[2].mxu1  ;;  %v1042_v24 = vsub.f32 %v1297_v35, %v1414_v23 }
 0x3b1   :  { %v1299_v3 = vpop.f32.mrb[3].mxu1 }
 0x3b2   :  { %v1300_v29 = vadd.f32 %v1299_v3, %v1298_v34  ;;  %v1058_v60 = vmul.f32 %v1042_v24, %v1042_v24 }
 0x3b4   :  { %1027 = vst [vmem:[#allocation2 + $0x8] sm:$0xff] %v1300_v29  ;;  %v1043_v55 = vsub.f32 %v1300_v29, %v1415_v16  ;;  %v1301_v43 = vpop.f32.mrb[4].mxu1  ;;  %v1424_v16 = vld [vmem:[%s2230_s0 + $0x50] sm:$0xff] }
 0x3b5   :  { %v1302_v19 = vpop.f32.mrb[5].mxu1 }
 0x3b6   :  { %v1059_v51 = vmul.f32 %v1043_v55, %v1043_v55  ;;  %v1303_v27 = vadd.f32 %v1302_v19, %v1301_v43 }
 0x3b8   :  { %v1074_v21 = vadd.f32 %v1059_v51, %v1058_v60  ;;  %1028 = vst [vmem:[#allocation2 + $0x10] sm:$0xff] %v1303_v27  ;;  %v1044_v33 = vsub.f32 %v1303_v27, %v1416_v59  ;;  %v1304_v18 = vpop.f32.mrb[6].mxu1 }
 0x3b9   :  { %v1305_v9 = vpop.f32.mrb[7].mxu1 }
 0x3ba   :  { %v1060_v4 = vmul.f32 %v1044_v33, %v1044_v33  ;;  %v1306_v40 = vadd.f32 %v1305_v9, %v1304_v18 }
 0x3bc   :  { %v1075_v37 = vadd.f32 %v1074_v21, %v1060_v4  ;;  %1029 = vst [vmem:[#allocation2 + $0x18] sm:$0xff] %v1306_v40  ;;  %v1045_v15 = vsub.f32 %v1306_v40, %v1417_v17  ;;  %v1307_v47 = vpop.f32.mrb[8].mxu1  ;;  %v1425_v21 = vld [vmem:[%s2230_s0 + $0x58] sm:$0xff] }
 0x3bd   :  { %v1308_v11 = vpop.f32.mrb[9].mxu1 }
 0x3be   :  { %v1061_v49 = vmul.f32 %v1045_v15, %v1045_v15  ;;  %v1309_v7 = vadd.f32 %v1308_v11, %v1307_v47 }
 0x3c0   :  { %v1076_v63 = vadd.f32 %v1075_v37, %v1061_v49  ;;  %1030 = vst [vmem:[#allocation2 + $0x20] sm:$0xff] %v1309_v7  ;;  %v1046_v26 = vsub.f32 %v1309_v7, %v1418_v54  ;;  %v1310_v38 = vpop.f32.mrb[10].mxu1  ;;  %v1426_v37 = vld [vmem:[%s2230_s0 + $0x60] sm:$0xff] }
 0x3c1   :  { %v1311_v13 = vpop.f32.mrb[11].mxu1 }
 0x3c2   :  { %v1062_v0 = vmul.f32 %v1046_v26, %v1046_v26  ;;  %v1312_v32 = vadd.f32 %v1311_v13, %v1310_v38 }
 0x3c4   :  { %v1077_v61 = vadd.f32 %v1076_v63, %v1062_v0  ;;  %1031 = vst [vmem:[#allocation2 + $0x28] sm:$0xff] %v1312_v32  ;;  %v1047_v8 = vsub.f32 %v1312_v32, %v1419_v44  ;;  %v1313_v42 = vpop.f32.mrb[12].mxu1  ;;  %v1427_v63 = vld [vmem:[%s2230_s0 + $0x68] sm:$0xff] }
 0x3c5   :  { %v1314_v36 = vpop.f32.mrb[13].mxu1 }
 0x3c6   :  { %v1063_v52 = vmul.f32 %v1047_v8, %v1047_v8  ;;  %v1315_v48 = vadd.f32 %v1314_v36, %v1313_v42 }
 0x3c8   :  { %v1078_v20 = vadd.f32 %v1077_v61, %v1063_v52  ;;  %1032 = vst [vmem:[#allocation2 + $0x30] sm:$0xff] %v1315_v48  ;;  %v1048_v6 = vsub.f32 %v1315_v48, %v1420_v50  ;;  %v1316_v39 = vpop.f32.mrb[14].mxu1  ;;  %v1428_v61 = vld [vmem:[%s2230_s0 + $0x70] sm:$0xff]  ;;  %v1429_v48 = vld [vmem:[%s2230_s0 + $0x78] sm:$0xff] }
 0x3c9   :  { %v1317_v41 = vpop.f32.mrb[15].mxu1 }
 0x3ca   :  { %v1064_v31 = vmul.f32 %v1048_v6, %v1048_v6  ;;  %v1318_v12 = vadd.f32 %v1317_v41, %v1316_v39 }
 0x3cc   :  { %v1079_v62 = vadd.f32 %v1078_v20, %v1064_v31  ;;  %1033 = vst [vmem:[#allocation2 + $0x38] sm:$0xff] %v1318_v12  ;;  %v1049_v45 = vsub.f32 %v1318_v12, %v1421_v58  ;;  %v1319_v10 = vpop.f32.mrb[16].mxu1 }
 0x3cd   :  { %v1320_v2 = vpop.f32.mrb[17].mxu1 }
 0x3ce   :  { %v1065_v46 = vmul.f32 %v1049_v45, %v1049_v45  ;;  %v1321_v25 = vadd.f32 %v1320_v2, %v1319_v10 }
 0x3d0   :  { %v1080_v22 = vadd.f32 %v1079_v62, %v1065_v46  ;;  %1034 = vst [vmem:[#allocation2 + $0x40] sm:$0xff] %v1321_v25  ;;  %v1050_v14 = vsub.f32 %v1321_v25, %v1422_v28  ;;  %v1322_v56 = vpop.f32.mrb[18].mxu1 }
 0x3d1   :  { %v1323_v30 = vpop.f32.mrb[19].mxu1 }
 0x3d2   :  { %v1066_v57 = vmul.f32 %v1050_v14, %v1050_v14  ;;  %v1324_v1 = vadd.f32 %v1323_v30, %v1322_v56 }
 0x3d4   :  { %v1081_v5 = vadd.f32 %v1080_v22, %v1066_v57  ;;  %1035 = vst [vmem:[#allocation2 + $0x48] sm:$0xff] %v1324_v1  ;;  %v1051_v35 = vsub.f32 %v1324_v1, %v1423_v53  ;;  %v1325_v34 = vpop.f32.mrb[20].mxu1 }
 0x3d5   :  { %v1326_v3 = vpop.f32.mrb[21].mxu1 }
 0x3d6   :  { %v1067_v23 = vmul.f32 %v1051_v35, %v1051_v35  ;;  %v1327_v24 = vadd.f32 %v1326_v3, %v1325_v34 }
 0x3d8   :  { %v1082_v29 = vadd.f32 %v1081_v5, %v1067_v23  ;;  %1036 = vst [vmem:[#allocation2 + $0x50] sm:$0xff] %v1327_v24  ;;  %v1052_v55 = vsub.f32 %v1327_v24, %v1424_v16  ;;  %v1328_v43 = vpop.f32.mrb[22].mxu1 }
 0x3d9   :  { %v1329_v19 = vpop.f32.mrb[23].mxu1 }
 0x3da   :  { %v1068_v60 = vmul.f32 %v1052_v55, %v1052_v55  ;;  %v1330_v51 = vadd.f32 %v1329_v19, %v1328_v43 }
 0x3dc   :  { %v1083_v27 = vadd.f32 %v1082_v29, %v1068_v60  ;;  %1037 = vst [vmem:[#allocation2 + $0x58] sm:$0xff] %v1330_v51  ;;  %v1053_v59 = vsub.f32 %v1330_v51, %v1425_v21  ;;  %v1331_v33 = vpop.f32.mrb[24].mxu1 }
 0x3dd   :  { %v1332_v18 = vpop.f32.mrb[25].mxu1 }
 0x3de   :  { %v1069_v9 = vmul.f32 %v1053_v59, %v1053_v59  ;;  %v1333_v4 = vadd.f32 %v1332_v18, %v1331_v33 }
 0x3e0   :  { %v1084_v40 = vadd.f32 %v1083_v27, %v1069_v9  ;;  %1038 = vst [vmem:[#allocation2 + $0x60] sm:$0xff] %v1333_v4  ;;  %v1054_v17 = vsub.f32 %v1333_v4, %v1426_v37  ;;  %v1334_v15 = vpop.f32.mrb[26].mxu1 }
 0x3e1   :  { %v1335_v47 = vpop.f32.mrb[27].mxu1 }
 0x3e2   :  { %v1070_v11 = vmul.f32 %v1054_v17, %v1054_v17  ;;  %v1336_v49 = vadd.f32 %v1335_v47, %v1334_v15 }
 0x3e4   :  { %v1085_v7 = vadd.f32 %v1084_v40, %v1070_v11  ;;  %1039 = vst [vmem:[#allocation2 + $0x68] sm:$0xff] %v1336_v49  ;;  %v1055_v54 = vsub.f32 %v1336_v49, %v1427_v63  ;;  %v1337_v26 = vpop.f32.mrb[28].mxu1 }
 0x3e5   :  { %v1338_v38 = vpop.f32.mrb[29].mxu1 }
 0x3e6   :  { %v1071_v13 = vmul.f32 %v1055_v54, %v1055_v54  ;;  %v1339_v0 = vadd.f32 %v1338_v38, %v1337_v26 }
 0x3e8   :  { %v1086_v32 = vadd.f32 %v1085_v7, %v1071_v13  ;;  %1040 = vst [vmem:[#allocation2 + $0x70] sm:$0xff] %v1339_v0  ;;  %v1056_v44 = vsub.f32 %v1339_v0, %v1428_v61  ;;  %v1340_v8 = vpop.f32.mrb[30].mxu1 }
 0x3e9   :  { %v1341_v42 = vpop.f32.mrb[31].mxu1 }
 0x3ea   :  { %v1072_v36 = vmul.f32 %v1056_v44, %v1056_v44  ;;  %v1342_v52 = vadd.f32 %v1341_v42, %v1340_v8 }
 0x3ec   :  { %1041 = vst [vmem:[#allocation2 + $0x78] sm:$0xff] %v1342_v52  ;;  %v1057_v20 = vsub.f32 %v1342_v52, %v1429_v48  ;;  %v1087_v50 = vadd.f32 %v1086_v32, %v1072_v36 }
 0x3ee   :  { %v1073_v6 = vmul.f32 %v1057_v20, %v1057_v20 }
 0x3f0   :  { %v1088_v39 = vadd.f32 %v1087_v50, %v1073_v6 }
 0x3f2   :  { %1089 = vadd.xlane.f32.xlu0 %v1088_v39 }
 0x3f3   :  { %1441 = shalt.err (!%p1438_p4)
}
 0x3f4   :  { %s1442_s23 = scalar_lea.hbm %s2234_s4, 2048 }
 0x3f5   :  { %p1443_p5 = scmp.ne.s32.totalorder %s2234_s4, %s1442_s23  ;;  %p1446_p6 = scmp.lt.u32.totalorder %s1442_s23, %s2234_s4 }
 0x3f7   :  { %p1448_p7 = pnand %p1446_p6, %p1443_p5 }
 0x3f9   :  { %1451 = shalt.err (!%p1448_p7)
}
 0x3fa   :  { %s1480_s27 = smov 128   ;;  %s1481_s28 = smov 8   ;;  %vm1099_vm15 = vcmask 0  }
 0x3fb   :  { %1114 = dma.vmem_to_hbm [thread:$0]  %s1109_s19, 2048, %s2234_s4, [#allocation3], %s1480_s27, %s1480_s27, %s1481_s28  }
 0x3fc   :  { %s1482_s6 = smov [#allocation4]  }
 0x3fd   :  { %s1121_s7 = sshll.u32 %s1482_s6, 4  ;;  %s1122_s7 = int_to_ptr.vmem [resolvable:$true] %s1121_s7 }
 0x3fe   :  { %s1452_s9 = scalar_lea.vmem %s1122_s7, 16  ;;  %s1456_s10 = scalar_lea.vmem %s1122_s7, 32 }
 0x3ff   :  { %p1453_p8 = scmp.ne.s32.totalorder %s1122_s7, %s1452_s9  ;;  %p1457_p9 = scmp.lt.s32.totalorder %s1122_s7, %s1122_s7 }
 0x400   :  { %p1458_p10 = scmp.lt.s32.totalorder %s1456_s10, %s1452_s9 }
 0x402   :  { %p1459_p11 = por %p1458_p10, %p1457_p9 }
 0x404   :  { %p1460_p12 = pnand %p1459_p11, %p1453_p8 }
 0x47f   :  { %v1090_v41 = vpop.xlane.xlu0 %1089 }
 0x480   :  { %v1091_v31 = vrot.slane %v1090_v41, 4 }
 0x482   :  { %v1092_v12 = vadd.f32 %v1091_v31, %v1090_v41 }
 0x484   :  { %v1093_v62 = vrot.slane %v1092_v12, 2 }
 0x486   :  { %v1094_v58 = vadd.f32 %v1093_v62, %v1092_v12 }
 0x488   :  { %v1095_v45 = vrot.slane %v1094_v58, 1 }
 0x48a   :  { %v1096_v10 = vadd.f32 %v1095_v45, %v1094_v58 }
 0x48c   :  { %1407 = vpush %v1096_v10 }
 0x4bd   :  { %s1408_s8 = spop %1407 }
 0x4be   :  { %v1098_v2 = vstv %s1408_s8 }
 0x4bf   :  { %1100 = vst.msk [vmem:[#allocation4] sm:$0x1] %vm1099_vm15, %v1098_v2 }
 0x4c0   :  { %1463 = shalt.err (!%p1460_p12)
}
 0x4c1   :  { %s1464_s11 = scalar_lea.hbm %s2235_s5, 16 }
 0x4c2   :  { %p1465_p13 = scmp.ne.s32.totalorder %s2235_s5, %s1464_s11  ;;  %p1468_p0 = scmp.lt.u32.totalorder %s1464_s11, %s2235_s5 }
 0x4c4   :  { %p1470_p1 = pnand %p1468_p0, %p1465_p13 }
 0x4c6   :  { %1473 = shalt.err (!%p1470_p1)
}
 0x4c7   :  { %1124 = dma.vmem_to_hbm [thread:$0]  %s1122_s7, 16, %s2235_s5, [#allocation5]  }
 0x4c8   :  { %1474 = dma.done.wait [#allocation3], 2048  }
 0x4c9   :  { %1475 = vsyncadd [#allocation3], 4294965248 }
 0x4ca   :  { %1476 = dma.done.wait [#allocation5], 16  }
 0x4cb   :  { %1477 = vsyncadd [#allocation5], 4294967280 }
 0x4cc   :  { %1133 = vsyncpa [#allocation3], 1 }
 0x4cd   :  { %1134 = vsyncpa [#allocation5], 1 }

// kernel: a_call__.2
= control target key start
LH: loop header
LB: loop body
LE: loop exit
PB: predicated region body
PF: predicated region fallthrough
CT: control target
= control target key end

     0   :  { %9 = vsyncpa [#allocation3], 0  ;;  %s4452_s0 = inlined_call_operand.hbm [shape: f32[256,128], index: 0, kind: input, shape index: {}]   ;;  %s4453_s1 = inlined_call_operand.hbm [shape: f32[128,128], index: 1, kind: input, shape index: {}]   ;;  %s4454_s2 = inlined_call_operand.vmem [shape: f32[256,128], index: 2, kind: output, shape index: {0}]   ;;  %s4455_s3 = inlined_call_operand.vmem [shape: f32[1,256], index: 3, kind: output, shape index: {1}]  }
   0x1   :  { %10 = vsyncpa [#allocation5], 0  ;;  %s3615_s12 = smov [#allocation2]   ;;  %s3567_s16 = scalar_lea.hbm %s4452_s0, 4096 }
   0x2   :  { %s16_s13 = sshll.u32 %s3615_s12, 4  ;;  %p3568_p0 = scmp.ne.s32.totalorder %s4452_s0, %s3567_s16  ;;  %s17_s13 = int_to_ptr.vmem [resolvable:$true] %s16_s13 }
   0x3   :  { %p3571_p1 = scmp.lt.u32.totalorder %s3567_s16, %s4452_s0 }
   0x5   :  { %p3573_p2 = pnand %p3571_p1, %p3568_p0 }
   0x7   :  { %3576 = shalt.err (!%p3573_p2)
}
   0x8   :  { %s3577_s21 = scalar_lea.vmem %s17_s13, 4096  ;;  %p3582_p4 = scmp.lt.s32.totalorder %s17_s13, %s17_s13 }
   0x9   :  { %p3578_p3 = scmp.ne.s32.totalorder %s17_s13, %s3577_s21  ;;  %p3583_p5 = scmp.lt.s32.totalorder %s3577_s21, %s3577_s21 }
   0xb   :  { %p3584_p6 = por %p3583_p5, %p3582_p4 }
   0xd   :  { %p3585_p7 = pnand %p3584_p6, %p3578_p3 }
   0xf   :  { %3588 = shalt.err (!%p3585_p7)
}
  0x10   :  { %s3616_s22 = smov 128   ;;  %s3617_s23 = smov 8  }
  0x11   :  { %22 = dma.hbm_to_vmem [thread:$0]  %s4452_s0, 4096, %s17_s13, [#allocation3], %s3616_s22, %s3616_s22, %s3617_s23  }
  0x12   :  { %s3618_s26 = smov [#allocation4]   ;;  %s3589_s30 = scalar_lea.hbm %s4453_s1, 2048 }
  0x13   :  { %s28_s27 = sshll.u32 %s3618_s26, 4  ;;  %p3590_p8 = scmp.ne.s32.totalorder %s4453_s1, %s3589_s30  ;;  %s29_s27 = int_to_ptr.vmem [resolvable:$true] %s28_s27 }
  0x14   :  { %p3593_p9 = scmp.lt.u32.totalorder %s3589_s30, %s4453_s1 }
  0x16   :  { %p3595_p10 = pnand %p3593_p9, %p3590_p8 }
  0x18   :  { %3598 = shalt.err (!%p3595_p10)
}
  0x19   :  { %s3599_s8 = scalar_lea.vmem %s29_s27, 2048  ;;  %p3604_p12 = scmp.lt.s32.totalorder %s29_s27, %s29_s27 }
  0x1a   :  { %p3600_p11 = scmp.ne.s32.totalorder %s29_s27, %s3599_s8  ;;  %p3605_p13 = scmp.lt.s32.totalorder %s3599_s8, %s3599_s8 }
  0x1c   :  { %p3606_p0 = por %p3605_p13, %p3604_p12 }
  0x1e   :  { %p3607_p1 = pnand %p3606_p0, %p3600_p11 }
  0x20   :  { %3610 = shalt.err (!%p3607_p1)
}
  0x21   :  { %34 = dma.hbm_to_vmem [thread:$0]  %s4453_s1, 2048, %s29_s27, [#allocation5], %s3616_s22, %s3616_s22, %s3617_s23  }
  0x22   :  { %3611 = dma.done.wait [#allocation3], 4096  }
  0x23   :  { %3612 = vsyncadd [#allocation3], 4294963200 }
  0x24   :  { %3613 = dma.done.wait [#allocation5], 2048  }
  0x25   :  { %3614 = vsyncadd [#allocation5], 4294965248  ;;  %v73_v0 = vld [vmem:[#allocation4] sm:$0xff]  ;;  %v74_v1 = vld [vmem:[#allocation4 + $0x8] sm:$0xff]  ;;  %vm3173_vm0 = vcmask 130112   ;;  %vm3180_vm1 = vcmask 195712  }
  0x26   :  { %v75_v2 = vld [vmem:[#allocation4 + $0x10] sm:$0xff]  ;;  %v3511_v3 = vpack.c.bf16 %v74_v1, %v73_v0  ;;  %v76_v4 = vld [vmem:[#allocation4 + $0x18] sm:$0xff]  ;;  %v41_v6 = vld [vmem:[#allocation2] sm:$0xff]  ;;  %vm3187_vm2 = vcmask 261312   ;;  %vm3194_vm3 = vcmask 326912   ;;  %vm3201_vm4 = vcmask 392512  }
  0x27   :  { %v3515_v5 = vpack.c.bf16 %v76_v4, %v75_v2  ;;  %v57_v7 = vld [vmem:[#allocation2 + $0x80] sm:$0xff]  ;;  %v78_v9 = vld [vmem:[#allocation4 + $0x28] sm:$0xff]  ;;  %3463 = vmatprep.mubr.f32.mxu0 %v41_v6  ;;  %v79_v11 = vld [vmem:[#allocation4 + $0x30] sm:$0xff]  ;;  %vm3208_vm5 = vcmask 458112   ;;  %vm3215_vm6 = vcmask 523712   ;;  %vm3222_vm7 = vcmask 589312  }
  0x28   :  { %3512 = vmatprep.subr.bf16.mxu0 %v3511_v3  ;;  %3543 = vmatprep.subr.bf16.mxu1 %v3511_v3  ;;  %v77_v8 = vld [vmem:[#allocation4 + $0x20] sm:$0xff]  ;;  %v80_v12 = vld [vmem:[#allocation4 + $0x38] sm:$0xff]  ;;  %v82_v15 = vld [vmem:[#allocation4 + $0x48] sm:$0xff]  ;;  %vm3229_vm8 = vcmask 654912   ;;  %vm3236_vm9 = vcmask 720512   ;;  %vm3243_vm10 = vcmask 786112  }
  0x29   :  { %3514 = vmatpush3.bf16.xpose.msra.mxu0 %v3511_v3  ;;  %3551 = vmatpush3.bf16.xpose.msra.mxu1 %v3511_v3  ;;  %v3519_v10 = vpack.c.bf16 %v78_v9, %v77_v8  ;;  %v3523_v13 = vpack.c.bf16 %v80_v12, %v79_v11  ;;  %v81_v14 = vld [vmem:[#allocation4 + $0x40] sm:$0xff]  ;;  %v83_v17 = vld [vmem:[#allocation4 + $0x50] sm:$0xff]  ;;  %v84_v18 = vld [vmem:[#allocation4 + $0x58] sm:$0xff]  ;;  %vm3250_vm11 = vcmask 851712   ;;  %vm3257_vm12 = vcmask 917312  }
  0x2a   :  { %3516 = vmatprep.subr.bf16.mxu0 %v3515_v5  ;;  %3544 = vmatprep.subr.bf16.mxu1 %v3515_v5  ;;  %v3527_v16 = vpack.c.bf16 %v82_v15, %v81_v14  ;;  %v3531_v19 = vpack.c.bf16 %v84_v18, %v83_v17  ;;  %v85_v20 = vld [vmem:[#allocation4 + $0x60] sm:$0xff]  ;;  %v86_v21 = vld [vmem:[#allocation4 + $0x68] sm:$0xff]  ;;  %v87_v23 = vld [vmem:[#allocation4 + $0x70] sm:$0xff]  ;;  %vm3264_vm13 = vcmask 982912   ;;  %vm3271_vm14 = vcmask 1048512  }
  0x2b   :  { %3487 = vmatprep.mubr.f32.mxu1 %v57_v7  ;;  %v3535_v22 = vpack.c.bf16 %v86_v21, %v85_v20  ;;  %v88_v24 = vld [vmem:[#allocation4 + $0x78] sm:$0xff]  ;;  %v42_v26 = vld [vmem:[#allocation2 + $0x8] sm:$0xff]  ;;  %v43_v28 = vld [vmem:[#allocation2 + $0x10] sm:$0xff] }
  0x2c   :  { %v3539_v25 = vpack.c.bf16 %v88_v24, %v87_v23  ;;  %v58_v27 = vld [vmem:[#allocation2 + $0x88] sm:$0xff]  ;;  %v59_v29 = vld [vmem:[#allocation2 + $0x90] sm:$0xff]  ;;  %v44_v30 = vld [vmem:[#allocation2 + $0x18] sm:$0xff] }
  0x2d   :  { %v60_v31 = vld [vmem:[#allocation2 + $0x98] sm:$0xff]  ;;  %v45_v32 = vld [vmem:[#allocation2 + $0x20] sm:$0xff]  ;;  %v46_v34 = vld [vmem:[#allocation2 + $0x28] sm:$0xff] }
  0x2e   :  { %v61_v33 = vld [vmem:[#allocation2 + $0xa0] sm:$0xff]  ;;  %v62_v35 = vld [vmem:[#allocation2 + $0xa8] sm:$0xff]  ;;  %v47_v36 = vld [vmem:[#allocation2 + $0x30] sm:$0xff] }
  0x2f   :  { %v63_v37 = vld [vmem:[#allocation2 + $0xb0] sm:$0xff]  ;;  %v48_v38 = vld [vmem:[#allocation2 + $0x38] sm:$0xff]  ;;  %v49_v40 = vld [vmem:[#allocation2 + $0x40] sm:$0xff] }
  0x30   :  { %v64_v39 = vld [vmem:[#allocation2 + $0xb8] sm:$0xff]  ;;  %v65_v41 = vld [vmem:[#allocation2 + $0xc0] sm:$0xff]  ;;  %v50_v42 = vld [vmem:[#allocation2 + $0x48] sm:$0xff] }
  0x31   :  { %3518 = vmatpush3.bf16.xpose.msra.mxu0 %v3515_v5  ;;  %3552 = vmatpush3.bf16.xpose.msra.mxu1 %v3515_v5  ;;  %v66_v43 = vld [vmem:[#allocation2 + $0xc8] sm:$0xff]  ;;  %v51_v44 = vld [vmem:[#allocation2 + $0x50] sm:$0xff]  ;;  %v52_v46 = vld [vmem:[#allocation2 + $0x58] sm:$0xff] }
  0x32   :  { %3520 = vmatprep.subr.bf16.mxu0 %v3519_v10  ;;  %3545 = vmatprep.subr.bf16.mxu1 %v3519_v10  ;;  %v67_v45 = vld [vmem:[#allocation2 + $0xd0] sm:$0xff]  ;;  %v68_v47 = vld [vmem:[#allocation2 + $0xd8] sm:$0xff]  ;;  %v53_v48 = vld [vmem:[#allocation2 + $0x60] sm:$0xff] }
  0x33   :  { %v69_v49 = vld [vmem:[#allocation2 + $0xe0] sm:$0xff]  ;;  %v54_v50 = vld [vmem:[#allocation2 + $0x68] sm:$0xff]  ;;  %v55_v52 = vld [vmem:[#allocation2 + $0x70] sm:$0xff] }
  0x34   :  { %v70_v51 = vld [vmem:[#allocation2 + $0xe8] sm:$0xff]  ;;  %v71_v53 = vld [vmem:[#allocation2 + $0xf0] sm:$0xff]  ;;  %v56_v54 = vld [vmem:[#allocation2 + $0x78] sm:$0xff] }
  0x35   :  { %v72_v55 = vld [vmem:[#allocation2 + $0xf8] sm:$0xff] }
  0x39   :  { %3522 = vmatpush3.bf16.xpose.msra.mxu0 %v3519_v10  ;;  %3553 = vmatpush3.bf16.xpose.msra.mxu1 %v3519_v10 }
  0x3a   :  { %3524 = vmatprep.subr.bf16.mxu0 %v3523_v13  ;;  %3546 = vmatprep.subr.bf16.mxu1 %v3523_v13 }
  0x41   :  { %3526 = vmatpush3.bf16.xpose.msra.mxu0 %v3523_v13  ;;  %3554 = vmatpush3.bf16.xpose.msra.mxu1 %v3523_v13 }
  0x42   :  { %3528 = vmatprep.subr.bf16.mxu0 %v3527_v16  ;;  %3547 = vmatprep.subr.bf16.mxu1 %v3527_v16 }
  0x49   :  { %3530 = vmatpush3.bf16.xpose.msra.mxu0 %v3527_v16  ;;  %3555 = vmatpush3.bf16.xpose.msra.mxu1 %v3527_v16 }
  0x4a   :  { %3532 = vmatprep.subr.bf16.mxu0 %v3531_v19  ;;  %3548 = vmatprep.subr.bf16.mxu1 %v3531_v19 }
  0x51   :  { %3534 = vmatpush3.bf16.xpose.msra.mxu0 %v3531_v19  ;;  %3556 = vmatpush3.bf16.xpose.msra.mxu1 %v3531_v19 }
  0x52   :  { %3536 = vmatprep.subr.bf16.mxu0 %v3535_v22  ;;  %3549 = vmatprep.subr.bf16.mxu1 %v3535_v22 }
  0x59   :  { %3538 = vmatpush3.bf16.xpose.msra.mxu0 %v3535_v22  ;;  %3557 = vmatpush3.bf16.xpose.msra.mxu1 %v3535_v22 }
  0x5a   :  { %3540 = vmatprep.subr.bf16.mxu0 %v3539_v25  ;;  %3550 = vmatprep.subr.bf16.mxu1 %v3539_v25 }
  0x61   :  { %3542 = vmatpush3.bf16.xpose.msra.mxu0 %v3539_v25  ;;  %3558 = vmatpush3.bf16.xpose.msra.mxu1 %v3539_v25 }
  0x68   :  { %3464 = vmatmul.mubr.f32.vlgmr.msra.gmra.mrb[0].mxu0 %v42_v26  ;;  %3488 = vmatmul.mubr.f32.vlgmr.msra.gmra.mrb[0].mxu1 %v58_v27 }
  0x69   :  { %3466 = vmatprep.mubr.f32.mxu0 %v43_v28  ;;  %3490 = vmatprep.mubr.f32.mxu1 %v59_v29 }
  0x6c   :  { %3467 = vmatmul.mubr.f32.gmra.mrb[2].mxu0 %v44_v30  ;;  %3491 = vmatmul.mubr.f32.gmra.mrb[2].mxu1 %v60_v31 }
  0x6d   :  { %3469 = vmatprep.mubr.f32.mxu0 %v45_v32  ;;  %3493 = vmatprep.mubr.f32.mxu1 %v61_v33 }
  0x70   :  { %3470 = vmatmul.mubr.f32.gmra.mrb[4].mxu0 %v46_v34  ;;  %3494 = vmatmul.mubr.f32.gmra.mrb[4].mxu1 %v62_v35  ;;  %v3619_v34 = vmov 0  }
  0x71   :  { %3472 = vmatprep.mubr.f32.mxu0 %v47_v36  ;;  %3496 = vmatprep.mubr.f32.mxu1 %v63_v37 }
  0x72   :  { %3566 = vset.pattern.permute.xlu0 %v3619_v34  ;;  %3565 = vset.pattern.permute.xlu1 %v3619_v34 }
  0x74   :  { %3473 = vmatmul.mubr.f32.gmra.mrb[6].mxu0 %v48_v38  ;;  %3497 = vmatmul.mubr.f32.gmra.mrb[6].mxu1 %v64_v39 }
  0x75   :  { %3475 = vmatprep.mubr.f32.mxu0 %v49_v40  ;;  %3499 = vmatprep.mubr.f32.mxu1 %v65_v41 }
  0x78   :  { %3476 = vmatmul.mubr.f32.gmra.mrb[8].mxu0 %v50_v42  ;;  %3500 = vmatmul.mubr.f32.gmra.mrb[8].mxu1 %v66_v43 }
  0x79   :  { %3478 = vmatprep.mubr.f32.mxu0 %v51_v44  ;;  %3502 = vmatprep.mubr.f32.mxu1 %v67_v45 }
  0x7c   :  { %3479 = vmatmul.mubr.f32.gmra.mrb[10].mxu0 %v52_v46  ;;  %3503 = vmatmul.mubr.f32.gmra.mrb[10].mxu1 %v68_v47 }
  0x7d   :  { %3481 = vmatprep.mubr.f32.mxu0 %v53_v48  ;;  %3505 = vmatprep.mubr.f32.mxu1 %v69_v49 }
  0x80   :  { %3482 = vmatmul.mubr.f32.gmra.mrb[12].mxu0 %v54_v50  ;;  %3506 = vmatmul.mubr.f32.gmra.mrb[12].mxu1 %v70_v51 }
  0x81   :  { %3484 = vmatprep.mubr.f32.mxu0 %v55_v52  ;;  %3508 = vmatprep.mubr.f32.mxu1 %v71_v53 }
  0x84   :  { %3485 = vmatmul.mubr.f32.gmra.mrb[14].mxu0 %v56_v54  ;;  %3509 = vmatmul.mubr.f32.gmra.mrb[14].mxu1 %v72_v55 }
 0x13b   :  { %v3465_v56 = vpop.f32.mrb[0].mxu0  ;;  %v3489_v57 = vpop.f32.mrb[0].mxu1 }
 0x13c   :  { %315 = vst [vmem:[%s4454_s2 + $0x8] sm:$0xff] %v3465_v56  ;;  %331 = vst [vmem:[%s4454_s2 + $0x88] sm:$0xff] %v3489_v57  ;;  %v155_v58 = vpop.f32.mrb[1].mxu0  ;;  %v363_v59 = vmul.f32 %v3489_v57, %v3489_v57  ;;  %v347_v60 = vmul.f32 %v3465_v56, %v3465_v56  ;;  %v235_v61 = vpop.f32.mrb[1].mxu1  ;;  %v474_v57 = vlaneseq }
 0x13d   :  { %314 = vst [vmem:[%s4454_s2] sm:$0xff] %v155_v58  ;;  %330 = vst [vmem:[%s4454_s2 + $0x80] sm:$0xff] %v235_v61  ;;  %v346_v0 = vmul.f32 %v155_v58, %v155_v58  ;;  %v362_v7 = vmul.f32 %v235_v61, %v235_v61  ;;  %v3620_v58 = vmov 1966171168  }
 0x13e   :  { %412 = vadd.xlane.f32.xlu1 %v363_v59  ;;  %380 = vadd.xlane.f32.xlu0 %v347_v60  ;;  %v1503_v59 = vunpack.c.l.s4 %v3620_v58  ;;  %v3762_v60 = vshrl.u32 %v474_v57, 7  ;;  %vm3370_vm15 = vcmp.lt.s32.totalorder %v474_v57, 256 }
 0x13f   :  { %v3468_v62 = vpop.f32.mrb[2].mxu0  ;;  %v3492_v63 = vpop.f32.mrb[2].mxu1 }
 0x140   :  { %317 = vst [vmem:[%s4454_s2 + $0x18] sm:$0xff] %v3468_v62  ;;  %v349_v1 = vmul.f32 %v3468_v62, %v3468_v62  ;;  %v165_v2 = vpop.f32.mrb[3].mxu0  ;;  %333 = vst [vmem:[%s4454_s2 + $0x98] sm:$0xff] %v3492_v63  ;;  %v245_v3 = vpop.f32.mrb[3].mxu1  ;;  %v365_v4 = vmul.f32 %v3492_v63, %v3492_v63  ;;  %v1504_v61 = vunpack.c.0.s8 %v1503_v59  ;;  %v3765_v62 = vsub.s32 0, %v3762_v60 }
 0x141   :  { %316 = vst [vmem:[%s4454_s2 + $0x10] sm:$0xff] %v165_v2  ;;  %332 = vst [vmem:[%s4454_s2 + $0x90] sm:$0xff] %v245_v3  ;;  %v364_v10 = vmul.f32 %v245_v3, %v245_v3  ;;  %v348_v13 = vmul.f32 %v165_v2, %v165_v2  ;;  %v3768_v63 = vsub.s32 1, %v3762_v60  ;;  %v3777_v2 = vsub.s32 4, %v3762_v60 }
 0x142   :  { %378 = vadd.xlane.f32.xlu0 %v346_v0  ;;  %384 = vadd.xlane.f32.xlu1 %v349_v1  ;;  %v3771_v0 = vsub.s32 2, %v3762_v60  ;;  %v3774_v1 = vsub.s32 3, %v3762_v60  ;;  %v3780_v3 = vsub.s32 5, %v3762_v60 }
 0x143   :  { %v3471_v5 = vpop.f32.mrb[4].mxu0  ;;  %v3495_v6 = vpop.f32.mrb[4].mxu1 }
 0x144   :  { %319 = vst [vmem:[%s4454_s2 + $0x28] sm:$0xff] %v3471_v5  ;;  %v175_v8 = vpop.f32.mrb[5].mxu0  ;;  %335 = vst [vmem:[%s4454_s2 + $0xa8] sm:$0xff] %v3495_v6  ;;  %v255_v9 = vpop.f32.mrb[5].mxu1  ;;  %v351_v16 = vmul.f32 %v3471_v5, %v3471_v5  ;;  %v367_v22 = vmul.f32 %v3495_v6, %v3495_v6  ;;  %v3786_v5 = vsub.s32 7, %v3762_v60 }
 0x145   :  { %318 = vst [vmem:[%s4454_s2 + $0x20] sm:$0xff] %v175_v8  ;;  %334 = vst [vmem:[%s4454_s2 + $0xa0] sm:$0xff] %v255_v9  ;;  %v350_v17 = vmul.f32 %v175_v8, %v175_v8  ;;  %v366_v23 = vmul.f32 %v255_v9, %v255_v9  ;;  %v3789_v8 = vsub.s32 %v1504_v61, %v3762_v60 }
 0x146   :  { %410 = vadd.xlane.f32.xlu0 %v362_v7  ;;  %416 = vadd.xlane.f32.xlu1 %v365_v4  ;;  %v3783_v4 = vsub.s32 6, %v3762_v60 }
 0x147   :  { %v3474_v11 = vpop.f32.mrb[6].mxu0  ;;  %v3498_v12 = vpop.f32.mrb[6].mxu1 }
 0x148   :  { %321 = vst [vmem:[%s4454_s2 + $0x38] sm:$0xff] %v3474_v11  ;;  %v185_v14 = vpop.f32.mrb[7].mxu0  ;;  %337 = vst [vmem:[%s4454_s2 + $0xb8] sm:$0xff] %v3498_v12  ;;  %v265_v15 = vpop.f32.mrb[7].mxu1  ;;  %v353_v28 = vmul.f32 %v3474_v11, %v3474_v11  ;;  %v369_v35 = vmul.f32 %v3498_v12, %v3498_v12 }
 0x149   :  { %320 = vst [vmem:[%s4454_s2 + $0x30] sm:$0xff] %v185_v14  ;;  %336 = vst [vmem:[%s4454_s2 + $0xb0] sm:$0xff] %v265_v15  ;;  %v352_v29 = vmul.f32 %v185_v14, %v185_v14  ;;  %v368_v36 = vmul.f32 %v265_v15, %v265_v15 }
 0x14a   :  { %414 = vadd.xlane.f32.xlu0 %v364_v10  ;;  %382 = vadd.xlane.f32.xlu1 %v348_v13 }
 0x14b   :  { %v3477_v18 = vpop.f32.mrb[8].mxu0  ;;  %v3501_v19 = vpop.f32.mrb[8].mxu1 }
 0x14c   :  { %323 = vst [vmem:[%s4454_s2 + $0x48] sm:$0xff] %v3477_v18  ;;  %v195_v20 = vpop.f32.mrb[9].mxu0  ;;  %339 = vst [vmem:[%s4454_s2 + $0xc8] sm:$0xff] %v3501_v19  ;;  %v275_v21 = vpop.f32.mrb[9].mxu1  ;;  %v355_v41 = vmul.f32 %v3477_v18, %v3477_v18  ;;  %v371_v43 = vmul.f32 %v3501_v19, %v3501_v19 }
 0x14d   :  { %322 = vst [vmem:[%s4454_s2 + $0x40] sm:$0xff] %v195_v20  ;;  %338 = vst [vmem:[%s4454_s2 + $0xc0] sm:$0xff] %v275_v21  ;;  %v354_v42 = vmul.f32 %v195_v20, %v195_v20  ;;  %v370_v44 = vmul.f32 %v275_v21, %v275_v21 }
 0x14e   :  { %388 = vadd.xlane.f32.xlu1 %v351_v16  ;;  %386 = vadd.xlane.f32.xlu0 %v350_v17 }
 0x14f   :  { %v3480_v24 = vpop.f32.mrb[10].mxu0  ;;  %v3504_v25 = vpop.f32.mrb[10].mxu1 }
 0x150   :  { %325 = vst [vmem:[%s4454_s2 + $0x58] sm:$0xff] %v3480_v24  ;;  %v205_v26 = vpop.f32.mrb[11].mxu0  ;;  %341 = vst [vmem:[%s4454_s2 + $0xd8] sm:$0xff] %v3504_v25  ;;  %v285_v27 = vpop.f32.mrb[11].mxu1  ;;  %v357_v45 = vmul.f32 %v3480_v24, %v3480_v24  ;;  %v373_v47 = vmul.f32 %v3504_v25, %v3504_v25 }
 0x151   :  { %324 = vst [vmem:[%s4454_s2 + $0x50] sm:$0xff] %v205_v26  ;;  %340 = vst [vmem:[%s4454_s2 + $0xd0] sm:$0xff] %v285_v27  ;;  %v356_v46 = vmul.f32 %v205_v26, %v205_v26  ;;  %v372_v48 = vmul.f32 %v285_v27, %v285_v27 }
 0x152   :  { %420 = vadd.xlane.f32.xlu1 %v367_v22  ;;  %418 = vadd.xlane.f32.xlu0 %v366_v23 }
 0x153   :  { %v3483_v30 = vpop.f32.mrb[12].mxu0  ;;  %v3507_v31 = vpop.f32.mrb[12].mxu1 }
 0x154   :  { %327 = vst [vmem:[%s4454_s2 + $0x68] sm:$0xff] %v3483_v30  ;;  %v215_v32 = vpop.f32.mrb[13].mxu0  ;;  %343 = vst [vmem:[%s4454_s2 + $0xe8] sm:$0xff] %v3507_v31  ;;  %v295_v33 = vpop.f32.mrb[13].mxu1  ;;  %v359_v49 = vmul.f32 %v3483_v30, %v3483_v30  ;;  %v375_v51 = vmul.f32 %v3507_v31, %v3507_v31 }
 0x155   :  { %326 = vst [vmem:[%s4454_s2 + $0x60] sm:$0xff] %v215_v32  ;;  %342 = vst [vmem:[%s4454_s2 + $0xe0] sm:$0xff] %v295_v33  ;;  %v358_v50 = vmul.f32 %v215_v32, %v215_v32  ;;  %v374_v52 = vmul.f32 %v295_v33, %v295_v33 }
 0x156   :  { %392 = vadd.xlane.f32.xlu1 %v353_v28  ;;  %390 = vadd.xlane.f32.xlu0 %v352_v29 }
 0x157   :  { %v3486_v37 = vpop.f32.mrb[14].mxu0  ;;  %v3510_v38 = vpop.f32.mrb[14].mxu1 }
 0x158   :  { %329 = vst [vmem:[%s4454_s2 + $0x78] sm:$0xff] %v3486_v37  ;;  %v225_v39 = vpop.f32.mrb[15].mxu0  ;;  %345 = vst [vmem:[%s4454_s2 + $0xf8] sm:$0xff] %v3510_v38  ;;  %v305_v40 = vpop.f32.mrb[15].mxu1  ;;  %v361_v54 = vmul.f32 %v3486_v37, %v3486_v37  ;;  %v377_v56 = vmul.f32 %v3510_v38, %v3510_v38 }
 0x159   :  { %328 = vst [vmem:[%s4454_s2 + $0x70] sm:$0xff] %v225_v39  ;;  %344 = vst [vmem:[%s4454_s2 + $0xf0] sm:$0xff] %v305_v40  ;;  %v360_v53 = vmul.f32 %v225_v39, %v225_v39  ;;  %v376_v55 = vmul.f32 %v305_v40, %v305_v40 }
 0x15a   :  { %424 = vadd.xlane.f32.xlu1 %v369_v35  ;;  %422 = vadd.xlane.f32.xlu0 %v368_v36 }
 0x15e   :  { %396 = vadd.xlane.f32.xlu1 %v355_v41  ;;  %394 = vadd.xlane.f32.xlu0 %v354_v42 }
 0x162   :  { %428 = vadd.xlane.f32.xlu1 %v371_v43  ;;  %426 = vadd.xlane.f32.xlu0 %v370_v44 }
 0x166   :  { %400 = vadd.xlane.f32.xlu1 %v357_v45  ;;  %398 = vadd.xlane.f32.xlu0 %v356_v46 }
 0x16a   :  { %432 = vadd.xlane.f32.xlu1 %v373_v47  ;;  %430 = vadd.xlane.f32.xlu0 %v372_v48 }
 0x16e   :  { %404 = vadd.xlane.f32.xlu1 %v359_v49  ;;  %402 = vadd.xlane.f32.xlu0 %v358_v50 }
 0x172   :  { %436 = vadd.xlane.f32.xlu1 %v375_v51  ;;  %434 = vadd.xlane.f32.xlu0 %v374_v52 }
 0x176   :  { %406 = vadd.xlane.f32.xlu0 %v360_v53  ;;  %408 = vadd.xlane.f32.xlu1 %v361_v54 }
 0x17a   :  { %438 = vadd.xlane.f32.xlu0 %v376_v55  ;;  %440 = vadd.xlane.f32.xlu1 %v377_v56 }
 0x1cb   :  { %v413_v6 = vpop.xlane.xlu1 %412  ;;  %v381_v7 = vpop.xlane.xlu0 %380 }
 0x1cc   :  { %v509_v9 = vrot.slane %v381_v7, %v3765_v62  ;;  %v513_v10 = vrot.slane %v381_v7, %v3768_v63  ;;  %v517_v11 = vrot.slane %v381_v7, %v3771_v0  ;;  %v521_v12 = vrot.slane %v381_v7, %v3774_v1 }
 0x1cd   :  { %v525_v13 = vrot.slane %v381_v7, %v3777_v2  ;;  %v529_v14 = vrot.slane %v381_v7, %v3780_v3  ;;  %v533_v15 = vrot.slane %v381_v7, %v3783_v4  ;;  %v537_v16 = vrot.slane %v381_v7, %v3786_v5 }
 0x1ce   :  { %v1547_v17 = vcombine.low %v509_v9, %v513_v10  ;;  %v1548_v18 = vcombine.low %v517_v11, %v521_v12  ;;  %v1021_v19 = vrot.slane %v413_v6, %v3765_v62  ;;  %v1025_v20 = vrot.slane %v413_v6, %v3768_v63 }
 0x1cf   :  { %v379_v21 = vpop.xlane.xlu0 %378  ;;  %v1549_v22 = vcombine.low %v525_v13, %v529_v14  ;;  %v1550_v23 = vcombine.low %v533_v15, %v537_v16  ;;  %v1029_v24 = vrot.slane %v413_v6, %v3771_v0  ;;  %v1033_v25 = vrot.slane %v413_v6, %v3774_v1  ;;  %v385_v10 = vpop.xlane.xlu1 %384 }
 0x1d0   :  { %v1557_v26 = vrot.slane %v1547_v17, %v3789_v8  ;;  %v1564_v27 = vrot.slane %v1548_v18, %v3789_v8  ;;  %v1037_v28 = vrot.slane %v413_v6, %v3777_v2  ;;  %v1041_v29 = vrot.slane %v413_v6, %v3780_v3 }
 0x1d1   :  { %v1571_v30 = vrot.slane %v1549_v22, %v3789_v8  ;;  %v1578_v31 = vrot.slane %v1550_v23, %v3789_v8  ;;  %v1045_v32 = vrot.slane %v413_v6, %v3783_v4  ;;  %v1049_v33 = vrot.slane %v413_v6, %v3786_v5 }
 0x1d2   :  { %v1579_v34 = vcombine.low %v1557_v26, %v1564_v27  ;;  %v2331_v35 = vcombine.low %v1021_v19, %v1025_v20  ;;  %v2332_v36 = vcombine.low %v1029_v24, %v1033_v25  ;;  %v2333_v37 = vcombine.low %v1037_v28, %v1041_v29 }
 0x1d3   :  { %v1580_v38 = vcombine.low %v1571_v30, %v1578_v31  ;;  %v2334_v39 = vcombine.low %v1045_v32, %v1049_v33  ;;  %v477_v40 = vrot.slane %v379_v21, %v3765_v62  ;;  %v481_v41 = vrot.slane %v379_v21, %v3768_v63  ;;  %v411_v46 = vpop.xlane.xlu0 %410 }
 0x1d4   :  { %v1587_v42 = vrot.slane %v1579_v34, %v3789_v8  ;;  %v2341_v43 = vrot.slane %v2331_v35, %v3789_v8  ;;  %v2348_v44 = vrot.slane %v2332_v36, %v3789_v8  ;;  %v2355_v45 = vrot.slane %v2333_v37, %v3789_v8  ;;  %v417_v35 = vpop.xlane.xlu1 %416 }
 0x1d5   :  { %v1594_v47 = vrot.slane %v1580_v38, %v3789_v8  ;;  %v2362_v48 = vrot.slane %v2334_v39, %v3789_v8  ;;  %v485_v49 = vrot.slane %v379_v21, %v3771_v0  ;;  %v489_v50 = vrot.slane %v379_v21, %v3774_v1 }
 0x1d6   :  { %v2363_v51 = vcombine.low %v2341_v43, %v2348_v44  ;;  %v493_v52 = vrot.slane %v379_v21, %v3777_v2  ;;  %v497_v53 = vrot.slane %v379_v21, %v3780_v3  ;;  %v501_v54 = vrot.slane %v379_v21, %v3783_v4 }
 0x1d7   :  { %v1595_v55 = vcombine.low %v1587_v42, %v1594_v47  ;;  %v2364_v56 = vcombine.low %v2355_v45, %v2362_v48  ;;  %v505_v58 = vrot.slane %v379_v21, %v3786_v5  ;;  %v1498_v59 = vcombine.low %v477_v40, %v481_v41 }
 0x1d8   :  { %v2371_v61 = vrot.slane %v2363_v51, %v3789_v8  ;;  %v1499_v6 = vcombine.low %v485_v49, %v489_v50  ;;  %v1500_v7 = vcombine.low %v493_v52, %v497_v53  ;;  %v989_v9 = vrot.slane %v411_v46, %v3765_v62 }
 0x1d9   :  { %3070 = vperm.xlu1 %3565, %v1595_v55   ;;  %v2378_v11 = vrot.slane %v2364_v56, %v3789_v8  ;;  %v1501_v12 = vcombine.low %v501_v54, %v505_v58  ;;  %v1508_v13 = vrot.slane %v1498_v59, %v3789_v8  ;;  %v993_v14 = vrot.slane %v411_v46, %v3768_v63 }
 0x1da   :  { %v1515_v15 = vrot.slane %v1499_v6, %v3789_v8  ;;  %v1522_v16 = vrot.slane %v1500_v7, %v3789_v8  ;;  %v997_v17 = vrot.slane %v411_v46, %v3771_v0  ;;  %v1001_v18 = vrot.slane %v411_v46, %v3774_v1  ;;  %v383_v6 = vpop.xlane.xlu1 %382 }
 0x1db   :  { %v2379_v19 = vcombine.low %v2371_v61, %v2378_v11  ;;  %v1529_v20 = vrot.slane %v1501_v12, %v3789_v8  ;;  %v1005_v21 = vrot.slane %v411_v46, %v3777_v2  ;;  %v1009_v22 = vrot.slane %v411_v46, %v3780_v3 }
 0x1dc   :  { %v1530_v23 = vcombine.low %v1508_v13, %v1515_v15  ;;  %v1013_v24 = vrot.slane %v411_v46, %v3783_v4  ;;  %v1017_v25 = vrot.slane %v411_v46, %v3786_v5  ;;  %v2282_v26 = vcombine.low %v989_v9, %v993_v14 }
 0x1dd   :  { %3118 = vperm.xlu0 %3566, %v2379_v19   ;;  %v1531_v27 = vcombine.low %v1522_v16, %v1529_v20  ;;  %v2283_v28 = vcombine.low %v997_v17, %v1001_v18  ;;  %v2284_v29 = vcombine.low %v1005_v21, %v1009_v22  ;;  %v573_v30 = vrot.slane %v385_v10, %v3765_v62 }
 0x1de   :  { %v1538_v31 = vrot.slane %v1530_v23, %v3789_v8  ;;  %v2285_v32 = vcombine.low %v1013_v24, %v1017_v25  ;;  %v2292_v33 = vrot.slane %v2282_v26, %v3789_v8  ;;  %v577_v34 = vrot.slane %v385_v10, %v3768_v63 }
 0x1df   :  { %v1545_v36 = vrot.slane %v1531_v27, %v3789_v8  ;;  %v2299_v37 = vrot.slane %v2283_v28, %v3789_v8  ;;  %v2306_v38 = vrot.slane %v2284_v29, %v3789_v8  ;;  %v581_v39 = vrot.slane %v385_v10, %v3771_v0  ;;  %v415_v28 = vpop.xlane.xlu0 %414 }
 0x1e0   :  { %v2313_v40 = vrot.slane %v2285_v32, %v3789_v8  ;;  %v585_v41 = vrot.slane %v385_v10, %v3774_v1  ;;  %v589_v42 = vrot.slane %v385_v10, %v3777_v2  ;;  %v593_v43 = vrot.slane %v385_v10, %v3780_v3 }
 0x1e1   :  { %v1546_v44 = vcombine.low %v1538_v31, %v1545_v36  ;;  %v2314_v45 = vcombine.low %v2292_v33, %v2299_v37  ;;  %v597_v46 = vrot.slane %v385_v10, %v3783_v4  ;;  %v601_v47 = vrot.slane %v385_v10, %v3786_v5 }
 0x1e2   :  { %v2315_v48 = vcombine.low %v2306_v38, %v2313_v40  ;;  %v1645_v49 = vcombine.low %v573_v30, %v577_v34  ;;  %v1646_v50 = vcombine.low %v581_v39, %v585_v41  ;;  %v1647_v51 = vcombine.low %v589_v42, %v593_v43  ;;  %v389_v41 = vpop.xlane.xlu1 %388 }
 0x1e3   :  { %3067 = vperm.xlu0 %3566, %v1546_v44   ;;  %v2322_v52 = vrot.slane %v2314_v45, %v3789_v8  ;;  %v1648_v53 = vcombine.low %v597_v46, %v601_v47  ;;  %v1085_v54 = vrot.slane %v417_v35, %v3765_v62  ;;  %v1089_v55 = vrot.slane %v417_v35, %v3768_v63 }
 0x1e4   :  { %v2329_v56 = vrot.slane %v2315_v48, %v3789_v8  ;;  %v1655_v58 = vrot.slane %v1645_v49, %v3789_v8  ;;  %v1662_v59 = vrot.slane %v1646_v50, %v3789_v8  ;;  %v1669_v61 = vrot.slane %v1647_v51, %v3789_v8 }
 0x1e5   :  { %v1676_v7 = vrot.slane %v1648_v53, %v3789_v8  ;;  %v1093_v9 = vrot.slane %v417_v35, %v3771_v0  ;;  %v1097_v10 = vrot.slane %v417_v35, %v3774_v1  ;;  %v1101_v11 = vrot.slane %v417_v35, %v3777_v2 }
 0x1e6   :  { %v2330_v12 = vcombine.low %v2322_v52, %v2329_v56  ;;  %v1677_v13 = vcombine.low %v1655_v58, %v1662_v59  ;;  %v1105_v14 = vrot.slane %v417_v35, %v3780_v3  ;;  %v1109_v15 = vrot.slane %v417_v35, %v3783_v4 }
 0x1e7   :  { %v1678_v16 = vcombine.low %v1669_v61, %v1676_v7  ;;  %v1113_v17 = vrot.slane %v417_v35, %v3786_v5  ;;  %v2429_v18 = vcombine.low %v1085_v54, %v1089_v55  ;;  %v2430_v19 = vcombine.low %v1093_v9, %v1097_v10 }
 0x1e8   :  { %3115 = vperm.xlu1 %3565, %v2330_v12   ;;  %v1685_v20 = vrot.slane %v1677_v13, %v3789_v8  ;;  %v2431_v21 = vcombine.low %v1101_v11, %v1105_v14  ;;  %v541_v22 = vrot.slane %v383_v6, %v3765_v62  ;;  %v545_v23 = vrot.slane %v383_v6, %v3768_v63  ;;  %v421_v13 = vpop.xlane.xlu1 %420 }
 0x1e9   :  { %v1692_v24 = vrot.slane %v1678_v16, %v3789_v8  ;;  %v2432_v25 = vcombine.low %v1109_v15, %v1113_v17  ;;  %v2439_v26 = vrot.slane %v2429_v18, %v3789_v8  ;;  %v2446_v27 = vrot.slane %v2430_v19, %v3789_v8 }
 0x1ea   :  { %v2453_v29 = vrot.slane %v2431_v21, %v3789_v8  ;;  %v549_v30 = vrot.slane %v383_v6, %v3771_v0  ;;  %v553_v31 = vrot.slane %v383_v6, %v3774_v1  ;;  %v557_v32 = vrot.slane %v383_v6, %v3777_v2 }
 0x1eb   :  { %v1693_v33 = vcombine.low %v1685_v20, %v1692_v24  ;;  %v2460_v34 = vrot.slane %v2432_v25, %v3789_v8  ;;  %v2461_v35 = vcombine.low %v2439_v26, %v2446_v27  ;;  %v561_v36 = vrot.slane %v383_v6, %v3780_v3 }
 0x1ec   :  { %v565_v37 = vrot.slane %v383_v6, %v3783_v4  ;;  %v569_v38 = vrot.slane %v383_v6, %v3786_v5  ;;  %v1596_v39 = vcombine.low %v541_v22, %v545_v23  ;;  %v1597_v40 = vcombine.low %v549_v30, %v553_v31 }
 0x1ed   :  { %3076 = vperm.xlu1 %3565, %v1693_v33   ;;  %v2462_v42 = vcombine.low %v2453_v29, %v2460_v34  ;;  %v2469_v43 = vrot.slane %v2461_v35, %v3789_v8  ;;  %v1598_v44 = vcombine.low %v557_v32, %v561_v36  ;;  %v1053_v45 = vrot.slane %v415_v28, %v3765_v62 }
 0x1ee   :  { %v1599_v46 = vcombine.low %v565_v37, %v569_v38  ;;  %v1606_v47 = vrot.slane %v1596_v39, %v3789_v8  ;;  %v1613_v48 = vrot.slane %v1597_v40, %v3789_v8  ;;  %v1057_v49 = vrot.slane %v415_v28, %v3768_v63  ;;  %v3912_v38 = vpop.xlane.xlu1 %392 }
 0x1ef   :  { %v2476_v50 = vrot.slane %v2462_v42, %v3789_v8  ;;  %v1620_v51 = vrot.slane %v1598_v44, %v3789_v8  ;;  %v1061_v52 = vrot.slane %v415_v28, %v3771_v0  ;;  %v1065_v53 = vrot.slane %v415_v28, %v3774_v1 }
 0x1f0   :  { %v1627_v54 = vrot.slane %v1599_v46, %v3789_v8  ;;  %v1628_v55 = vcombine.low %v1606_v47, %v1613_v48  ;;  %v1069_v56 = vrot.slane %v415_v28, %v3777_v2  ;;  %v1073_v58 = vrot.slane %v415_v28, %v3780_v3 }
 0x1f1   :  { %v2477_v59 = vcombine.low %v2469_v43, %v2476_v50  ;;  %v1077_v61 = vrot.slane %v415_v28, %v3783_v4  ;;  %v1081_v6 = vrot.slane %v415_v28, %v3786_v5  ;;  %v2380_v7 = vcombine.low %v1053_v45, %v1057_v49 }
 0x1f2   :  { %v1629_v9 = vcombine.low %v1620_v51, %v1627_v54  ;;  %v1636_v10 = vrot.slane %v1628_v55, %v3789_v8  ;;  %v2381_v11 = vcombine.low %v1061_v52, %v1065_v53  ;;  %v2382_v12 = vcombine.low %v1069_v56, %v1073_v58  ;;  %v387_v51 = vpop.xlane.xlu0 %386 }
 0x1f3   :  { %3124 = vperm.xlu0 %3566, %v2477_v59   ;;  %v2383_v14 = vcombine.low %v1077_v61, %v1081_v6  ;;  %v2390_v15 = vrot.slane %v2380_v7, %v3789_v8  ;;  %v637_v16 = vrot.slane %v389_v41, %v3765_v62  ;;  %v641_v17 = vrot.slane %v389_v41, %v3768_v63 }
 0x1f4   :  { %v1643_v18 = vrot.slane %v1629_v9, %v3789_v8  ;;  %v2397_v19 = vrot.slane %v2381_v11, %v3789_v8  ;;  %v2404_v20 = vrot.slane %v2382_v12, %v3789_v8  ;;  %v645_v21 = vrot.slane %v389_v41, %v3771_v0  ;;  %v425_v11 = vpop.xlane.xlu1 %424 }
 0x1f5   :  { %v2411_v22 = vrot.slane %v2383_v14, %v3789_v8  ;;  %v649_v23 = vrot.slane %v389_v41, %v3774_v1  ;;  %v653_v24 = vrot.slane %v389_v41, %v3777_v2  ;;  %v657_v25 = vrot.slane %v389_v41, %v3780_v3 }
 0x1f6   :  { %v1644_v26 = vcombine.low %v1636_v10, %v1643_v18  ;;  %v2412_v27 = vcombine.low %v2390_v15, %v2397_v19  ;;  %v661_v28 = vrot.slane %v389_v41, %v3783_v4  ;;  %v665_v29 = vrot.slane %v389_v41, %v3786_v5 }
 0x1f7   :  { %v2413_v30 = vcombine.low %v2404_v20, %v2411_v22  ;;  %v1743_v31 = vcombine.low %v637_v16, %v641_v17  ;;  %v1744_v32 = vcombine.low %v645_v21, %v649_v23  ;;  %v1745_v33 = vcombine.low %v653_v24, %v657_v25 }
 0x1f8   :  { %3073 = vperm.xlu1 %3565, %v1644_v26   ;;  %v2420_v34 = vrot.slane %v2412_v27, %v3789_v8  ;;  %v1746_v35 = vcombine.low %v661_v28, %v665_v29  ;;  %v1149_v36 = vrot.slane %v421_v13, %v3765_v62  ;;  %v1153_v37 = vrot.slane %v421_v13, %v3768_v63 }
 0x1f9   :  { %v2427_v39 = vrot.slane %v2413_v30, %v3789_v8  ;;  %v1753_v40 = vrot.slane %v1743_v31, %v3789_v8  ;;  %v1760_v41 = vrot.slane %v1744_v32, %v3789_v8  ;;  %v1767_v42 = vrot.slane %v1745_v33, %v3789_v8 }
 0x1fa   :  { %v1774_v43 = vrot.slane %v1746_v35, %v3789_v8  ;;  %v1157_v44 = vrot.slane %v421_v13, %v3771_v0  ;;  %v1161_v45 = vrot.slane %v421_v13, %v3774_v1  ;;  %v1165_v46 = vrot.slane %v421_v13, %v3777_v2 }
 0x1fb   :  { %v2428_v47 = vcombine.low %v2420_v34, %v2427_v39  ;;  %v1775_v48 = vcombine.low %v1753_v40, %v1760_v41  ;;  %v1169_v49 = vrot.slane %v421_v13, %v3780_v3  ;;  %v1173_v50 = vrot.slane %v421_v13, %v3783_v4 }
 0x1fc   :  { %v1776_v52 = vcombine.low %v1767_v42, %v1774_v43  ;;  %v1177_v53 = vrot.slane %v421_v13, %v3786_v5  ;;  %v2527_v54 = vcombine.low %v1149_v36, %v1153_v37  ;;  %v2528_v55 = vcombine.low %v1157_v44, %v1161_v45  ;;  %v419_v45 = vpop.xlane.xlu0 %418 }
 0x1fd   :  { %3121 = vperm.xlu1 %3565, %v2428_v47   ;;  %v1783_v56 = vrot.slane %v1775_v48, %v3789_v8  ;;  %v2529_v58 = vcombine.low %v1165_v46, %v1169_v49  ;;  %v605_v59 = vrot.slane %v387_v51, %v3765_v62  ;;  %v609_v61 = vrot.slane %v387_v51, %v3768_v63 }
 0x1fe   :  { %v1790_v6 = vrot.slane %v1776_v52, %v3789_v8  ;;  %v2530_v7 = vcombine.low %v1173_v50, %v1177_v53  ;;  %v2537_v9 = vrot.slane %v2527_v54, %v3789_v8  ;;  %v2544_v10 = vrot.slane %v2528_v55, %v3789_v8 }
 0x1ff   :  { %v2551_v12 = vrot.slane %v2529_v58, %v3789_v8  ;;  %v613_v13 = vrot.slane %v387_v51, %v3771_v0  ;;  %v617_v14 = vrot.slane %v387_v51, %v3774_v1  ;;  %v621_v15 = vrot.slane %v387_v51, %v3777_v2 }
 0x200   :  { %v1791_v16 = vcombine.low %v1783_v56, %v1790_v6  ;;  %v2558_v17 = vrot.slane %v2530_v7, %v3789_v8  ;;  %v2559_v18 = vcombine.low %v2537_v9, %v2544_v10  ;;  %v625_v19 = vrot.slane %v387_v51, %v3780_v3 }
 0x201   :  { %v629_v20 = vrot.slane %v387_v51, %v3783_v4  ;;  %v633_v21 = vrot.slane %v387_v51, %v3786_v5  ;;  %v1694_v22 = vcombine.low %v605_v59, %v609_v61  ;;  %v1695_v23 = vcombine.low %v613_v13, %v617_v14  ;;  %v397_v59 = vpop.xlane.xlu1 %396 }
 0x202   :  { %3082 = vperm.xlu1 %3565, %v1791_v16   ;;  %v2560_v24 = vcombine.low %v2551_v12, %v2558_v17  ;;  %v2567_v25 = vrot.slane %v2559_v18, %v3789_v8  ;;  %v1696_v26 = vcombine.low %v621_v15, %v625_v19  ;;  %v1213_v27 = vrot.slane %v425_v11, %v3765_v62 }
 0x203   :  { %v1697_v28 = vcombine.low %v629_v20, %v633_v21  ;;  %v1704_v29 = vrot.slane %v1694_v22, %v3789_v8  ;;  %v1711_v30 = vrot.slane %v1695_v23, %v3789_v8  ;;  %v1217_v31 = vrot.slane %v425_v11, %v3768_v63 }
 0x204   :  { %v2574_v32 = vrot.slane %v2560_v24, %v3789_v8  ;;  %v1718_v33 = vrot.slane %v1696_v26, %v3789_v8  ;;  %v1221_v34 = vrot.slane %v425_v11, %v3771_v0  ;;  %v1225_v35 = vrot.slane %v425_v11, %v3774_v1 }
 0x205   :  { %v1725_v36 = vrot.slane %v1697_v28, %v3789_v8  ;;  %v1726_v37 = vcombine.low %v1704_v29, %v1711_v30  ;;  %v1229_v39 = vrot.slane %v425_v11, %v3777_v2  ;;  %v1233_v40 = vrot.slane %v425_v11, %v3780_v3 }
 0x206   :  { %v2575_v41 = vcombine.low %v2567_v25, %v2574_v32  ;;  %v1237_v42 = vrot.slane %v425_v11, %v3783_v4  ;;  %v1241_v43 = vrot.slane %v425_v11, %v3786_v5  ;;  %v2625_v44 = vcombine.low %v1213_v27, %v1217_v31 }
 0x207   :  { %v1727_v46 = vcombine.low %v1718_v33, %v1725_v36  ;;  %v1734_v47 = vrot.slane %v1726_v37, %v3789_v8  ;;  %v2626_v48 = vcombine.low %v1221_v34, %v1225_v35  ;;  %v2627_v49 = vcombine.low %v1229_v39, %v1233_v40 }
 0x208   :  { %3130 = vperm.xlu0 %3566, %v2575_v41   ;;  %v2628_v50 = vcombine.low %v1237_v42, %v1241_v43  ;;  %v2635_v51 = vrot.slane %v2625_v44, %v3789_v8  ;;  %v1117_v52 = vrot.slane %v419_v45, %v3765_v62  ;;  %v1121_v53 = vrot.slane %v419_v45, %v3768_v63  ;;  %v3986_v43 = vpop.xlane.xlu0 %390 }
 0x209   :  { %v1741_v54 = vrot.slane %v1727_v46, %v3789_v8  ;;  %v2642_v55 = vrot.slane %v2626_v48, %v3789_v8  ;;  %v2649_v56 = vrot.slane %v2627_v49, %v3789_v8  ;;  %v1125_v58 = vrot.slane %v419_v45, %v3771_v0  ;;  %v429_v48 = vpop.xlane.xlu1 %428 }
 0x20a   :  { %v2656_v61 = vrot.slane %v2628_v50, %v3789_v8  ;;  %v1129_v6 = vrot.slane %v419_v45, %v3774_v1  ;;  %v1133_v7 = vrot.slane %v419_v45, %v3777_v2  ;;  %v1137_v9 = vrot.slane %v419_v45, %v3780_v3 }
 0x20b   :  { %v1742_v10 = vcombine.low %v1734_v47, %v1741_v54  ;;  %v2657_v11 = vcombine.low %v2635_v51, %v2642_v55  ;;  %v1141_v12 = vrot.slane %v419_v45, %v3783_v4  ;;  %v1145_v13 = vrot.slane %v419_v45, %v3786_v5 }
 0x20c   :  { %v2658_v14 = vcombine.low %v2649_v56, %v2656_v61  ;;  %v2478_v15 = vcombine.low %v1117_v52, %v1121_v53  ;;  %v2479_v16 = vcombine.low %v1125_v58, %v1129_v6  ;;  %v2480_v17 = vcombine.low %v1133_v7, %v1137_v9 }
 0x20d   :  { %3079 = vperm.xlu1 %3565, %v1742_v10   ;;  %v2665_v18 = vrot.slane %v2657_v11, %v3789_v8  ;;  %v2481_v19 = vcombine.low %v1141_v12, %v1145_v13  ;;  %v765_v20 = vrot.slane %v397_v59, %v3765_v62  ;;  %v769_v21 = vrot.slane %v397_v59, %v3768_v63 }
 0x20e   :  { %v2672_v22 = vrot.slane %v2658_v14, %v3789_v8  ;;  %v2488_v23 = vrot.slane %v2478_v15, %v3789_v8  ;;  %v2495_v24 = vrot.slane %v2479_v16, %v3789_v8  ;;  %v2502_v25 = vrot.slane %v2480_v17, %v3789_v8  ;;  %v4010_v16 = vpop.xlane.xlu0 %422 }
 0x20f   :  { %v2509_v26 = vrot.slane %v2481_v19, %v3789_v8  ;;  %v773_v27 = vrot.slane %v397_v59, %v3771_v0  ;;  %v777_v28 = vrot.slane %v397_v59, %v3774_v1  ;;  %v781_v29 = vrot.slane %v397_v59, %v3777_v2 }
 0x210   :  { %v2673_v30 = vcombine.low %v2665_v18, %v2672_v22  ;;  %v2510_v31 = vcombine.low %v2488_v23, %v2495_v24  ;;  %v785_v32 = vrot.slane %v397_v59, %v3780_v3  ;;  %v789_v33 = vrot.slane %v397_v59, %v3783_v4 }
 0x211   :  { %v2511_v34 = vcombine.low %v2502_v25, %v2509_v26  ;;  %v793_v35 = vrot.slane %v397_v59, %v3786_v5  ;;  %v1939_v36 = vcombine.low %v765_v20, %v769_v21  ;;  %v1940_v37 = vcombine.low %v773_v27, %v777_v28 }
 0x212   :  { %3136 = vperm.xlu0 %3566, %v2673_v30   ;;  %v2518_v39 = vrot.slane %v2510_v31, %v3789_v8  ;;  %v1941_v40 = vcombine.low %v781_v29, %v785_v32  ;;  %v701_v41 = vrot.slane %v3912_v38, %v3765_v62  ;;  %v705_v42 = vrot.slane %v3912_v38, %v3768_v63 }
 0x213   :  { %v2525_v44 = vrot.slane %v2511_v34, %v3789_v8  ;;  %v1942_v45 = vcombine.low %v789_v33, %v793_v35  ;;  %v1949_v46 = vrot.slane %v1939_v36, %v3789_v8  ;;  %v1956_v47 = vrot.slane %v1940_v37, %v3789_v8  ;;  %v4027_v36 = vpop.xlane.xlu1 %400 }
 0x214   :  { %v1963_v49 = vrot.slane %v1941_v40, %v3789_v8  ;;  %v709_v50 = vrot.slane %v3912_v38, %v3771_v0  ;;  %v713_v51 = vrot.slane %v3912_v38, %v3774_v1  ;;  %v717_v52 = vrot.slane %v3912_v38, %v3777_v2 }
 0x215   :  { %v2526_v53 = vcombine.low %v2518_v39, %v2525_v44  ;;  %v1970_v54 = vrot.slane %v1942_v45, %v3789_v8  ;;  %v1971_v55 = vcombine.low %v1949_v46, %v1956_v47  ;;  %v721_v56 = vrot.slane %v3912_v38, %v3780_v3 }
 0x216   :  { %v725_v58 = vrot.slane %v3912_v38, %v3783_v4  ;;  %v729_v59 = vrot.slane %v3912_v38, %v3786_v5  ;;  %v1841_v61 = vcombine.low %v701_v41, %v705_v42  ;;  %v1842_v6 = vcombine.low %v709_v50, %v713_v51  ;;  %v4034_v42 = vpop.xlane.xlu0 %394 }
 0x217   :  { %3127 = vperm.xlu1 %3565, %v2526_v53   ;;  %v1972_v7 = vcombine.low %v1963_v49, %v1970_v54  ;;  %v1979_v9 = vrot.slane %v1971_v55, %v3789_v8  ;;  %v1843_v10 = vcombine.low %v717_v52, %v721_v56  ;;  %v1277_v11 = vrot.slane %v429_v48, %v3765_v62 }
 0x218   :  { %v1844_v12 = vcombine.low %v725_v58, %v729_v59  ;;  %v1851_v13 = vrot.slane %v1841_v61, %v3789_v8  ;;  %v1858_v14 = vrot.slane %v1842_v6, %v3789_v8  ;;  %v1281_v15 = vrot.slane %v429_v48, %v3768_v63 }
 0x219   :  { %v1986_v38 = vrot.slane %v1972_v7, %v3789_v8  ;;  %v1865_v17 = vrot.slane %v1843_v10, %v3789_v8  ;;  %v1285_v18 = vrot.slane %v429_v48, %v3771_v0  ;;  %v1289_v19 = vrot.slane %v429_v48, %v3774_v1  ;;  %v433_v10 = vpop.xlane.xlu1 %432 }
 0x21a   :  { %v1872_v20 = vrot.slane %v1844_v12, %v3789_v8  ;;  %v1873_v21 = vcombine.low %v1851_v13, %v1858_v14  ;;  %v1293_v22 = vrot.slane %v429_v48, %v3777_v2  ;;  %v1297_v23 = vrot.slane %v429_v48, %v3780_v3 }
 0x21b   :  { %v1987_v24 = vcombine.low %v1979_v9, %v1986_v38  ;;  %v1301_v25 = vrot.slane %v429_v48, %v3783_v4  ;;  %v1305_v26 = vrot.slane %v429_v48, %v3786_v5  ;;  %v2723_v27 = vcombine.low %v1277_v11, %v1281_v15  ;;  %v4063_v15 = vpop.xlane.xlu0 %426 }
 0x21c   :  { %v1874_v28 = vcombine.low %v1865_v17, %v1872_v20  ;;  %v1881_v29 = vrot.slane %v1873_v21, %v3789_v8  ;;  %v2724_v30 = vcombine.low %v1285_v18, %v1289_v19  ;;  %v2725_v31 = vcombine.low %v1293_v22, %v1297_v23 }
 0x21d   :  { %3094 = vperm.xlu0 %3566, %v1987_v24   ;;  %v2726_v32 = vcombine.low %v1301_v25, %v1305_v26  ;;  %v2733_v33 = vrot.slane %v2723_v27, %v3789_v8  ;;  %v669_v34 = vrot.slane %v3986_v43, %v3765_v62  ;;  %v673_v35 = vrot.slane %v3986_v43, %v3768_v63 }
 0x21e   :  { %v1888_v37 = vrot.slane %v1874_v28, %v3789_v8  ;;  %v2740_v39 = vrot.slane %v2724_v30, %v3789_v8  ;;  %v2747_v40 = vrot.slane %v2725_v31, %v3789_v8  ;;  %v677_v41 = vrot.slane %v3986_v43, %v3771_v0 }
 0x21f   :  { %v2754_v44 = vrot.slane %v2726_v32, %v3789_v8  ;;  %v681_v45 = vrot.slane %v3986_v43, %v3774_v1  ;;  %v685_v46 = vrot.slane %v3986_v43, %v3777_v2  ;;  %v689_v47 = vrot.slane %v3986_v43, %v3780_v3 }
 0x220   :  { %v1889_v48 = vcombine.low %v1881_v29, %v1888_v37  ;;  %v2755_v49 = vcombine.low %v2733_v33, %v2740_v39  ;;  %v693_v50 = vrot.slane %v3986_v43, %v3783_v4  ;;  %v697_v51 = vrot.slane %v3986_v43, %v3786_v5 }
 0x221   :  { %v2756_v52 = vcombine.low %v2747_v40, %v2754_v44  ;;  %v1792_v53 = vcombine.low %v669_v34, %v673_v35  ;;  %v1793_v54 = vcombine.low %v677_v41, %v681_v45  ;;  %v1794_v55 = vcombine.low %v685_v46, %v689_v47  ;;  %v4083_v41 = vpop.xlane.xlu0 %398 }
 0x222   :  { %3088 = vperm.xlu1 %3565, %v1889_v48   ;;  %v2763_v56 = vrot.slane %v2755_v49, %v3789_v8  ;;  %v1795_v58 = vcombine.low %v693_v50, %v697_v51  ;;  %v1181_v59 = vrot.slane %v4010_v16, %v3765_v62  ;;  %v1185_v61 = vrot.slane %v4010_v16, %v3768_v63 }
 0x223   :  { %v2770_v6 = vrot.slane %v2756_v52, %v3789_v8  ;;  %v1802_v7 = vrot.slane %v1792_v53, %v3789_v8  ;;  %v1809_v43 = vrot.slane %v1793_v54, %v3789_v8  ;;  %v1816_v9 = vrot.slane %v1794_v55, %v3789_v8 }
 0x224   :  { %v1823_v11 = vrot.slane %v1795_v58, %v3789_v8  ;;  %v1189_v12 = vrot.slane %v4010_v16, %v3771_v0  ;;  %v1193_v13 = vrot.slane %v4010_v16, %v3774_v1  ;;  %v1197_v14 = vrot.slane %v4010_v16, %v3777_v2 }
 0x225   :  { %v2771_v38 = vcombine.low %v2763_v56, %v2770_v6  ;;  %v1824_v17 = vcombine.low %v1802_v7, %v1809_v43  ;;  %v1201_v18 = vrot.slane %v4010_v16, %v3780_v3  ;;  %v1205_v19 = vrot.slane %v4010_v16, %v3783_v4 }
 0x226   :  { %v1825_v20 = vcombine.low %v1816_v9, %v1823_v11  ;;  %v1209_v21 = vrot.slane %v4010_v16, %v3786_v5  ;;  %v2576_v22 = vcombine.low %v1181_v59, %v1185_v61  ;;  %v2577_v23 = vcombine.low %v1189_v12, %v1193_v13 }
 0x227   :  { %3142 = vperm.xlu0 %3566, %v2771_v38   ;;  %v1832_v24 = vrot.slane %v1824_v17, %v3789_v8  ;;  %v2578_v25 = vcombine.low %v1197_v14, %v1201_v18  ;;  %v1341_v26 = vrot.slane %v433_v10, %v3765_v62  ;;  %v1345_v27 = vrot.slane %v433_v10, %v3768_v63  ;;  %v431_v14 = vpop.xlane.xlu0 %430 }
 0x228   :  { %v1839_v28 = vrot.slane %v1825_v20, %v3789_v8  ;;  %v2579_v29 = vcombine.low %v1205_v19, %v1209_v21  ;;  %v2586_v30 = vrot.slane %v2576_v22, %v3789_v8  ;;  %v2593_v31 = vrot.slane %v2577_v23, %v3789_v8 }
 0x229   :  { %v2600_v32 = vrot.slane %v2578_v25, %v3789_v8  ;;  %v1349_v16 = vrot.slane %v433_v10, %v3771_v0  ;;  %v1353_v33 = vrot.slane %v433_v10, %v3774_v1  ;;  %v1357_v34 = vrot.slane %v433_v10, %v3777_v2 }
 0x22a   :  { %v1840_v35 = vcombine.low %v1832_v24, %v1839_v28  ;;  %v2607_v37 = vrot.slane %v2579_v29, %v3789_v8  ;;  %v2608_v39 = vcombine.low %v2586_v30, %v2593_v31  ;;  %v1361_v40 = vrot.slane %v433_v10, %v3780_v3  ;;  %v4113_v24 = vpop.xlane.xlu1 %404 }
 0x22b   :  { %v1365_v44 = vrot.slane %v433_v10, %v3783_v4  ;;  %v1369_v45 = vrot.slane %v433_v10, %v3786_v5  ;;  %v2821_v46 = vcombine.low %v1341_v26, %v1345_v27  ;;  %v2822_v47 = vcombine.low %v1349_v16, %v1353_v33 }
 0x22c   :  { %3085 = vperm.xlu1 %3565, %v1840_v35   ;;  %v2609_v48 = vcombine.low %v2600_v32, %v2607_v37  ;;  %v2616_v49 = vrot.slane %v2608_v39, %v3789_v8  ;;  %v2823_v50 = vcombine.low %v1357_v34, %v1361_v40  ;;  %v733_v51 = vrot.slane %v4034_v42, %v3765_v62 }
 0x22d   :  { %v2824_v52 = vcombine.low %v1365_v44, %v1369_v45  ;;  %v2831_v53 = vrot.slane %v2821_v46, %v3789_v8  ;;  %v2838_v54 = vrot.slane %v2822_v47, %v3789_v8  ;;  %v737_v55 = vrot.slane %v4034_v42, %v3768_v63 }
 0x22e   :  { %v2623_v56 = vrot.slane %v2609_v48, %v3789_v8  ;;  %v2845_v58 = vrot.slane %v2823_v50, %v3789_v8  ;;  %v741_v59 = vrot.slane %v4034_v42, %v3771_v0  ;;  %v745_v61 = vrot.slane %v4034_v42, %v3774_v1 }
 0x22f   :  { %v2852_v6 = vrot.slane %v2824_v52, %v3789_v8  ;;  %v2853_v7 = vcombine.low %v2831_v53, %v2838_v54  ;;  %v749_v43 = vrot.slane %v4034_v42, %v3777_v2  ;;  %v753_v9 = vrot.slane %v4034_v42, %v3780_v3  ;;  %v437_v52 = vpop.xlane.xlu1 %436 }
 0x230   :  { %v2624_v10 = vcombine.low %v2616_v49, %v2623_v56  ;;  %v757_v11 = vrot.slane %v4034_v42, %v3783_v4  ;;  %v761_v12 = vrot.slane %v4034_v42, %v3786_v5  ;;  %v1890_v13 = vcombine.low %v733_v51, %v737_v55 }
 0x231   :  { %v2854_v38 = vcombine.low %v2845_v58, %v2852_v6  ;;  %v2861_v17 = vrot.slane %v2853_v7, %v3789_v8  ;;  %v1891_v18 = vcombine.low %v741_v59, %v745_v61  ;;  %v1892_v19 = vcombine.low %v749_v43, %v753_v9 }
 0x232   :  { %3133 = vperm.xlu1 %3565, %v2624_v10   ;;  %v1893_v20 = vcombine.low %v757_v11, %v761_v12  ;;  %v1900_v21 = vrot.slane %v1890_v13, %v3789_v8  ;;  %v1309_v22 = vrot.slane %v431_v14, %v3765_v62  ;;  %v1313_v23 = vrot.slane %v431_v14, %v3768_v63  ;;  %v4147_v11 = vpop.xlane.xlu0 %402 }
 0x233   :  { %v2868_v25 = vrot.slane %v2854_v38, %v3789_v8  ;;  %v1907_v42 = vrot.slane %v1891_v18, %v3789_v8  ;;  %v1914_v26 = vrot.slane %v1892_v19, %v3789_v8  ;;  %v1317_v27 = vrot.slane %v431_v14, %v3771_v0 }
 0x234   :  { %v1921_v28 = vrot.slane %v1893_v20, %v3789_v8  ;;  %v1321_v29 = vrot.slane %v431_v14, %v3774_v1  ;;  %v1325_v30 = vrot.slane %v431_v14, %v3777_v2  ;;  %v1329_v31 = vrot.slane %v431_v14, %v3780_v3 }
 0x235   :  { %v2869_v32 = vcombine.low %v2861_v17, %v2868_v25  ;;  %v1922_v16 = vcombine.low %v1900_v21, %v1907_v42  ;;  %v1333_v33 = vrot.slane %v431_v14, %v3783_v4  ;;  %v1337_v34 = vrot.slane %v431_v14, %v3786_v5 }
 0x236   :  { %v1923_v35 = vcombine.low %v1914_v26, %v1921_v28  ;;  %v2772_v37 = vcombine.low %v1309_v22, %v1313_v23  ;;  %v2773_v39 = vcombine.low %v1317_v27, %v1321_v29  ;;  %v2774_v40 = vcombine.low %v1325_v30, %v1329_v31 }
 0x237   :  { %3148 = vperm.xlu0 %3566, %v2869_v32   ;;  %v1930_v44 = vrot.slane %v1922_v16, %v3789_v8  ;;  %v2775_v45 = vcombine.low %v1333_v33, %v1337_v34  ;;  %v1245_v46 = vrot.slane %v4063_v15, %v3765_v62  ;;  %v1249_v47 = vrot.slane %v4063_v15, %v3768_v63 }
 0x238   :  { %v1937_v48 = vrot.slane %v1923_v35, %v3789_v8  ;;  %v2782_v49 = vrot.slane %v2772_v37, %v3789_v8  ;;  %v2789_v50 = vrot.slane %v2773_v39, %v3789_v8  ;;  %v2796_v51 = vrot.slane %v2774_v40, %v3789_v8  ;;  %v435_v35 = vpop.xlane.xlu0 %434 }
 0x239   :  { %v2803_v53 = vrot.slane %v2775_v45, %v3789_v8  ;;  %v1253_v54 = vrot.slane %v4063_v15, %v3771_v0  ;;  %v1257_v55 = vrot.slane %v4063_v15, %v3774_v1  ;;  %v1261_v56 = vrot.slane %v4063_v15, %v3777_v2 }
 0x23a   :  { %v1938_v58 = vcombine.low %v1930_v44, %v1937_v48  ;;  %v2804_v59 = vcombine.low %v2782_v49, %v2789_v50  ;;  %v1265_v61 = vrot.slane %v4063_v15, %v3780_v3  ;;  %v1269_v6 = vrot.slane %v4063_v15, %v3783_v4 }
 0x23b   :  { %v2805_v7 = vcombine.low %v2796_v51, %v2803_v53  ;;  %v1273_v43 = vrot.slane %v4063_v15, %v3786_v5  ;;  %v2674_v9 = vcombine.low %v1245_v46, %v1249_v47  ;;  %v2675_v10 = vcombine.low %v1253_v54, %v1257_v55 }
 0x23c   :  { %3091 = vperm.xlu1 %3565, %v1938_v58   ;;  %v2812_v12 = vrot.slane %v2804_v59, %v3789_v8  ;;  %v2676_v13 = vcombine.low %v1261_v56, %v1265_v61  ;;  %v1405_v14 = vrot.slane %v437_v52, %v3765_v62  ;;  %v1409_v38 = vrot.slane %v437_v52, %v3768_v63 }
 0x23d   :  { %v2819_v17 = vrot.slane %v2805_v7, %v3789_v8  ;;  %v2677_v18 = vcombine.low %v1269_v6, %v1273_v43  ;;  %v2684_v19 = vrot.slane %v2674_v9, %v3789_v8  ;;  %v2691_v20 = vrot.slane %v2675_v10, %v3789_v8 }
 0x23e   :  { %v2698_v15 = vrot.slane %v2676_v13, %v3789_v8  ;;  %v1413_v21 = vrot.slane %v437_v52, %v3771_v0  ;;  %v1417_v22 = vrot.slane %v437_v52, %v3774_v1  ;;  %v1421_v23 = vrot.slane %v437_v52, %v3777_v2 }
 0x23f   :  { %v2820_v25 = vcombine.low %v2812_v12, %v2819_v17  ;;  %v2705_v42 = vrot.slane %v2677_v18, %v3789_v8  ;;  %v2706_v26 = vcombine.low %v2684_v19, %v2691_v20  ;;  %v1425_v27 = vrot.slane %v437_v52, %v3780_v3  ;;  %v4189_v12 = vpop.xlane.xlu0 %406 }
 0x240   :  { %v1429_v28 = vrot.slane %v437_v52, %v3783_v4  ;;  %v1433_v29 = vrot.slane %v437_v52, %v3786_v5  ;;  %v2919_v30 = vcombine.low %v1405_v14, %v1409_v38  ;;  %v2920_v31 = vcombine.low %v1413_v21, %v1417_v22 }
 0x241   :  { %3145 = vperm.xlu0 %3566, %v2820_v25   ;;  %v2707_v32 = vcombine.low %v2698_v15, %v2705_v42  ;;  %v2714_v16 = vrot.slane %v2706_v26, %v3789_v8  ;;  %v2921_v33 = vcombine.low %v1421_v23, %v1425_v27  ;;  %v829_v34 = vrot.slane %v4027_v36, %v3765_v62 }
 0x242   :  { %v2922_v37 = vcombine.low %v1429_v28, %v1433_v29  ;;  %v2929_v39 = vrot.slane %v2919_v30, %v3789_v8  ;;  %v2936_v40 = vrot.slane %v2920_v31, %v3789_v8  ;;  %v833_v44 = vrot.slane %v4027_v36, %v3768_v63 }
 0x243   :  { %v2721_v45 = vrot.slane %v2707_v32, %v3789_v8  ;;  %v2943_v46 = vrot.slane %v2921_v33, %v3789_v8  ;;  %v837_v47 = vrot.slane %v4027_v36, %v3771_v0  ;;  %v841_v48 = vrot.slane %v4027_v36, %v3774_v1 }
 0x244   :  { %v2950_v49 = vrot.slane %v2922_v37, %v3789_v8  ;;  %v2951_v50 = vcombine.low %v2929_v39, %v2936_v40  ;;  %v845_v51 = vrot.slane %v4027_v36, %v3777_v2  ;;  %v849_v52 = vrot.slane %v4027_v36, %v3780_v3 }
 0x245   :  { %v2722_v53 = vcombine.low %v2714_v16, %v2721_v45  ;;  %v853_v54 = vrot.slane %v4027_v36, %v3783_v4  ;;  %v857_v55 = vrot.slane %v4027_v36, %v3786_v5  ;;  %v2037_v56 = vcombine.low %v829_v34, %v833_v44 }
 0x246   :  { %v2952_v58 = vcombine.low %v2943_v46, %v2950_v49  ;;  %v2959_v59 = vrot.slane %v2951_v50, %v3789_v8  ;;  %v2038_v61 = vcombine.low %v837_v47, %v841_v48  ;;  %v2039_v6 = vcombine.low %v845_v51, %v849_v52 }
 0x247   :  { %3139 = vperm.xlu1 %3565, %v2722_v53   ;;  %v2040_v7 = vcombine.low %v853_v54, %v857_v55  ;;  %v2047_v43 = vrot.slane %v2037_v56, %v3789_v8  ;;  %v1373_v9 = vrot.slane %v435_v35, %v3765_v62  ;;  %v1377_v10 = vrot.slane %v435_v35, %v3768_v63 }
 0x248   :  { %v2966_v13 = vrot.slane %v2952_v58, %v3789_v8  ;;  %v2054_v36 = vrot.slane %v2038_v61, %v3789_v8  ;;  %v2061_v14 = vrot.slane %v2039_v6, %v3789_v8  ;;  %v1381_v38 = vrot.slane %v435_v35, %v3771_v0 }
 0x249   :  { %v2068_v17 = vrot.slane %v2040_v7, %v3789_v8  ;;  %v1385_v18 = vrot.slane %v435_v35, %v3774_v1  ;;  %v1389_v19 = vrot.slane %v435_v35, %v3777_v2  ;;  %v1393_v20 = vrot.slane %v435_v35, %v3780_v3  ;;  %v4229_v7 = vpop.xlane.xlu1 %408 }
 0x24a   :  { %v2967_v15 = vcombine.low %v2959_v59, %v2966_v13  ;;  %v2069_v21 = vcombine.low %v2047_v43, %v2054_v36  ;;  %v1397_v22 = vrot.slane %v435_v35, %v3783_v4  ;;  %v1401_v23 = vrot.slane %v435_v35, %v3786_v5  ;;  %v439_v35 = vpop.xlane.xlu0 %438 }
 0x24b   :  { %v2070_v25 = vcombine.low %v2061_v14, %v2068_v17  ;;  %v2870_v42 = vcombine.low %v1373_v9, %v1377_v10  ;;  %v2871_v26 = vcombine.low %v1381_v38, %v1385_v18  ;;  %v2872_v27 = vcombine.low %v1389_v19, %v1393_v20 }
 0x24c   :  { %3154 = vperm.xlu0 %3566, %v2967_v15   ;;  %v2077_v28 = vrot.slane %v2069_v21, %v3789_v8  ;;  %v2873_v29 = vcombine.low %v1397_v22, %v1401_v23  ;;  %v797_v30 = vrot.slane %v4083_v41, %v3765_v62  ;;  %v801_v31 = vrot.slane %v4083_v41, %v3768_v63 }
 0x24d   :  { %v2084_v32 = vrot.slane %v2070_v25, %v3789_v8  ;;  %v2880_v16 = vrot.slane %v2870_v42, %v3789_v8  ;;  %v2887_v33 = vrot.slane %v2871_v26, %v3789_v8  ;;  %v2894_v34 = vrot.slane %v2872_v27, %v3789_v8 }
 0x24e   :  { %v2901_v37 = vrot.slane %v2873_v29, %v3789_v8  ;;  %v805_v39 = vrot.slane %v4083_v41, %v3771_v0  ;;  %v809_v40 = vrot.slane %v4083_v41, %v3774_v1  ;;  %v813_v44 = vrot.slane %v4083_v41, %v3777_v2 }
 0x24f   :  { %v2085_v45 = vcombine.low %v2077_v28, %v2084_v32  ;;  %v2902_v46 = vcombine.low %v2880_v16, %v2887_v33  ;;  %v817_v47 = vrot.slane %v4083_v41, %v3780_v3  ;;  %v821_v48 = vrot.slane %v4083_v41, %v3783_v4  ;;  %v441_v32 = vpop.xlane.xlu1 %440 }
 0x250   :  { %v2903_v49 = vcombine.low %v2894_v34, %v2901_v37  ;;  %v825_v50 = vrot.slane %v4083_v41, %v3786_v5  ;;  %v1988_v51 = vcombine.low %v797_v30, %v801_v31  ;;  %v1989_v52 = vcombine.low %v805_v39, %v809_v40 }
 0x251   :  { %3100 = vperm.xlu1 %3565, %v2085_v45   ;;  %v2910_v53 = vrot.slane %v2902_v46, %v3789_v8  ;;  %v1990_v54 = vcombine.low %v813_v44, %v817_v47  ;;  %v1437_v55 = vrot.slane %v439_v35, %v3765_v62  ;;  %v1441_v56 = vrot.slane %v439_v35, %v3768_v63 }
 0x252   :  { %v2917_v58 = vrot.slane %v2903_v49, %v3789_v8  ;;  %v1991_v59 = vcombine.low %v821_v48, %v825_v50  ;;  %v1998_v61 = vrot.slane %v1988_v51, %v3789_v8  ;;  %v2005_v6 = vrot.slane %v1989_v52, %v3789_v8 }
 0x253   :  { %v2012_v41 = vrot.slane %v1990_v54, %v3789_v8  ;;  %v1445_v43 = vrot.slane %v439_v35, %v3771_v0  ;;  %v1449_v9 = vrot.slane %v439_v35, %v3774_v1  ;;  %v1453_v10 = vrot.slane %v439_v35, %v3777_v2 }
 0x254   :  { %v2918_v13 = vcombine.low %v2910_v53, %v2917_v58  ;;  %v2019_v36 = vrot.slane %v1991_v59, %v3789_v8  ;;  %v2020_v14 = vcombine.low %v1998_v61, %v2005_v6  ;;  %v1457_v38 = vrot.slane %v439_v35, %v3780_v3 }
 0x255   :  { %v1461_v17 = vrot.slane %v439_v35, %v3783_v4  ;;  %v1465_v18 = vrot.slane %v439_v35, %v3786_v5  ;;  %v2968_v19 = vcombine.low %v1437_v55, %v1441_v56  ;;  %v2969_v20 = vcombine.low %v1445_v43, %v1449_v9 }
 0x256   :  { %3151 = vperm.xlu0 %3566, %v2918_v13   ;;  %v2021_v15 = vcombine.low %v2012_v41, %v2019_v36  ;;  %v2028_v21 = vrot.slane %v2020_v14, %v3789_v8  ;;  %v2970_v22 = vcombine.low %v1453_v10, %v1457_v38  ;;  %v893_v23 = vrot.slane %v4113_v24, %v3765_v62 }
 0x257   :  { %v2971_v25 = vcombine.low %v1461_v17, %v1465_v18  ;;  %v2978_v42 = vrot.slane %v2968_v19, %v3789_v8  ;;  %v2985_v26 = vrot.slane %v2969_v20, %v3789_v8  ;;  %v897_v27 = vrot.slane %v4113_v24, %v3768_v63 }
 0x258   :  { %v2035_v28 = vrot.slane %v2021_v15, %v3789_v8  ;;  %v2992_v29 = vrot.slane %v2970_v22, %v3789_v8  ;;  %v901_v30 = vrot.slane %v4113_v24, %v3771_v0  ;;  %v905_v31 = vrot.slane %v4113_v24, %v3774_v1 }
 0x259   :  { %v2999_v16 = vrot.slane %v2971_v25, %v3789_v8  ;;  %v3000_v33 = vcombine.low %v2978_v42, %v2985_v26  ;;  %v909_v34 = vrot.slane %v4113_v24, %v3777_v2  ;;  %v913_v35 = vrot.slane %v4113_v24, %v3780_v3 }
 0x25a   :  { %v2036_v37 = vcombine.low %v2028_v21, %v2035_v28  ;;  %v917_v39 = vrot.slane %v4113_v24, %v3783_v4  ;;  %v921_v40 = vrot.slane %v4113_v24, %v3786_v5  ;;  %v2135_v44 = vcombine.low %v893_v23, %v897_v27 }
 0x25b   :  { %v3001_v45 = vcombine.low %v2992_v29, %v2999_v16  ;;  %v3008_v46 = vrot.slane %v3000_v33, %v3789_v8  ;;  %v2136_v47 = vcombine.low %v901_v30, %v905_v31  ;;  %v2137_v48 = vcombine.low %v909_v34, %v913_v35 }
 0x25c   :  { %3097 = vperm.xlu1 %3565, %v2036_v37   ;;  %v2138_v49 = vcombine.low %v917_v39, %v921_v40  ;;  %v2145_v50 = vrot.slane %v2135_v44, %v3789_v8  ;;  %v1469_v51 = vrot.slane %v441_v32, %v3765_v62  ;;  %v1473_v52 = vrot.slane %v441_v32, %v3768_v63 }
 0x25d   :  { %v3015_v53 = vrot.slane %v3001_v45, %v3789_v8  ;;  %v2152_v54 = vrot.slane %v2136_v47, %v3789_v8  ;;  %v2159_v24 = vrot.slane %v2137_v48, %v3789_v8  ;;  %v1477_v55 = vrot.slane %v441_v32, %v3771_v0 }
 0x25e   :  { %v2166_v56 = vrot.slane %v2138_v49, %v3789_v8  ;;  %v1481_v58 = vrot.slane %v441_v32, %v3774_v1  ;;  %v1485_v59 = vrot.slane %v441_v32, %v3777_v2  ;;  %v1489_v61 = vrot.slane %v441_v32, %v3780_v3 }
 0x25f   :  { %v3016_v6 = vcombine.low %v3008_v46, %v3015_v53  ;;  %v2167_v41 = vcombine.low %v2145_v50, %v2152_v54  ;;  %v1493_v43 = vrot.slane %v441_v32, %v3783_v4  ;;  %v1497_v9 = vrot.slane %v441_v32, %v3786_v5 }
 0x260   :  { %v2168_v10 = vcombine.low %v2159_v24, %v2166_v56  ;;  %v3017_v13 = vcombine.low %v1469_v51, %v1473_v52  ;;  %v3018_v36 = vcombine.low %v1477_v55, %v1481_v58  ;;  %v3019_v14 = vcombine.low %v1485_v59, %v1489_v61 }
 0x261   :  { %3157 = vperm.xlu0 %3566, %v3016_v6   ;;  %v2175_v38 = vrot.slane %v2167_v41, %v3789_v8  ;;  %v3020_v17 = vcombine.low %v1493_v43, %v1497_v9  ;;  %v861_v18 = vrot.slane %v4147_v11, %v3765_v62  ;;  %v865_v19 = vrot.slane %v4147_v11, %v3768_v63 }
 0x262   :  { %v2182_v20 = vrot.slane %v2168_v10, %v3789_v8  ;;  %v3027_v15 = vrot.slane %v3017_v13, %v3789_v8  ;;  %v3034_v21 = vrot.slane %v3018_v36, %v3789_v8  ;;  %v3041_v22 = vrot.slane %v3019_v14, %v3789_v8 }
 0x263   :  { %v3048_v23 = vrot.slane %v3020_v17, %v3789_v8  ;;  %v869_v25 = vrot.slane %v4147_v11, %v3771_v0  ;;  %v873_v42 = vrot.slane %v4147_v11, %v3774_v1  ;;  %v877_v26 = vrot.slane %v4147_v11, %v3777_v2 }
 0x264   :  { %v2183_v27 = vcombine.low %v2175_v38, %v2182_v20  ;;  %v3049_v28 = vcombine.low %v3027_v15, %v3034_v21  ;;  %v881_v29 = vrot.slane %v4147_v11, %v3780_v3  ;;  %v885_v30 = vrot.slane %v4147_v11, %v3783_v4 }
 0x265   :  { %v3050_v31 = vcombine.low %v3041_v22, %v3048_v23  ;;  %v889_v32 = vrot.slane %v4147_v11, %v3786_v5  ;;  %v2086_v16 = vcombine.low %v861_v18, %v865_v19  ;;  %v2087_v33 = vcombine.low %v869_v25, %v873_v42 }
 0x266   :  { %3106 = vperm.xlu1 %3565, %v2183_v27   ;;  %v3057_v34 = vrot.slane %v3049_v28, %v3789_v8  ;;  %v2088_v35 = vcombine.low %v877_v26, %v881_v29  ;;  %v925_v37 = vrot.slane %v4189_v12, %v3765_v62  ;;  %v929_v39 = vrot.slane %v4189_v12, %v3768_v63 }
 0x267   :  { %v3064_v40 = vrot.slane %v3050_v31, %v3789_v8  ;;  %v2089_v44 = vcombine.low %v885_v30, %v889_v32  ;;  %v2096_v45 = vrot.slane %v2086_v16, %v3789_v8  ;;  %v2103_v46 = vrot.slane %v2087_v33, %v3789_v8  ;;  %v3071_v30 = vpop.permute.xlu1 %3070 }
 0x268   :  { %v2110_v11 = vrot.slane %v2088_v35, %v3789_v8  ;;  %v933_v47 = vrot.slane %v4189_v12, %v3771_v0  ;;  %v937_v48 = vrot.slane %v4189_v12, %v3774_v1  ;;  %v941_v49 = vrot.slane %v4189_v12, %v3777_v2  ;;  %v3119_v35 = vpop.permute.xlu0 %3118 }
 0x269   :  { %v3065_v50 = vcombine.low %v3057_v34, %v3064_v40  ;;  %v2117_v51 = vrot.slane %v2089_v44, %v3789_v8  ;;  %v2118_v52 = vcombine.low %v2096_v45, %v2103_v46  ;;  %v945_v53 = vrot.slane %v4189_v12, %v3780_v3 }
 0x26a   :  { %v949_v54 = vrot.slane %v4189_v12, %v3783_v4  ;;  %v953_v24 = vrot.slane %v4189_v12, %v3786_v5  ;;  %v2184_v55 = vcombine.low %v925_v37, %v929_v39  ;;  %v2185_v56 = vcombine.low %v933_v47, %v937_v48 }
 0x26b   :  { %3160 = vperm.xlu0 %3566, %v3065_v50   ;;  %v2119_v58 = vcombine.low %v2110_v11, %v2117_v51  ;;  %v2126_v59 = vrot.slane %v2118_v52, %v3789_v8  ;;  %v2186_v61 = vcombine.low %v941_v49, %v945_v53  ;;  %v957_v6 = vrot.slane %v4229_v7, %v3765_v62  ;;  %v3116_v31 = vpop.permute.xlu1 %3115 }
 0x26c   :  { %v2187_v41 = vcombine.low %v949_v54, %v953_v24  ;;  %v2194_v43 = vrot.slane %v2184_v55, %v3789_v8  ;;  %v2201_v9 = vrot.slane %v2185_v56, %v3789_v8  ;;  %v961_v10 = vrot.slane %v4229_v7, %v3768_v63  ;;  %v3068_v39 = vpop.permute.xlu0 %3067 }
 0x26d   :  { %v2133_v12 = vrot.slane %v2119_v58, %v3789_v8  ;;  %v2208_v13 = vrot.slane %v2186_v61, %v3789_v8  ;;  %v965_v36 = vrot.slane %v4229_v7, %v3771_v0  ;;  %v969_v14 = vrot.slane %v4229_v7, %v3774_v1 }
 0x26e   :  { %v2215_v62 = vrot.slane %v2187_v41, %v3789_v8  ;;  %v2216_v38 = vcombine.low %v2194_v43, %v2201_v9  ;;  %v973_v17 = vrot.slane %v4229_v7, %v3777_v2  ;;  %v977_v18 = vrot.slane %v4229_v7, %v3780_v3 }
 0x26f   :  { %v2134_v63 = vcombine.low %v2126_v59, %v2133_v12  ;;  %v981_v19 = vrot.slane %v4229_v7, %v3783_v4  ;;  %v985_v20 = vrot.slane %v4229_v7, %v3786_v5  ;;  %v2233_v0 = vcombine.low %v957_v6, %v961_v10  ;;  %v4349_v32 = vpop.permute.xlu1 %3076 }
 0x270   :  { %v2217_v15 = vcombine.low %v2208_v13, %v2215_v62  ;;  %v2224_v1 = vrot.slane %v2216_v38, %v3789_v8  ;;  %v2234_v21 = vcombine.low %v965_v36, %v969_v14  ;;  %v2235_v22 = vcombine.low %v973_v17, %v977_v18 }
 0x271   :  { %3103 = vperm.xlu1 %3565, %v2134_v63   ;;  %v2236_v23 = vcombine.low %v981_v19, %v985_v20  ;;  %v2243_v2 = vrot.slane %v2233_v0, %v3789_v8  ;;  %v4366_v51 = vand.u32 127, %v474_v57 }
 0x272   :  { %v2231_v25 = vrot.slane %v2217_v15, %v3789_v8  ;;  %v2250_v3 = vrot.slane %v2234_v21, %v3789_v8  ;;  %v2257_v42 = vrot.slane %v2235_v22, %v3789_v8  ;;  %v3125_v44 = vpop.permute.xlu0 %3124 }
 0x273   :  { %v2264_v4 = vrot.slane %v2236_v23, %v3789_v8  ;;  %v3175_v53 = vadd.s32 4294967280, %v4366_v51  ;;  %v3168_v54 = vadd.s32 4294967288, %v4366_v51  ;;  %v3166_v56 = vsub.s32 %v4366_v51, %v3762_v60 }
 0x274   :  { %v2232_v26 = vcombine.low %v2224_v1, %v2231_v25  ;;  %v2265_v5 = vcombine.low %v2243_v2, %v2250_v3  ;;  %v3182_v58 = vadd.s32 4294967272, %v4366_v51  ;;  %v3189_v61 = vadd.s32 4294967264, %v4366_v51 }
 0x275   :  { %v2266_v7 = vcombine.low %v2257_v42, %v2264_v4  ;;  %v3178_v59 = vsub.s32 %v3175_v53, %v3762_v60  ;;  %v3171_v6 = vsub.s32 %v3168_v54, %v3762_v60  ;;  %v3276_v41 = vrot.slane %v3116_v31, %v3166_v56 }
 0x276   :  { %3109 = vperm.xlu1 %3565, %v2232_v26   ;;  %v2273_v27 = vrot.slane %v2265_v5, %v3789_v8  ;;  %v3185_v10 = vsub.s32 %v3182_v58, %v3762_v60  ;;  %v3192_v12 = vsub.s32 %v3189_v61, %v3762_v60  ;;  %v3203_v13 = vadd.s32 4294967248, %v4366_v51 }
 0x277   :  { %v2280_v28 = vrot.slane %v2266_v7, %v3789_v8  ;;  %v3074_v16 = vpop.permute.xlu1 %3073  ;;  %v3280_v9 = vrot.slane %v3119_v35, %v3171_v6  ;;  %v3167_v62 = vrot.slane %v3068_v39, %v3166_v56  ;;  %v3196_v17 = vadd.s32 4294967256, %v4366_v51 }
 0x278   :  { %v3179_v18 = vrot.slane %v3074_v16, %v3178_v59  ;;  %v3172_v20 = vrot.slane %v3071_v30, %v3171_v6  ;;  %v3290_v0 = vrot.slane %v3125_v44, %v3185_v10  ;;  %v3210_v15 = vadd.s32 4294967240, %v4366_v51 }
 0x279   :  { %v2281_v29 = vcombine.low %v2273_v27, %v2280_v28  ;;  %v3281_v38 = vsel %vm3173_vm0, %v3280_v9, %v3276_v41  ;;  %v3206_v1 = vsub.s32 %v3203_v13, %v3762_v60  ;;  %v3217_v21 = vadd.s32 4294967232, %v4366_v51 }
 0x27a   :  { %v3174_v22 = vsel %vm3173_vm0, %v3172_v20, %v3167_v62  ;;  %v3199_v23 = vsub.s32 %v3196_v17, %v3762_v60  ;;  %v3186_v7 = vrot.slane %v4349_v32, %v3185_v10  ;;  %v3213_v28 = vsub.s32 %v3210_v15, %v3762_v60 }
 0x27b   :  { %3112 = vperm.xlu1 %3565, %v2281_v29   ;;  %v3181_v25 = vsel %vm3180_vm1, %v3179_v18, %v3174_v22  ;;  %v3224_v29 = vadd.s32 4294967224, %v4366_v51  ;;  %v3220_v30 = vsub.s32 %v3217_v21, %v3762_v60  ;;  %v3266_v18 = vadd.s32 4294967176, %v4366_v51 }
 0x27c   :  { %v3122_v33 = vpop.permute.xlu1 %3121  ;;  %v3188_v31 = vsel %vm3187_vm2, %v3186_v7, %v3181_v25 }
 0x27d   :  { %v3285_v43 = vrot.slane %v3122_v33, %v3178_v59  ;;  %v3231_v33 = vadd.s32 4294967216, %v4366_v51  ;;  %v3245_v59 = vadd.s32 4294967200, %v4366_v51 }
 0x27f   :  { %v3286_v63 = vsel %vm3180_vm1, %v3285_v43, %v3281_v38  ;;  %v3252_v43 = vadd.s32 4294967192, %v4366_v51 }
 0x280   :  { %v3291_v2 = vsel %vm3187_vm2, %v3290_v0, %v3286_v63 }
 0x281   :  { %v4351_v34 = vpop.permute.xlu1 %3082  ;;  %v3255_v20 = vsub.s32 %v3252_v43, %v3762_v60 }
 0x287   :  { %v3131_v46 = vpop.permute.xlu0 %3130 }
 0x288   :  { %v3300_v27 = vrot.slane %v3131_v46, %v3199_v23  ;;  %v3227_v46 = vsub.s32 %v3224_v29, %v3762_v60 }
 0x28c   :  { %v4353_v37 = vpop.permute.xlu1 %3079 }
 0x28d   :  { %v3193_v3 = vrot.slane %v4353_v37, %v3192_v12 }
 0x28f   :  { %v3195_v35 = vsel %vm3194_vm3, %v3193_v3, %v3188_v31 }
 0x291   :  { %v4359_v47 = vpop.permute.xlu0 %3136 }
 0x292   :  { %v3310_v44 = vrot.slane %v4359_v47, %v3213_v28 }
 0x296   :  { %v3128_v40 = vpop.permute.xlu1 %3127 }
 0x297   :  { %v3295_v19 = vrot.slane %v3128_v40, %v3192_v12  ;;  %v3200_v40 = vrot.slane %v4351_v34, %v3199_v23 }
 0x299   :  { %v3296_v42 = vsel %vm3194_vm3, %v3295_v19, %v3291_v2  ;;  %v3202_v56 = vsel %vm3201_vm4, %v3200_v40, %v3195_v35 }
 0x29a   :  { %v3301_v16 = vsel %vm3201_vm4, %v3300_v27, %v3296_v42 }
 0x29c   :  { %v4361_v49 = vpop.permute.xlu0 %3094 }
 0x29d   :  { %v3228_v17 = vrot.slane %v4361_v49, %v3227_v46 }
 0x2a1   :  { %v4355_v45 = vpop.permute.xlu1 %3088 }
 0x2a2   :  { %v3214_v61 = vrot.slane %v4355_v45, %v3213_v28  ;;  %v3248_v45 = vsub.s32 %v3245_v59, %v3762_v60 }
 0x2a6   :  { %v4368_v52 = vpop.permute.xlu0 %3142 }
 0x2a7   :  { %v3320_v6 = vrot.slane %v4368_v52, %v3227_v46 }
 0x2ab   :  { %v4357_v11 = vpop.permute.xlu1 %3085 }
 0x2ac   :  { %v3207_v37 = vrot.slane %v4357_v11, %v3206_v1  ;;  %v3234_v11 = vsub.s32 %v3231_v33, %v3762_v60 }
 0x2b1   :  { %v3134_v48 = vpop.permute.xlu1 %3133 }
 0x2b2   :  { %v3305_v4 = vrot.slane %v3134_v48, %v3206_v1  ;;  %v3238_v48 = vadd.s32 4294967208, %v4366_v51 }
 0x2b4   :  { %v3306_v32 = vsel %vm3208_vm5, %v3305_v4, %v3301_v16  ;;  %v3241_v41 = vsub.s32 %v3238_v48, %v3762_v60 }
 0x2b5   :  { %v3311_v58 = vsel %vm3215_vm6, %v3310_v44, %v3306_v32 }
 0x2b6   :  { %v4372_v24 = vpop.permute.xlu0 %3148 }
 0x2b7   :  { %v3330_v19 = vrot.slane %v4372_v24, %v3241_v41 }
 0x2bb   :  { %v4363_v50 = vpop.permute.xlu1 %3091 }
 0x2bc   :  { %v3221_v34 = vrot.slane %v4363_v50, %v3220_v30  ;;  %v3259_v50 = vadd.s32 4294967184, %v4366_v51  ;;  %v3269_v51 = vsub.s32 %v3266_v18, %v3762_v60 }
 0x2be   :  { %v3262_v1 = vsub.s32 %v3259_v50, %v3762_v60 }
 0x2c0   :  { %v4385_v36 = vpop.permute.xlu0 %3145 }
 0x2c1   :  { %v3325_v13 = vrot.slane %v4385_v36, %v3234_v11 }
 0x2c6   :  { %v4374_v55 = vpop.permute.xlu1 %3139 }
 0x2c7   :  { %v3315_v39 = vrot.slane %v4374_v55, %v3220_v30  ;;  %v3209_v55 = vsel %vm3208_vm5, %v3207_v37, %v3202_v56 }
 0x2c8   :  { %v3216_v9 = vsel %vm3215_vm6, %v3214_v61, %v3209_v55 }
 0x2c9   :  { %v3316_v47 = vsel %vm3222_vm7, %v3315_v39, %v3311_v58  ;;  %v3223_v12 = vsel %vm3222_vm7, %v3221_v34, %v3216_v9 }
 0x2ca   :  { %v3321_v10 = vsel %vm3229_vm8, %v3320_v6, %v3316_v47  ;;  %v3230_v0 = vsel %vm3229_vm8, %v3228_v17, %v3223_v12 }
 0x2cb   :  { %v4399_v26 = vpop.permute.xlu0 %3154  ;;  %v3326_v63 = vsel %vm3236_vm9, %v3325_v13, %v3321_v10 }
 0x2cc   :  { %v3331_v49 = vsel %vm3243_vm10, %v3330_v19, %v3326_v63 }
 0x2d0   :  { %v4387_v14 = vpop.permute.xlu1 %3100 }
 0x2d1   :  { %v3242_v22 = vrot.slane %v4387_v14, %v3241_v41 }
 0x2d5   :  { %v3152_v53 = vpop.permute.xlu0 %3151 }
 0x2d6   :  { %v3335_v15 = vrot.slane %v3152_v53, %v3248_v45 }
 0x2d8   :  { %v3336_v25 = vsel %vm3250_vm11, %v3335_v15, %v3331_v49 }
 0x2db   :  { %v3098_v5 = vpop.permute.xlu1 %3097 }
 0x2dc   :  { %v3235_v62 = vrot.slane %v3098_v5, %v3234_v11  ;;  %v3340_v5 = vrot.slane %v4399_v26, %v3255_v20 }
 0x2de   :  { %v3237_v36 = vsel %vm3236_vm9, %v3235_v62, %v3230_v0  ;;  %v3341_v28 = vsel %vm3257_vm12, %v3340_v5, %v3336_v25 }
 0x2df   :  { %v3244_v24 = vsel %vm3243_vm10, %v3242_v22, %v3237_v36 }
 0x2e0   :  { %v3158_v52 = vpop.permute.xlu0 %3157 }
 0x2e1   :  { %v3345_v3 = vrot.slane %v3158_v52, %v3262_v1 }
 0x2e3   :  { %v3346_v60 = vsel %vm3264_vm13, %v3345_v3, %v3341_v28 }
 0x2e5   :  { %v3107_v54 = vpop.permute.xlu1 %3106 }
 0x2e6   :  { %v3256_v7 = vrot.slane %v3107_v54, %v3255_v20 }
 0x2ea   :  { %v3161_v2 = vpop.permute.xlu0 %3160 }
 0x2eb   :  { %v3350_v27 = vrot.slane %v3161_v2, %v3269_v51 }
 0x2ed   :  { %v3351_v16 = vsel %vm3271_vm14, %v3350_v27, %v3346_v60 }
 0x2f0   :  { %v3104_v38 = vpop.permute.xlu1 %3103 }
 0x2f1   :  { %v3249_v21 = vrot.slane %v3104_v38, %v3248_v45 }
 0x2f3   :  { %v3251_v42 = vsel %vm3250_vm11, %v3249_v21, %v3244_v24 }
 0x2f4   :  { %v3258_v29 = vsel %vm3257_vm12, %v3256_v7, %v3251_v42 }
 0x2f5   :  { %v3110_v23 = vpop.permute.xlu1 %3109 }
 0x2f6   :  { %v3263_v4 = vrot.slane %v3110_v23, %v3262_v1 }
 0x2f8   :  { %v3265_v31 = vsel %vm3264_vm13, %v3263_v4, %v3258_v29 }
 0x2fa   :  { %v3113_v14 = vpop.permute.xlu1 %3112 }
 0x2fb   :  { %v3270_v30 = vrot.slane %v3113_v14, %v3269_v51 }
 0x2fd   :  { %v3272_v33 = vsel %vm3271_vm14, %v3270_v30, %v3265_v31 }
 0x2fe   :  { %v3352_v35 = vcombine.low %v3272_v33, %v3351_v16 }
 0x300   :  { %v3359_v37 = vrot.slane %v3352_v35, %v3789_v8 }
 0x302   :  { %v3366_v32 = vrot.slane %v3359_v37, %v3789_v8 }
 0x304   :  { %3372 = vst.msk [vmem:[%s4455_s3] sm:$0x3] %vm3370_vm15, %v3366_v32 }
 0x305   :  { %3381 = vsyncpa [#allocation3], 1 }
 0x306   :  { %3382 = vsyncpa [#allocation5], 1 }

</bundles_post_ra>
